<compile_context>
chip_gen: v7x
topology: tpu7x:2x2x1
jax: 0.10.0
libtpu: 0.0.40
codegen_flags: <defaults>
</compile_context>

<pallas_src>
import functools

import jax
import jax.numpy as jnp
from jax import lax
from jax.experimental import pallas as pl
from jax.experimental.pallas import tpu as pltpu

SOFT_BLEND = 20.0
INIT_BONES = (0, 1, 2, 4, 5, 16, 17, 18, 19)   # I = 9
CVG_THRESH = 1e-5
DVG_THRESH = 1.0
BROYDEN_EPS = 1e-6


# ----------------------------------------------------------------------------
# helpers
# ----------------------------------------------------------------------------
def _softplus_beta(x, beta=100.0, threshold=20.0):
    # matches torch.nn.Softplus(beta=100): returns x where beta*x > threshold
    bx = beta * x
    safe = jnp.minimum(bx, threshold)
    return jnp.where(bx > threshold, x, jnp.log1p(jnp.exp(safe)) / beta)


def _round_up(x, m):
    return ((x + m - 1) // m) * m


# ----------------------------------------------------------------------------
# Fused kernel: query_weights MLP + softmax + forward LBS + full Broyden search
# ----------------------------------------------------------------------------
def _fused_search_kernel(xc0_ref, xdt_ref, tpack_ref,
                         wpa_ref, w1t_ref, w2t_ref, w3a_ref,
                         xc_out_ref, diff_out_ref,
                         *, max_steps, cvg_sq, dvg_sq, eps, n_valid, p_tile):
    f32 = jnp.float32
    xc0 = xc0_ref[0].astype(f32)            # (3, Pt)  canonical init points
    xdt = xdt_ref[0].astype(f32)            # (3, Pt)  deformed target points
    tpack = tpack_ref[0].astype(f32)        # (12, J)  bone transform rows 0..2, packed
    wpa = wpa_ref[...].astype(f32)          # (H, 6)   [w0^T | b0 | b1 | b2]
    w1t = w1t_ref[...].astype(f32)          # (H, H)
    w2t = w2t_ref[...].astype(f32)          # (H, H)
    w3a = w3a_ref[...].astype(f32)          # (J, H+1) [w3^T | b3]
    H = w1t.shape[0]
    w0c = [wpa[:, c:c + 1] for c in range(3)]
    b0 = wpa[:, 3:4]
    b1 = wpa[:, 4:5]
    b2 = wpa[:, 5:6]
    w3t = w3a[:, :H]
    b3 = w3a[:, H:H + 1]

    xd0, xd1, xd2 = xdt[0:1], xdt[1:2], xdt[2:3]          # (1, Pt) components

    def skin(c0, c1, c2):
        # lbs_network MLP (softplus beta=100); layer 0 (K=3 + bias) on the VPU
        h = w0c[0] * c0 + w0c[1] * c1 + w0c[2] * c2 + b0                 # (H, Pt)
        h = _softplus_beta(h)
        h = _softplus_beta(jnp.dot(w1t, h, preferred_element_type=f32) + b1)
        h = _softplus_beta(jnp.dot(w2t, h, preferred_element_type=f32) + b2)
        logits = jnp.dot(w3t, h, preferred_element_type=f32) + b3        # (J, Pt)
        # query_weights: soft_blend * logits, softmax over joints (f32)
        logits = SOFT_BLEND * logits
        logits = logits - jnp.max(logits, axis=0, keepdims=True)
        e = jnp.exp(logits)
        inv = pl.reciprocal(jnp.sum(e, axis=0, keepdims=True), approx=True)
        w = e * inv                                                       # (J, Pt)
        # forward LBS: blended transform rows (one MXU matmul), then apply to (x,1)
        pm = jnp.dot(tpack, w, preferred_element_type=f32)                # (12, Pt)

        def row(rb):
            return (pm[rb:rb + 1] * c0 + pm[rb + 1:rb + 2] * c1
                    + pm[rb + 2:rb + 3] * c2 + pm[rb + 3:rb + 4])
        return (row(0), row(4), row(8)), pm

    x0, x1, x2 = xc0[0:1], xc0[1:2], xc0[2:3]

    # padded tail lanes (beyond the real point count) are excluded from the solve
    tile_base = pl.program_id(1) * p_tile
    lane = tile_base + lax.broadcasted_iota(jnp.int32, x0.shape, 1)
    lane_valid = lane < n_valid

    # ---- initial residual and J_inv_init = inverse of blended 3x3 transform ----
    (y0, y1, y2), pm = skin(x0, x1, x2)
    g0, g1, g2 = y0 - xd0, y1 - xd1, y2 - xd2

    a_, b_, c_ = pm[0:1], pm[1:2], pm[2:3]
    d_, e_, f_ = pm[4:5], pm[5:6], pm[6:7]
    g_, h_, i_ = pm[8:9], pm[9:10], pm[10:11]
    det = a_ * (e_ * i_ - f_ * h_) - b_ * (d_ * i_ - f_ * g_) + c_ * (d_ * h_ - e_ * g_)
    det = jnp.where(lane_valid, det, 1.0)          # guard pad lanes from 1/0
    rdet = 1.0 / det
    J0 = (e_ * i_ - f_ * h_) * rdet
    J1 = (c_ * h_ - b_ * i_) * rdet
    J2 = (b_ * f_ - c_ * e_) * rdet
    J3 = (f_ * g_ - d_ * i_) * rdet
    J4 = (a_ * i_ - c_ * g_) * rdet
    J5 = (c_ * d_ - a_ * f_) * rdet
    J6 = (d_ * h_ - e_ * g_) * rdet
    J7 = (b_ * g_ - a_ * h_) * rdet
    J8 = (a_ * e_ - b_ * d_) * rdet

    gsq = g0 * g0 + g1 * g1 + g2 * g2
    gnsq_opt = jnp.where(lane_valid, gsq, 0.0)                 # squared |gx|_opt
    m = jnp.where(lane_valid, 1.0, 0.0).astype(f32)            # reference: 1st step updates all
    m_max = jnp.max(m)

    carry = (jnp.int32(0), m_max,
             x0, x1, x2, g0, g1, g2,
             J0, J1, J2, J3, J4, J5, J6, J7, J8,
             x0, x1, x2, gnsq_opt, m)

    def cond_fn(c):
        return jnp.logical_and(c[0] < max_steps, c[1] > 0.5)

    def body_fn(c):
        (step, _any, x0, x1, x2, g0, g1, g2,
         J0, J1, J2, J3, J4, J5, J6, J7, J8,
         xo0, xo1, xo2, gnsq_opt, m) = c
        act = m > 0.5
        zero = jnp.zeros_like(m)

        # Broyden update from carried (J, g): equals torch's trailing update = -J_inv.bmm(gx)
        u0 = -(J0 * g0 + J1 * g1 + J2 * g2)
        u1 = -(J3 * g0 + J4 * g1 + J5 * g2)
        u2 = -(J6 * g0 + J7 * g1 + J8 * g2)

        dx0 = jnp.where(act, u0, zero)
        dx1 = jnp.where(act, u1, zero)
        dx2 = jnp.where(act, u2, zero)
        x0, x1, x2 = x0 + dx0, x1 + dx1, x2 + dx2

        (y0, y1, y2), _ = skin(x0, x1, x2)
        dg0 = jnp.where(act, y0 - xd0 - g0, zero)
        dg1 = jnp.where(act, y1 - xd1 - g1, zero)
        dg2 = jnp.where(act, y2 - xd2 - g2, zero)
        g0, g1, g2 = g0 + dg0, g1 + dg1, g2 + dg2

        gsq = g0 * g0 + g1 * g1 + g2 * g2            # squared norm (sqrt deferred)
        better = gsq < gnsq_opt
        gnsq_opt = jnp.where(better, gsq, gnsq_opt)
        xo0 = jnp.where(better, x0, xo0)
        xo1 = jnp.where(better, x1, xo1)
        xo2 = jnp.where(better, x2, xo2)
        m = jnp.where((gnsq_opt > cvg_sq) & (gsq < dvg_sq), 1.0, 0.0).astype(f32)

        # Broyden rank-1 update: J += (dx - J dg) vT / (vT dg +/- eps), vT = dx^T J
        v0 = dx0 * J0 + dx1 * J3 + dx2 * J6
        v1 = dx0 * J1 + dx1 * J4 + dx2 * J7
        v2 = dx0 * J2 + dx1 * J5 + dx2 * J8
        jd0 = J0 * dg0 + J1 * dg1 + J2 * dg2
        jd1 = J3 * dg0 + J4 * dg1 + J5 * dg2
        jd2 = J6 * dg0 + J7 * dg1 + J8 * dg2
        a0, a1, a2 = dx0 - jd0, dx1 - jd1, dx2 - jd2
        denom = v0 * dg0 + v1 * dg1 + v2 * dg2
        denom = denom + jnp.where(denom >= 0.0, eps, -eps)
        r = 1.0 / denom
        J0 = J0 + a0 * v0 * r
        J1 = J1 + a0 * v1 * r
        J2 = J2 + a0 * v2 * r
        J3 = J3 + a1 * v0 * r
        J4 = J4 + a1 * v1 * r
        J5 = J5 + a1 * v2 * r
        J6 = J6 + a2 * v0 * r
        J7 = J7 + a2 * v1 * r
        J8 = J8 + a2 * v2 * r

        return (step + 1, jnp.max(m),
                x0, x1, x2, g0, g1, g2,
                J0, J1, J2, J3, J4, J5, J6, J7, J8,
                xo0, xo1, xo2, gnsq_opt, m)

    carry = lax.while_loop(cond_fn, body_fn, carry)
    (_, _, _, _, _, _, _, _,
     _, _, _, _, _, _, _, _, _,
     xo0, xo1, xo2, gnsq_opt, _) = carry

    # lane-dense stores: P (multiple of 128) is the minor dim; single sqrt at the end
    xc_out_ref[0] = jnp.concatenate([xo0, xo1, xo2], axis=0).astype(xc_out_ref.dtype)
    diff_out_ref[0] = jnp.sqrt(gnsq_opt).astype(diff_out_ref.dtype)


# ----------------------------------------------------------------------------
# ForwardDeformer.forward (eval_mode=True)
# ----------------------------------------------------------------------------
def forward_deformer_eval(xd, cond, tfs, params, max_steps=50, tile_p=256):
    """xd: (B,N,3), tfs: (B,J,4,4) -> xc: (B,N,I,3), others dict"""
    del cond  # lbs_network is not conditioned (cond_layer empty)
    B, N, D = xd.shape
    J = tfs.shape[1]
    n_init = len(INIT_BONES)
    P = N * n_init

    # --- pack bone transforms: tpack[b, 4*i+c, j] = tfs[b, j, i, c] (rows 0..2) ---
    tpack = jnp.transpose(tfs[:, :, :3, :], (0, 2, 3, 1)).reshape(B, 12, J).astype(jnp.float32)

    # --- init(): inverse LBS with one-hot weights, emitted lane-dense (B, 3, P) ---
    tfs_inv = jnp.linalg.inv(tfs)                                 # glue: 4x4 inverse
    tinv_rows = tfs_inv[:, jnp.asarray(INIT_BONES), :3, :]        # (B, I, 3, 4)
    xd_t = jnp.transpose(xd, (0, 2, 1)).astype(jnp.float32)       # (B, 3, N)
    xdh_t = jnp.concatenate([xd_t, jnp.ones((B, 1, N), jnp.float32)], axis=1)   # (B, 4, N)
    xc0_t = jnp.einsum('bkrc,bcn->brnk', tinv_rows, xdh_t).reshape(B, 3, P)     # p = n*I + k
    xdt_t = jnp.repeat(xd_t, n_init, axis=2)                      # repeat_interleave -> (B, 3, P)

    # --- point tile: multiple of 128; ensure >= 2 parallel grid steps (v7x: 2 TCs) ---
    P_TILE = min(int(tile_p), _round_up(P, 128))
    P_TILE = max(128, (P_TILE // 128) * 128)
    Pp = _round_up(P, P_TILE)
    while B * (Pp // P_TILE) < 2 and P_TILE > 128:
        P_TILE = max(128, (P_TILE // 2 // 128) * 128)
        Pp = _round_up(P, P_TILE)
    pad = Pp - P
    if pad:
        xc0_t = jnp.pad(xc0_t, ((0, 0), (0, 0), (0, pad)))
        xdt_t = jnp.pad(xdt_t, ((0, 0), (0, 0), (0, pad)))

    # --- pack MLP params for the transposed (channels, points) layout ---
    wpa = jnp.concatenate([params["w0"].T, params["b0"].T, params["b1"].T, params["b2"].T],
                          axis=1).astype(jnp.float32)                       # (H, 6)
    w1t = params["w1"].T.astype(jnp.float32)                                # (H, H)
    w2t = params["w2"].T.astype(jnp.float32)                                # (H, H)
    w3a = jnp.concatenate([params["w3"].T, params["b3"].T], axis=1).astype(jnp.float32)  # (J, H+1)

    kernel = functools.partial(
        _fused_search_kernel, max_steps=int(max_steps),
        cvg_sq=float(CVG_THRESH) ** 2, dvg_sq=float(DVG_THRESH) ** 2,
        eps=BROYDEN_EPS, n_valid=P, p_tile=P_TILE)

    xc_t, diff = pl.pallas_call(
        kernel,
        out_shape=(jax.ShapeDtypeStruct((B, 3, Pp), jnp.float32),
                   jax.ShapeDtypeStruct((B, 1, Pp), jnp.float32)),
        grid_spec=pltpu.PrefetchScalarGridSpec(
            num_scalar_prefetch=0,
            grid=(B, Pp // P_TILE),
            in_specs=[
                pl.BlockSpec((1, 3, P_TILE), lambda b, p: (b, 0, p)),
                pl.BlockSpec((1, 3, P_TILE), lambda b, p: (b, 0, p)),
                pl.BlockSpec((1, 12, J), lambda b, p: (b, 0, 0)),
                pl.BlockSpec(wpa.shape, lambda b, p: (0, 0)),   # resident across tiles
                pl.BlockSpec(w1t.shape, lambda b, p: (0, 0)),
                pl.BlockSpec(w2t.shape, lambda b, p: (0, 0)),
                pl.BlockSpec(w3a.shape, lambda b, p: (0, 0)),
            ],
            out_specs=[
                pl.BlockSpec((1, 3, P_TILE), lambda b, p: (b, 0, p)),
                pl.BlockSpec((1, 1, P_TILE), lambda b, p: (b, 0, p)),
            ],
        ),
        compiler_params=pltpu.CompilerParams(
            dimension_semantics=("parallel", "parallel")),
    )(xc0_t, xdt_t, tpack, wpa, w1t, w2t, w3a)

    xc_opt = jnp.transpose(xc_t[:, :, :P], (0, 2, 1)).reshape(B, N, n_init, D)
    diff = diff[:, 0, :P].reshape(B, N, n_init)
    others = {"diff": diff, "valid_ids": diff < CVG_THRESH}
    return xc_opt, others


# ----------------------------------------------------------------------------
# deterministic synthetic parameters for the lbs_network MLP
# ----------------------------------------------------------------------------
def init_params(key, d_in=3, hidden=64, n_joints=24):
    k0, k1, k2, k3 = jax.random.split(key, 4)

    def lin(k, fi, fo, scale=1.0):
        return scale * jax.random.normal(k, (fi, fo), jnp.float32) / jnp.sqrt(fi)

    return {
        "w0": lin(k0, d_in, hidden), "b0": jnp.zeros((1, hidden), jnp.float32),
        "w1": lin(k1, hidden, hidden), "b1": jnp.zeros((1, hidden), jnp.float32),
        "w2": lin(k2, hidden, hidden), "b2": jnp.zeros((1, hidden), jnp.float32),
        "w3": lin(k3, hidden, n_joints, scale=0.1), "b3": jnp.zeros((1, n_joints), jnp.float32),
    }


# ----------------------------------------------------------------------------
if __name__ == "__main__":
    key = jax.random.PRNGKey(0)
    k_x, k_t, k_p = jax.random.split(key, 3)

    B, N, J = 2, 8, 24                        # batch, points, bones (SMPL-like)
    xd = 0.5 * jax.random.normal(k_x, (B, N, 3), jnp.float32)

    # near-identity affine bone transforms (invertible), last row = [0,0,0,1]
    noise = 0.05 * jax.random.normal(k_t, (B, J, 4, 4), jnp.float32)
    tfs = jnp.eye(4, dtype=jnp.float32)[None, None] + noise
    tfs = tfs.at[:, :, 3, :].set(jnp.array([0.0, 0.0, 0.0, 1.0], jnp.float32))

    params = init_params(k_p, d_in=3, hidden=64, n_joints=J)

    fwd = jax.jit(functools.partial(forward_deformer_eval, params=params, max_steps=10))
    xc, others = fwd(xd, {}, tfs)
    xc = jax.block_until_ready(xc)

    assert xc.shape == (B, N, len(INIT_BONES), 3), xc.shape
    assert others["valid_ids"].shape == (B, N, len(INIT_BONES))
    assert bool(jnp.all(jnp.isfinite(xc)))
    assert bool(jnp.all(jnp.isfinite(others["diff"])))
    print("KERNEL_OK")
</pallas_src>

<mosaic_0001>
module attributes {stable_mosaic.version = 11 : i64} {
  func.func @_fused_search_kernel(%arg0: i32, %arg1: i32, %arg2: memref<1x3x128xf32, #tpu.memory_space<vmem>>, %arg3: memref<1x3x128xf32, #tpu.memory_space<vmem>>, %arg4: memref<1x12x24xf32, #tpu.memory_space<vmem>>, %arg5: memref<64x6xf32, #tpu.memory_space<vmem>>, %arg6: memref<64x64xf32, #tpu.memory_space<vmem>>, %arg7: memref<64x64xf32, #tpu.memory_space<vmem>>, %arg8: memref<24x65xf32, #tpu.memory_space<vmem>>, %arg9: memref<1x3x128xf32, #tpu.memory_space<vmem>>, %arg10: memref<1x1x128xf32, #tpu.memory_space<vmem>>) attributes {dimension_semantics = [#tpu.dimension_semantics<parallel>, #tpu.dimension_semantics<parallel>], iteration_bounds = array<i64: 2, 1>, scalar_prefetch = 0 : i64, scratch_operands = 0 : i64, tpu.core_type = #tpu.core_type<tc>, window_params = [{transform_indices = @transform_0, window_bounds = array<i64: 1, 3, 128>}, {transform_indices = @transform_1, window_bounds = array<i64: 1, 3, 128>}, {transform_indices = @transform_2, window_bounds = array<i64: 1, 12, 24>}, {pipeline_mode = #tpu.pipeline_mode<synchronous>, transform_indices = @transform_3, window_bounds = array<i64: 64, 6>}, {pipeline_mode = #tpu.pipeline_mode<synchronous>, transform_indices = @transform_4, window_bounds = array<i64: 64, 64>}, {pipeline_mode = #tpu.pipeline_mode<synchronous>, transform_indices = @transform_5, window_bounds = array<i64: 64, 64>}, {pipeline_mode = #tpu.pipeline_mode<synchronous>, transform_indices = @transform_6, window_bounds = array<i64: 24, 65>}, {transform_indices = @transform_7, window_bounds = array<i64: 1, 3, 128>}, {transform_indices = @transform_8, window_bounds = array<i64: 1, 1, 128>}]} {
    %c0 = arith.constant 0 : index
    %c0_0 = arith.constant 0 : index
    %c0_1 = arith.constant 0 : index
    %0 = vector.load %arg2[%c0, %c0_0, %c0_1] : memref<1x3x128xf32, #tpu.memory_space<vmem>>, vector<1x3x128xf32>
    %1 = vector.shape_cast %0 : vector<1x3x128xf32> to vector<3x128xf32>
    %c0_2 = arith.constant 0 : index
    %c0_3 = arith.constant 0 : index
    %c0_4 = arith.constant 0 : index
    %2 = vector.load %arg3[%c0_2, %c0_3, %c0_4] : memref<1x3x128xf32, #tpu.memory_space<vmem>>, vector<1x3x128xf32>
    %3 = vector.shape_cast %2 : vector<1x3x128xf32> to vector<3x128xf32>
    %c0_5 = arith.constant 0 : index
    %c0_6 = arith.constant 0 : index
    %c0_7 = arith.constant 0 : index
    %4 = vector.load %arg4[%c0_5, %c0_6, %c0_7] : memref<1x12x24xf32, #tpu.memory_space<vmem>>, vector<1x12x24xf32>
    %5 = vector.shape_cast %4 : vector<1x12x24xf32> to vector<12x24xf32>
    %c0_8 = arith.constant 0 : index
    %c0_9 = arith.constant 0 : index
    %6 = vector.load %arg5[%c0_8, %c0_9] : memref<64x6xf32, #tpu.memory_space<vmem>>, vector<64x6xf32>
    %c0_10 = arith.constant 0 : index
    %c0_11 = arith.constant 0 : index
    %7 = vector.load %arg6[%c0_10, %c0_11] : memref<64x64xf32, #tpu.memory_space<vmem>>, vector<64x64xf32>
    %c0_12 = arith.constant 0 : index
    %c0_13 = arith.constant 0 : index
    %8 = vector.load %arg7[%c0_12, %c0_13] : memref<64x64xf32, #tpu.memory_space<vmem>>, vector<64x64xf32>
    %c0_14 = arith.constant 0 : index
    %c0_15 = arith.constant 0 : index
    %9 = vector.load %arg8[%c0_14, %c0_15] : memref<24x65xf32, #tpu.memory_space<vmem>>, vector<24x65xf32>
    %10 = vector.extract_strided_slice %6 {offsets = [0, 0], sizes = [64, 1], strides = [1, 1]} : vector<64x6xf32> to vector<64x1xf32>
    %11 = vector.extract_strided_slice %6 {offsets = [0, 1], sizes = [64, 1], strides = [1, 1]} : vector<64x6xf32> to vector<64x1xf32>
    %12 = vector.extract_strided_slice %6 {offsets = [0, 2], sizes = [64, 1], strides = [1, 1]} : vector<64x6xf32> to vector<64x1xf32>
    %13 = vector.extract_strided_slice %6 {offsets = [0, 3], sizes = [64, 1], strides = [1, 1]} : vector<64x6xf32> to vector<64x1xf32>
    %14 = vector.extract_strided_slice %6 {offsets = [0, 4], sizes = [64, 1], strides = [1, 1]} : vector<64x6xf32> to vector<64x1xf32>
    %15 = vector.extract_strided_slice %6 {offsets = [0, 5], sizes = [64, 1], strides = [1, 1]} : vector<64x6xf32> to vector<64x1xf32>
    %16 = vector.extract_strided_slice %9 {offsets = [0, 0], sizes = [24, 64], strides = [1, 1]} : vector<24x65xf32> to vector<24x64xf32>
    %17 = vector.extract_strided_slice %9 {offsets = [0, 64], sizes = [24, 1], strides = [1, 1]} : vector<24x65xf32> to vector<24x1xf32>
    %18 = vector.extract_strided_slice %3 {offsets = [0, 0], sizes = [1, 128], strides = [1, 1]} : vector<3x128xf32> to vector<1x128xf32>
    %19 = vector.extract_strided_slice %3 {offsets = [1, 0], sizes = [1, 128], strides = [1, 1]} : vector<3x128xf32> to vector<1x128xf32>
    %20 = vector.extract_strided_slice %3 {offsets = [2, 0], sizes = [1, 128], strides = [1, 1]} : vector<3x128xf32> to vector<1x128xf32>
    %21 = vector.extract_strided_slice %1 {offsets = [0, 0], sizes = [1, 128], strides = [1, 1]} : vector<3x128xf32> to vector<1x128xf32>
    %22 = vector.extract_strided_slice %1 {offsets = [1, 0], sizes = [1, 128], strides = [1, 1]} : vector<3x128xf32> to vector<1x128xf32>
    %23 = vector.extract_strided_slice %1 {offsets = [2, 0], sizes = [1, 128], strides = [1, 1]} : vector<3x128xf32> to vector<1x128xf32>
    %c128_i32 = arith.constant 128 : i32
    %24 = arith.muli %arg1, %c128_i32 : i32
    %25 = tpu.iota {dimensions = array<i32: 1>} : vector<1x128xi32>
    %26 = vector.broadcast %24 : i32 to vector<1x128xi32>
    %27 = arith.addi %26, %25 : vector<1x128xi32>
    %c72_i32 = arith.constant 72 : i32
    %28 = vector.broadcast %c72_i32 : i32 to vector<1x128xi32>
    %29 = arith.cmpi slt, %27, %28 : vector<1x128xi32>
    %30 = vector.broadcast %10 : vector<64x1xf32> to vector<64x128xf32>
    %31 = vector.broadcast %21 : vector<1x128xf32> to vector<64x128xf32>
    %32 = arith.mulf %30, %31 : vector<64x128xf32>
    %33 = vector.broadcast %11 : vector<64x1xf32> to vector<64x128xf32>
    %34 = vector.broadcast %22 : vector<1x128xf32> to vector<64x128xf32>
    %35 = arith.mulf %33, %34 : vector<64x128xf32>
    %36 = arith.addf %32, %35 : vector<64x128xf32>
    %37 = vector.broadcast %12 : vector<64x1xf32> to vector<64x128xf32>
    %38 = vector.broadcast %23 : vector<1x128xf32> to vector<64x128xf32>
    %39 = arith.mulf %37, %38 : vector<64x128xf32>
    %40 = arith.addf %36, %39 : vector<64x128xf32>
    %41 = vector.broadcast %13 : vector<64x1xf32> to vector<64x128xf32>
    %42 = arith.addf %40, %41 : vector<64x128xf32>
    %cst = arith.constant 1.000000e+02 : f32
    %43 = vector.broadcast %cst : f32 to vector<64x128xf32>
    %44 = arith.mulf %43, %42 : vector<64x128xf32>
    %cst_16 = arith.constant 2.000000e+01 : f32
    %45 = vector.broadcast %cst_16 : f32 to vector<64x128xf32>
    %46 = arith.minimumf %44, %45 : vector<64x128xf32>
    %cst_17 = arith.constant 2.000000e+01 : f32
    %47 = vector.broadcast %cst_17 : f32 to vector<64x128xf32>
    %48 = arith.cmpf ogt, %44, %47 : vector<64x128xf32>
    %49 = math.exp %46 : vector<64x128xf32>
    %50 = math.log1p %49 : vector<64x128xf32>
    %cst_18 = arith.constant 1.000000e+02 : f32
    %51 = vector.broadcast %cst_18 : f32 to vector<64x128xf32>
    %52 = arith.divf %50, %51 : vector<64x128xf32>
    %53 = arith.select %48, %42, %52 : vector<64x128xi1>, vector<64x128xf32>
    %cst_19 = arith.constant dense<0.000000e+00> : vector<64x128xf32>
    %54 = tpu.matmul %7, %53, %cst_19 {dimension_numbers = #tpu.dot_dimension_numbers<[1], [0], [0], [1], [0, 0, 1, 1], [], []>} : vector<64x64xf32>, vector<64x128xf32>, vector<64x128xf32> -> vector<64x128xf32>
    %55 = vector.broadcast %14 : vector<64x1xf32> to vector<64x128xf32>
    %56 = arith.addf %54, %55 : vector<64x128xf32>
    %cst_20 = arith.constant 1.000000e+02 : f32
    %57 = vector.broadcast %cst_20 : f32 to vector<64x128xf32>
    %58 = arith.mulf %57, %56 : vector<64x128xf32>
    %cst_21 = arith.constant 2.000000e+01 : f32
    %59 = vector.broadcast %cst_21 : f32 to vector<64x128xf32>
    %60 = arith.minimumf %58, %59 : vector<64x128xf32>
    %cst_22 = arith.constant 2.000000e+01 : f32
    %61 = vector.broadcast %cst_22 : f32 to vector<64x128xf32>
    %62 = arith.cmpf ogt, %58, %61 : vector<64x128xf32>
    %63 = math.exp %60 : vector<64x128xf32>
    %64 = math.log1p %63 : vector<64x128xf32>
    %cst_23 = arith.constant 1.000000e+02 : f32
    %65 = vector.broadcast %cst_23 : f32 to vector<64x128xf32>
    %66 = arith.divf %64, %65 : vector<64x128xf32>
    %67 = arith.select %62, %56, %66 : vector<64x128xi1>, vector<64x128xf32>
    %cst_24 = arith.constant dense<0.000000e+00> : vector<64x128xf32>
    %68 = tpu.matmul %8, %67, %cst_24 {dimension_numbers = #tpu.dot_dimension_numbers<[1], [0], [0], [1], [0, 0, 1, 1], [], []>} : vector<64x64xf32>, vector<64x128xf32>, vector<64x128xf32> -> vector<64x128xf32>
    %69 = vector.broadcast %15 : vector<64x1xf32> to vector<64x128xf32>
    %70 = arith.addf %68, %69 : vector<64x128xf32>
    %cst_25 = arith.constant 1.000000e+02 : f32
    %71 = vector.broadcast %cst_25 : f32 to vector<64x128xf32>
    %72 = arith.mulf %71, %70 : vector<64x128xf32>
    %cst_26 = arith.constant 2.000000e+01 : f32
    %73 = vector.broadcast %cst_26 : f32 to vector<64x128xf32>
    %74 = arith.minimumf %72, %73 : vector<64x128xf32>
    %cst_27 = arith.constant 2.000000e+01 : f32
    %75 = vector.broadcast %cst_27 : f32 to vector<64x128xf32>
    %76 = arith.cmpf ogt, %72, %75 : vector<64x128xf32>
    %77 = math.exp %74 : vector<64x128xf32>
    %78 = math.log1p %77 : vector<64x128xf32>
    %cst_28 = arith.constant 1.000000e+02 : f32
    %79 = vector.broadcast %cst_28 : f32 to vector<64x128xf32>
    %80 = arith.divf %78, %79 : vector<64x128xf32>
    %81 = arith.select %76, %70, %80 : vector<64x128xi1>, vector<64x128xf32>
    %cst_29 = arith.constant dense<0.000000e+00> : vector<24x128xf32>
    %82 = tpu.matmul %16, %81, %cst_29 {dimension_numbers = #tpu.dot_dimension_numbers<[1], [0], [0], [1], [0, 0, 1, 1], [], []>} : vector<24x64xf32>, vector<64x128xf32>, vector<24x128xf32> -> vector<24x128xf32>
    %83 = vector.broadcast %17 : vector<24x1xf32> to vector<24x128xf32>
    %84 = arith.addf %82, %83 : vector<24x128xf32>
    %cst_30 = arith.constant 2.000000e+01 : f32
    %85 = vector.broadcast %cst_30 : f32 to vector<24x128xf32>
    %86 = arith.mulf %85, %84 : vector<24x128xf32>
    %cst_31 = arith.constant dense<0xFF800000> : vector<128xf32>
    %87 = vector.multi_reduction <maximumf>, %86, %cst_31 [0] : vector<24x128xf32> to vector<128xf32>
    %88 = vector.shape_cast %87 : vector<128xf32> to vector<1x128xf32>
    %89 = vector.broadcast %88 : vector<1x128xf32> to vector<24x128xf32>
    %90 = arith.subf %86, %89 : vector<24x128xf32>
    %91 = math.exp %90 : vector<24x128xf32>
    %cst_32 = arith.constant dense<0.000000e+00> : vector<128xf32>
    %92 = vector.multi_reduction <add>, %91, %cst_32 [0] : vector<24x128xf32> to vector<128xf32>
    %93 = vector.shape_cast %92 : vector<128xf32> to vector<1x128xf32>
    %94 = tpu.reciprocal %93 {approx = true} : vector<1x128xf32> -> vector<1x128xf32>
    %95 = vector.broadcast %94 : vector<1x128xf32> to vector<24x128xf32>
    %96 = arith.mulf %91, %95 : vector<24x128xf32>
    %cst_33 = arith.constant dense<0.000000e+00> : vector<12x128xf32>
    %97 = tpu.matmul %5, %96, %cst_33 {dimension_numbers = #tpu.dot_dimension_numbers<[1], [0], [0], [1], [0, 0, 1, 1], [], []>} : vector<12x24xf32>, vector<24x128xf32>, vector<12x128xf32> -> vector<12x128xf32>
    %98 = vector.extract_strided_slice %97 {offsets = [0, 0], sizes = [1, 128], strides = [1, 1]} : vector<12x128xf32> to vector<1x128xf32>
    %99 = arith.mulf %98, %21 : vector<1x128xf32>
    %100 = vector.extract_strided_slice %97 {offsets = [1, 0], sizes = [1, 128], strides = [1, 1]} : vector<12x128xf32> to vector<1x128xf32>
    %101 = arith.mulf %100, %22 : vector<1x128xf32>
    %102 = arith.addf %99, %101 : vector<1x128xf32>
    %103 = vector.extract_strided_slice %97 {offsets = [2, 0], sizes = [1, 128], strides = [1, 1]} : vector<12x128xf32> to vector<1x128xf32>
    %104 = arith.mulf %103, %23 : vector<1x128xf32>
    %105 = arith.addf %102, %104 : vector<1x128xf32>
    %106 = vector.extract_strided_slice %97 {offsets = [3, 0], sizes = [1, 128], strides = [1, 1]} : vector<12x128xf32> to vector<1x128xf32>
    %107 = arith.addf %105, %106 : vector<1x128xf32>
    %108 = vector.extract_strided_slice %97 {offsets = [4, 0], sizes = [1, 128], strides = [1, 1]} : vector<12x128xf32> to vector<1x128xf32>
    %109 = arith.mulf %108, %21 : vector<1x128xf32>
    %110 = vector.extract_strided_slice %97 {offsets = [5, 0], sizes = [1, 128], strides = [1, 1]} : vector<12x128xf32> to vector<1x128xf32>
    %111 = arith.mulf %110, %22 : vector<1x128xf32>
    %112 = arith.addf %109, %111 : vector<1x128xf32>
    %113 = vector.extract_strided_slice %97 {offsets = [6, 0], sizes = [1, 128], strides = [1, 1]} : vector<12x128xf32> to vector<1x128xf32>
    %114 = arith.mulf %113, %23 : vector<1x128xf32>
    %115 = arith.addf %112, %114 : vector<1x128xf32>
    %116 = vector.extract_strided_slice %97 {offsets = [7, 0], sizes = [1, 128], strides = [1, 1]} : vector<12x128xf32> to vector<1x128xf32>
    %117 = arith.addf %115, %116 : vector<1x128xf32>
    %118 = vector.extract_strided_slice %97 {offsets = [8, 0], sizes = [1, 128], strides = [1, 1]} : vector<12x128xf32> to vector<1x128xf32>
    %119 = arith.mulf %118, %21 : vector<1x128xf32>
    %120 = vector.extract_strided_slice %97 {offsets = [9, 0], sizes = [1, 128], strides = [1, 1]} : vector<12x128xf32> to vector<1x128xf32>
    %121 = arith.mulf %120, %22 : vector<1x128xf32>
    %122 = arith.addf %119, %121 : vector<1x128xf32>
    %123 = vector.extract_strided_slice %97 {offsets = [10, 0], sizes = [1, 128], strides = [1, 1]} : vector<12x128xf32> to vector<1x128xf32>
    %124 = arith.mulf %123, %23 : vector<1x128xf32>
    %125 = arith.addf %122, %124 : vector<1x128xf32>
    %126 = vector.extract_strided_slice %97 {offsets = [11, 0], sizes = [1, 128], strides = [1, 1]} : vector<12x128xf32> to vector<1x128xf32>
    %127 = arith.addf %125, %126 : vector<1x128xf32>
    %128 = arith.subf %107, %18 : vector<1x128xf32>
    %129 = arith.subf %117, %19 : vector<1x128xf32>
    %130 = arith.subf %127, %20 : vector<1x128xf32>
    %131 = vector.extract_strided_slice %97 {offsets = [0, 0], sizes = [1, 128], strides = [1, 1]} : vector<12x128xf32> to vector<1x128xf32>
    %132 = vector.extract_strided_slice %97 {offsets = [1, 0], sizes = [1, 128], strides = [1, 1]} : vector<12x128xf32> to vector<1x128xf32>
    %133 = vector.extract_strided_slice %97 {offsets = [2, 0], sizes = [1, 128], strides = [1, 1]} : vector<12x128xf32> to vector<1x128xf32>
    %134 = vector.extract_strided_slice %97 {offsets = [4, 0], sizes = [1, 128], strides = [1, 1]} : vector<12x128xf32> to vector<1x128xf32>
    %135 = vector.extract_strided_slice %97 {offsets = [5, 0], sizes = [1, 128], strides = [1, 1]} : vector<12x128xf32> to vector<1x128xf32>
    %136 = vector.extract_strided_slice %97 {offsets = [6, 0], sizes = [1, 128], strides = [1, 1]} : vector<12x128xf32> to vector<1x128xf32>
    %137 = vector.extract_strided_slice %97 {offsets = [8, 0], sizes = [1, 128], strides = [1, 1]} : vector<12x128xf32> to vector<1x128xf32>
    %138 = vector.extract_strided_slice %97 {offsets = [9, 0], sizes = [1, 128], strides = [1, 1]} : vector<12x128xf32> to vector<1x128xf32>
    %139 = vector.extract_strided_slice %97 {offsets = [10, 0], sizes = [1, 128], strides = [1, 1]} : vector<12x128xf32> to vector<1x128xf32>
    %140 = arith.mulf %135, %139 : vector<1x128xf32>
    %141 = arith.mulf %136, %138 : vector<1x128xf32>
    %142 = arith.subf %140, %141 : vector<1x128xf32>
    %143 = arith.mulf %131, %142 : vector<1x128xf32>
    %144 = arith.mulf %134, %139 : vector<1x128xf32>
    %145 = arith.mulf %136, %137 : vector<1x128xf32>
    %146 = arith.subf %144, %145 : vector<1x128xf32>
    %147 = arith.mulf %132, %146 : vector<1x128xf32>
    %148 = arith.subf %143, %147 : vector<1x128xf32>
    %149 = arith.mulf %134, %138 : vector<1x128xf32>
    %150 = arith.mulf %135, %137 : vector<1x128xf32>
    %151 = arith.subf %149, %150 : vector<1x128xf32>
    %152 = arith.mulf %133, %151 : vector<1x128xf32>
    %153 = arith.addf %148, %152 : vector<1x128xf32>
    %cst_34 = arith.constant 1.000000e+00 : f32
    %154 = vector.broadcast %cst_34 : f32 to vector<1x128xf32>
    %155 = arith.select %29, %153, %154 : vector<1x128xi1>, vector<1x128xf32>
    %cst_35 = arith.constant 1.000000e+00 : f32
    %156 = vector.broadcast %cst_35 : f32 to vector<1x128xf32>
    %157 = arith.divf %156, %155 : vector<1x128xf32>
    %158 = arith.mulf %135, %139 : vector<1x128xf32>
    %159 = arith.mulf %136, %138 : vector<1x128xf32>
    %160 = arith.subf %158, %159 : vector<1x128xf32>
    %161 = arith.mulf %160, %157 : vector<1x128xf32>
    %162 = arith.mulf %133, %138 : vector<1x128xf32>
    %163 = arith.mulf %132, %139 : vector<1x128xf32>
    %164 = arith.subf %162, %163 : vector<1x128xf32>
    %165 = arith.mulf %164, %157 : vector<1x128xf32>
    %166 = arith.mulf %132, %136 : vector<1x128xf32>
    %167 = arith.mulf %133, %135 : vector<1x128xf32>
    %168 = arith.subf %166, %167 : vector<1x128xf32>
    %169 = arith.mulf %168, %157 : vector<1x128xf32>
    %170 = arith.mulf %136, %137 : vector<1x128xf32>
    %171 = arith.mulf %134, %139 : vector<1x128xf32>
    %172 = arith.subf %170, %171 : vector<1x128xf32>
    %173 = arith.mulf %172, %157 : vector<1x128xf32>
    %174 = arith.mulf %131, %139 : vector<1x128xf32>
    %175 = arith.mulf %133, %137 : vector<1x128xf32>
    %176 = arith.subf %174, %175 : vector<1x128xf32>
    %177 = arith.mulf %176, %157 : vector<1x128xf32>
    %178 = arith.mulf %133, %134 : vector<1x128xf32>
    %179 = arith.mulf %131, %136 : vector<1x128xf32>
    %180 = arith.subf %178, %179 : vector<1x128xf32>
    %181 = arith.mulf %180, %157 : vector<1x128xf32>
    %182 = arith.mulf %134, %138 : vector<1x128xf32>
    %183 = arith.mulf %135, %137 : vector<1x128xf32>
    %184 = arith.subf %182, %183 : vector<1x128xf32>
    %185 = arith.mulf %184, %157 : vector<1x128xf32>
    %186 = arith.mulf %132, %137 : vector<1x128xf32>
    %187 = arith.mulf %131, %138 : vector<1x128xf32>
    %188 = arith.subf %186, %187 : vector<1x128xf32>
    %189 = arith.mulf %188, %157 : vector<1x128xf32>
    %190 = arith.mulf %131, %135 : vector<1x128xf32>
    %191 = arith.mulf %132, %134 : vector<1x128xf32>
    %192 = arith.subf %190, %191 : vector<1x128xf32>
    %193 = arith.mulf %192, %157 : vector<1x128xf32>
    %194 = arith.mulf %128, %128 : vector<1x128xf32>
    %195 = arith.mulf %129, %129 : vector<1x128xf32>
    %196 = arith.addf %194, %195 : vector<1x128xf32>
    %197 = arith.mulf %130, %130 : vector<1x128xf32>
    %198 = arith.addf %196, %197 : vector<1x128xf32>
    %cst_36 = arith.constant 0.000000e+00 : f32
    %199 = vector.broadcast %cst_36 : f32 to vector<1x128xf32>
    %200 = arith.select %29, %198, %199 : vector<1x128xi1>, vector<1x128xf32>
    %cst_37 = arith.constant 1.000000e+00 : f32
    %cst_38 = arith.constant 0.000000e+00 : f32
    %201 = vector.broadcast %cst_37 : f32 to vector<1x128xf32>
    %202 = vector.broadcast %cst_38 : f32 to vector<1x128xf32>
    %203 = arith.select %29, %201, %202 : vector<1x128xi1>, vector<1x128xf32>
    %204 = vector.shape_cast %203 : vector<1x128xf32> to vector<1x1x128xf32>
    %cst_39 = arith.constant dense<0xFF800000> : vector<1xf32>
    %205 = vector.multi_reduction <maximumf>, %204, %cst_39 [1, 2] : vector<1x1x128xf32> to vector<1xf32>
    %206 = vector.shape_cast %205 : vector<1xf32> to vector<1x1x1xf32>
    %207 = vector.extract %206[0, 0, 0] : f32 from vector<1x1x1xf32>
    %c0_i32 = arith.constant 0 : i32
    %208:22 = scf.while (%arg11 = %c0_i32, %arg12 = %207, %arg13 = %21, %arg14 = %22, %arg15 = %23, %arg16 = %128, %arg17 = %129, %arg18 = %130, %arg19 = %161, %arg20 = %165, %arg21 = %169, %arg22 = %173, %arg23 = %177, %arg24 = %181, %arg25 = %185, %arg26 = %189, %arg27 = %193, %arg28 = %21, %arg29 = %22, %arg30 = %23, %arg31 = %200, %arg32 = %203) : (i32, f32, vector<1x128xf32>, vector<1x128xf32>, vector<1x128xf32>, vector<1x128xf32>, vector<1x128xf32>, vector<1x128xf32>, vector<1x128xf32>, vector<1x128xf32>, vector<1x128xf32>, vector<1x128xf32>, vector<1x128xf32>, vector<1x128xf32>, vector<1x128xf32>, vector<1x128xf32>, vector<1x128xf32>, vector<1x128xf32>, vector<1x128xf32>, vector<1x128xf32>, vector<1x128xf32>, vector<1x128xf32>) -> (i32, f32, vector<1x128xf32>, vector<1x128xf32>, vector<1x128xf32>, vector<1x128xf32>, vector<1x128xf32>, vector<1x128xf32>, vector<1x128xf32>, vector<1x128xf32>, vector<1x128xf32>, vector<1x128xf32>, vector<1x128xf32>, vector<1x128xf32>, vector<1x128xf32>, vector<1x128xf32>, vector<1x128xf32>, vector<1x128xf32>, vector<1x128xf32>, vector<1x128xf32>, vector<1x128xf32>, vector<1x128xf32>) {
      %c10_i32 = arith.constant 10 : i32
      %217 = arith.cmpi slt, %arg11, %c10_i32 : i32
      %cst_46 = arith.constant 5.000000e-01 : f32
      %218 = arith.cmpf ogt, %arg12, %cst_46 : f32
      %219 = arith.andi %217, %218 : i1
      scf.condition(%219) %arg11, %arg12, %arg13, %arg14, %arg15, %arg16, %arg17, %arg18, %arg19, %arg20, %arg21, %arg22, %arg23, %arg24, %arg25, %arg26, %arg27, %arg28, %arg29, %arg30, %arg31, %arg32 : i32, f32, vector<1x128xf32>, vector<1x128xf32>, vector<1x128xf32>, vector<1x128xf32>, vector<1x128xf32>, vector<1x128xf32>, vector<1x128xf32>, vector<1x128xf32>, vector<1x128xf32>, vector<1x128xf32>, vector<1x128xf32>, vector<1x128xf32>, vector<1x128xf32>, vector<1x128xf32>, vector<1x128xf32>, vector<1x128xf32>, vector<1x128xf32>, vector<1x128xf32>, vector<1x128xf32>, vector<1x128xf32>
    } do {
    ^bb0(%arg11: i32, %arg12: f32, %arg13: vector<1x128xf32>, %arg14: vector<1x128xf32>, %arg15: vector<1x128xf32>, %arg16: vector<1x128xf32>, %arg17: vector<1x128xf32>, %arg18: vector<1x128xf32>, %arg19: vector<1x128xf32>, %arg20: vector<1x128xf32>, %arg21: vector<1x128xf32>, %arg22: vector<1x128xf32>, %arg23: vector<1x128xf32>, %arg24: vector<1x128xf32>, %arg25: vector<1x128xf32>, %arg26: vector<1x128xf32>, %arg27: vector<1x128xf32>, %arg28: vector<1x128xf32>, %arg29: vector<1x128xf32>, %arg30: vector<1x128xf32>, %arg31: vector<1x128xf32>, %arg32: vector<1x128xf32>):
      %cst_46 = arith.constant 5.000000e-01 : f32
      %217 = vector.broadcast %cst_46 : f32 to vector<1x128xf32>
      %218 = arith.cmpf ogt, %arg32, %217 : vector<1x128xf32>
      %cst_47 = arith.constant 0.000000e+00 : f32
      %219 = vector.broadcast %cst_47 : f32 to vector<1x128xf32>
      %220 = arith.mulf %arg19, %arg16 : vector<1x128xf32>
      %221 = arith.mulf %arg20, %arg17 : vector<1x128xf32>
      %222 = arith.addf %220, %221 : vector<1x128xf32>
      %223 = arith.mulf %arg21, %arg18 : vector<1x128xf32>
      %224 = arith.addf %222, %223 : vector<1x128xf32>
      %cst_48 = arith.constant 0.000000e+00 : f32
      %225 = vector.broadcast %cst_48 : f32 to vector<1x128xf32>
      %226 = arith.subf %225, %224 : vector<1x128xf32>
      %227 = arith.mulf %arg22, %arg16 : vector<1x128xf32>
      %228 = arith.mulf %arg23, %arg17 : vector<1x128xf32>
      %229 = arith.addf %227, %228 : vector<1x128xf32>
      %230 = arith.mulf %arg24, %arg18 : vector<1x128xf32>
      %231 = arith.addf %229, %230 : vector<1x128xf32>
      %cst_49 = arith.constant 0.000000e+00 : f32
      %232 = vector.broadcast %cst_49 : f32 to vector<1x128xf32>
      %233 = arith.subf %232, %231 : vector<1x128xf32>
      %234 = arith.mulf %arg25, %arg16 : vector<1x128xf32>
      %235 = arith.mulf %arg26, %arg17 : vector<1x128xf32>
      %236 = arith.addf %234, %235 : vector<1x128xf32>
      %237 = arith.mulf %arg27, %arg18 : vector<1x128xf32>
      %238 = arith.addf %236, %237 : vector<1x128xf32>
      %cst_50 = arith.constant 0.000000e+00 : f32
      %239 = vector.broadcast %cst_50 : f32 to vector<1x128xf32>
      %240 = arith.subf %239, %238 : vector<1x128xf32>
      %241 = arith.select %218, %226, %219 : vector<1x128xi1>, vector<1x128xf32>
      %242 = arith.select %218, %233, %219 : vector<1x128xi1>, vector<1x128xf32>
      %243 = arith.select %218, %240, %219 : vector<1x128xi1>, vector<1x128xf32>
      %244 = arith.addf %arg13, %241 : vector<1x128xf32>
      %245 = arith.addf %arg14, %242 : vector<1x128xf32>
      %246 = arith.addf %arg15, %243 : vector<1x128xf32>
      %247 = vector.broadcast %10 : vector<64x1xf32> to vector<64x128xf32>
      %248 = vector.broadcast %244 : vector<1x128xf32> to vector<64x128xf32>
      %249 = arith.mulf %247, %248 : vector<64x128xf32>
      %250 = vector.broadcast %11 : vector<64x1xf32> to vector<64x128xf32>
      %251 = vector.broadcast %245 : vector<1x128xf32> to vector<64x128xf32>
      %252 = arith.mulf %250, %251 : vector<64x128xf32>
      %253 = arith.addf %249, %252 : vector<64x128xf32>
      %254 = vector.broadcast %12 : vector<64x1xf32> to vector<64x128xf32>
      %255 = vector.broadcast %246 : vector<1x128xf32> to vector<64x128xf32>
      %256 = arith.mulf %254, %255 : vector<64x128xf32>
      %257 = arith.addf %253, %256 : vector<64x128xf32>
      %258 = vector.broadcast %13 : vector<64x1xf32> to vector<64x128xf32>
      %259 = arith.addf %257, %258 : vector<64x128xf32>
      %cst_51 = arith.constant 1.000000e+02 : f32
      %260 = vector.broadcast %cst_51 : f32 to vector<64x128xf32>
      %261 = arith.mulf %260, %259 : vector<64x128xf32>
      %cst_52 = arith.constant 2.000000e+01 : f32
      %262 = vector.broadcast %cst_52 : f32 to vector<64x128xf32>
      %263 = arith.minimumf %261, %262 : vector<64x128xf32>
      %cst_53 = arith.constant 2.000000e+01 : f32
      %264 = vector.broadcast %cst_53 : f32 to vector<64x128xf32>
      %265 = arith.cmpf ogt, %261, %264 : vector<64x128xf32>
      %266 = math.exp %263 : vector<64x128xf32>
      %267 = math.log1p %266 : vector<64x128xf32>
      %cst_54 = arith.constant 1.000000e+02 : f32
      %268 = vector.broadcast %cst_54 : f32 to vector<64x128xf32>
      %269 = arith.divf %267, %268 : vector<64x128xf32>
      %270 = arith.select %265, %259, %269 : vector<64x128xi1>, vector<64x128xf32>
      %cst_55 = arith.constant dense<0.000000e+00> : vector<64x128xf32>
      %271 = tpu.matmul %7, %270, %cst_55 {dimension_numbers = #tpu.dot_dimension_numbers<[1], [0], [0], [1], [0, 0, 1, 1], [], []>} : vector<64x64xf32>, vector<64x128xf32>, vector<64x128xf32> -> vector<64x128xf32>
      %272 = vector.broadcast %14 : vector<64x1xf32> to vector<64x128xf32>
      %273 = arith.addf %271, %272 : vector<64x128xf32>
      %cst_56 = arith.constant 1.000000e+02 : f32
      %274 = vector.broadcast %cst_56 : f32 to vector<64x128xf32>
      %275 = arith.mulf %274, %273 : vector<64x128xf32>
      %cst_57 = arith.constant 2.000000e+01 : f32
      %276 = vector.broadcast %cst_57 : f32 to vector<64x128xf32>
      %277 = arith.minimumf %275, %276 : vector<64x128xf32>
      %cst_58 = arith.constant 2.000000e+01 : f32
      %278 = vector.broadcast %cst_58 : f32 to vector<64x128xf32>
      %279 = arith.cmpf ogt, %275, %278 : vector<64x128xf32>
      %280 = math.exp %277 : vector<64x128xf32>
      %281 = math.log1p %280 : vector<64x128xf32>
      %cst_59 = arith.constant 1.000000e+02 : f32
      %282 = vector.broadcast %cst_59 : f32 to vector<64x128xf32>
      %283 = arith.divf %281, %282 : vector<64x128xf32>
      %284 = arith.select %279, %273, %283 : vector<64x128xi1>, vector<64x128xf32>
      %cst_60 = arith.constant dense<0.000000e+00> : vector<64x128xf32>
      %285 = tpu.matmul %8, %284, %cst_60 {dimension_numbers = #tpu.dot_dimension_numbers<[1], [0], [0], [1], [0, 0, 1, 1], [], []>} : vector<64x64xf32>, vector<64x128xf32>, vector<64x128xf32> -> vector<64x128xf32>
      %286 = vector.broadcast %15 : vector<64x1xf32> to vector<64x128xf32>
      %287 = arith.addf %285, %286 : vector<64x128xf32>
      %cst_61 = arith.constant 1.000000e+02 : f32
      %288 = vector.broadcast %cst_61 : f32 to vector<64x128xf32>
      %289 = arith.mulf %288, %287 : vector<64x128xf32>
      %cst_62 = arith.constant 2.000000e+01 : f32
      %290 = vector.broadcast %cst_62 : f32 to vector<64x128xf32>
      %291 = arith.minimumf %289, %290 : vector<64x128xf32>
      %cst_63 = arith.constant 2.000000e+01 : f32
      %292 = vector.broadcast %cst_63 : f32 to vector<64x128xf32>
      %293 = arith.cmpf ogt, %289, %292 : vector<64x128xf32>
      %294 = math.exp %291 : vector<64x128xf32>
      %295 = math.log1p %294 : vector<64x128xf32>
      %cst_64 = arith.constant 1.000000e+02 : f32
      %296 = vector.broadcast %cst_64 : f32 to vector<64x128xf32>
      %297 = arith.divf %295, %296 : vector<64x128xf32>
      %298 = arith.select %293, %287, %297 : vector<64x128xi1>, vector<64x128xf32>
      %cst_65 = arith.constant dense<0.000000e+00> : vector<24x128xf32>
      %299 = tpu.matmul %16, %298, %cst_65 {dimension_numbers = #tpu.dot_dimension_numbers<[1], [0], [0], [1], [0, 0, 1, 1], [], []>} : vector<24x64xf32>, vector<64x128xf32>, vector<24x128xf32> -> vector<24x128xf32>
      %300 = vector.broadcast %17 : vector<24x1xf32> to vector<24x128xf32>
      %301 = arith.addf %299, %300 : vector<24x128xf32>
      %cst_66 = arith.constant 2.000000e+01 : f32
      %302 = vector.broadcast %cst_66 : f32 to vector<24x128xf32>
      %303 = arith.mulf %302, %301 : vector<24x128xf32>
      %cst_67 = arith.constant dense<0xFF800000> : vector<128xf32>
      %304 = vector.multi_reduction <maximumf>, %303, %cst_67 [0] : vector<24x128xf32> to vector<128xf32>
      %305 = vector.shape_cast %304 : vector<128xf32> to vector<1x128xf32>
      %306 = vector.broadcast %305 : vector<1x128xf32> to vector<24x128xf32>
      %307 = arith.subf %303, %306 : vector<24x128xf32>
      %308 = math.exp %307 : vector<24x128xf32>
      %cst_68 = arith.constant dense<0.000000e+00> : vector<128xf32>
      %309 = vector.multi_reduction <add>, %308, %cst_68 [0] : vector<24x128xf32> to vector<128xf32>
      %310 = vector.shape_cast %309 : vector<128xf32> to vector<1x128xf32>
      %311 = tpu.reciprocal %310 {approx = true} : vector<1x128xf32> -> vector<1x128xf32>
      %312 = vector.broadcast %311 : vector<1x128xf32> to vector<24x128xf32>
      %313 = arith.mulf %308, %312 : vector<24x128xf32>
      %cst_69 = arith.constant dense<0.000000e+00> : vector<12x128xf32>
      %314 = tpu.matmul %5, %313, %cst_69 {dimension_numbers = #tpu.dot_dimension_numbers<[1], [0], [0], [1], [0, 0, 1, 1], [], []>} : vector<12x24xf32>, vector<24x128xf32>, vector<12x128xf32> -> vector<12x128xf32>
      %315 = vector.extract_strided_slice %314 {offsets = [0, 0], sizes = [1, 128], strides = [1, 1]} : vector<12x128xf32> to vector<1x128xf32>
      %316 = arith.mulf %315, %244 : vector<1x128xf32>
      %317 = vector.extract_strided_slice %314 {offsets = [1, 0], sizes = [1, 128], strides = [1, 1]} : vector<12x128xf32> to vector<1x128xf32>
      %318 = arith.mulf %317, %245 : vector<1x128xf32>
      %319 = arith.addf %316, %318 : vector<1x128xf32>
      %320 = vector.extract_strided_slice %314 {offsets = [2, 0], sizes = [1, 128], strides = [1, 1]} : vector<12x128xf32> to vector<1x128xf32>
      %321 = arith.mulf %320, %246 : vector<1x128xf32>
      %322 = arith.addf %319, %321 : vector<1x128xf32>
      %323 = vector.extract_strided_slice %314 {offsets = [3, 0], sizes = [1, 128], strides = [1, 1]} : vector<12x128xf32> to vector<1x128xf32>
      %324 = arith.addf %322, %323 : vector<1x128xf32>
      %325 = vector.extract_strided_slice %314 {offsets = [4, 0], sizes = [1, 128], strides = [1, 1]} : vector<12x128xf32> to vector<1x128xf32>
      %326 = arith.mulf %325, %244 : vector<1x128xf32>
      %327 = vector.extract_strided_slice %314 {offsets = [5, 0], sizes = [1, 128], strides = [1, 1]} : vector<12x128xf32> to vector<1x128xf32>
      %328 = arith.mulf %327, %245 : vector<1x128xf32>
      %329 = arith.addf %326, %328 : vector<1x128xf32>
      %330 = vector.extract_strided_slice %314 {offsets = [6, 0], sizes = [1, 128], strides = [1, 1]} : vector<12x128xf32> to vector<1x128xf32>
      %331 = arith.mulf %330, %246 : vector<1x128xf32>
      %332 = arith.addf %329, %331 : vector<1x128xf32>
      %333 = vector.extract_strided_slice %314 {offsets = [7, 0], sizes = [1, 128], strides = [1, 1]} : vector<12x128xf32> to vector<1x128xf32>
      %334 = arith.addf %332, %333 : vector<1x128xf32>
      %335 = vector.extract_strided_slice %314 {offsets = [8, 0], sizes = [1, 128], strides = [1, 1]} : vector<12x128xf32> to vector<1x128xf32>
      %336 = arith.mulf %335, %244 : vector<1x128xf32>
      %337 = vector.extract_strided_slice %314 {offsets = [9, 0], sizes = [1, 128], strides = [1, 1]} : vector<12x128xf32> to vector<1x128xf32>
      %338 = arith.mulf %337, %245 : vector<1x128xf32>
      %339 = arith.addf %336, %338 : vector<1x128xf32>
      %340 = vector.extract_strided_slice %314 {offsets = [10, 0], sizes = [1, 128], strides = [1, 1]} : vector<12x128xf32> to vector<1x128xf32>
      %341 = arith.mulf %340, %246 : vector<1x128xf32>
      %342 = arith.addf %339, %341 : vector<1x128xf32>
      %343 = vector.extract_strided_slice %314 {offsets = [11, 0], sizes = [1, 128], strides = [1, 1]} : vector<12x128xf32> to vector<1x128xf32>
      %344 = arith.addf %342, %343 : vector<1x128xf32>
      %345 = arith.subf %324, %18 : vector<1x128xf32>
      %346 = arith.subf %345, %arg16 : vector<1x128xf32>
      %347 = arith.select %218, %346, %219 : vector<1x128xi1>, vector<1x128xf32>
      %348 = arith.subf %334, %19 : vector<1x128xf32>
      %349 = arith.subf %348, %arg17 : vector<1x128xf32>
      %350 = arith.select %218, %349, %219 : vector<1x128xi1>, vector<1x128xf32>
      %351 = arith.subf %344, %20 : vector<1x128xf32>
      %352 = arith.subf %351, %arg18 : vector<1x128xf32>
      %353 = arith.select %218, %352, %219 : vector<1x128xi1>, vector<1x128xf32>
      %354 = arith.addf %arg16, %347 : vector<1x128xf32>
      %355 = arith.addf %arg17, %350 : vector<1x128xf32>
      %356 = arith.addf %arg18, %353 : vector<1x128xf32>
      %357 = arith.mulf %354, %354 : vector<1x128xf32>
      %358 = arith.mulf %355, %355 : vector<1x128xf32>
      %359 = arith.addf %357, %358 : vector<1x128xf32>
      %360 = arith.mulf %356, %356 : vector<1x128xf32>
      %361 = arith.addf %359, %360 : vector<1x128xf32>
      %362 = arith.cmpf olt, %361, %arg31 : vector<1x128xf32>
      %363 = arith.select %362, %361, %arg31 : vector<1x128xi1>, vector<1x128xf32>
      %364 = arith.select %362, %244, %arg28 : vector<1x128xi1>, vector<1x128xf32>
      %365 = arith.select %362, %245, %arg29 : vector<1x128xi1>, vector<1x128xf32>
      %366 = arith.select %362, %246, %arg30 : vector<1x128xi1>, vector<1x128xf32>
      %cst_70 = arith.constant 1.000000e-10 : f32
      %367 = vector.broadcast %cst_70 : f32 to vector<1x128xf32>
      %368 = arith.cmpf ogt, %363, %367 : vector<1x128xf32>
      %cst_71 = arith.constant 1.000000e+00 : f32
      %369 = vector.broadcast %cst_71 : f32 to vector<1x128xf32>
      %370 = arith.cmpf olt, %361, %369 : vector<1x128xf32>
      %371 = arith.andi %368, %370 : vector<1x128xi1>
      %cst_72 = arith.constant 1.000000e+00 : f32
      %cst_73 = arith.constant 0.000000e+00 : f32
      %372 = vector.broadcast %cst_72 : f32 to vector<1x128xf32>
      %373 = vector.broadcast %cst_73 : f32 to vector<1x128xf32>
      %374 = arith.select %371, %372, %373 : vector<1x128xi1>, vector<1x128xf32>
      %375 = arith.mulf %241, %arg19 : vector<1x128xf32>
      %376 = arith.mulf %242, %arg22 : vector<1x128xf32>
      %377 = arith.addf %375, %376 : vector<1x128xf32>
      %378 = arith.mulf %243, %arg25 : vector<1x128xf32>
      %379 = arith.addf %377, %378 : vector<1x128xf32>
      %380 = arith.mulf %241, %arg20 : vector<1x128xf32>
      %381 = arith.mulf %242, %arg23 : vector<1x128xf32>
      %382 = arith.addf %380, %381 : vector<1x128xf32>
      %383 = arith.mulf %243, %arg26 : vector<1x128xf32>
      %384 = arith.addf %382, %383 : vector<1x128xf32>
      %385 = arith.mulf %241, %arg21 : vector<1x128xf32>
      %386 = arith.mulf %242, %arg24 : vector<1x128xf32>
      %387 = arith.addf %385, %386 : vector<1x128xf32>
      %388 = arith.mulf %243, %arg27 : vector<1x128xf32>
      %389 = arith.addf %387, %388 : vector<1x128xf32>
      %390 = arith.mulf %arg19, %347 : vector<1x128xf32>
      %391 = arith.mulf %arg20, %350 : vector<1x128xf32>
      %392 = arith.addf %390, %391 : vector<1x128xf32>
      %393 = arith.mulf %arg21, %353 : vector<1x128xf32>
      %394 = arith.addf %392, %393 : vector<1x128xf32>
      %395 = arith.mulf %arg22, %347 : vector<1x128xf32>
      %396 = arith.mulf %arg23, %350 : vector<1x128xf32>
      %397 = arith.addf %395, %396 : vector<1x128xf32>
      %398 = arith.mulf %arg24, %353 : vector<1x128xf32>
      %399 = arith.addf %397, %398 : vector<1x128xf32>
      %400 = arith.mulf %arg25, %347 : vector<1x128xf32>
      %401 = arith.mulf %arg26, %350 : vector<1x128xf32>
      %402 = arith.addf %400, %401 : vector<1x128xf32>
      %403 = arith.mulf %arg27, %353 : vector<1x128xf32>
      %404 = arith.addf %402, %403 : vector<1x128xf32>
      %405 = arith.subf %241, %394 : vector<1x128xf32>
      %406 = arith.subf %242, %399 : vector<1x128xf32>
      %407 = arith.subf %243, %404 : vector<1x128xf32>
      %408 = arith.mulf %379, %347 : vector<1x128xf32>
      %409 = arith.mulf %384, %350 : vector<1x128xf32>
      %410 = arith.addf %408, %409 : vector<1x128xf32>
      %411 = arith.mulf %389, %353 : vector<1x128xf32>
      %412 = arith.addf %410, %411 : vector<1x128xf32>
      %cst_74 = arith.constant 0.000000e+00 : f32
      %413 = vector.broadcast %cst_74 : f32 to vector<1x128xf32>
      %414 = arith.cmpf oge, %412, %413 : vector<1x128xf32>
      %cst_75 = arith.constant 9.99999997E-7 : f32
      %cst_76 = arith.constant -9.99999997E-7 : f32
      %415 = vector.broadcast %cst_75 : f32 to vector<1x128xf32>
      %416 = vector.broadcast %cst_76 : f32 to vector<1x128xf32>
      %417 = arith.select %414, %415, %416 : vector<1x128xi1>, vector<1x128xf32>
      %418 = arith.addf %412, %417 : vector<1x128xf32>
      %cst_77 = arith.constant 1.000000e+00 : f32
      %419 = vector.broadcast %cst_77 : f32 to vector<1x128xf32>
      %420 = arith.divf %419, %418 : vector<1x128xf32>
      %421 = arith.mulf %405, %379 : vector<1x128xf32>
      %422 = arith.mulf %421, %420 : vector<1x128xf32>
      %423 = arith.addf %arg19, %422 : vector<1x128xf32>
      %424 = arith.mulf %405, %384 : vector<1x128xf32>
      %425 = arith.mulf %424, %420 : vector<1x128xf32>
      %426 = arith.addf %arg20, %425 : vector<1x128xf32>
      %427 = arith.mulf %405, %389 : vector<1x128xf32>
      %428 = arith.mulf %427, %420 : vector<1x128xf32>
      %429 = arith.addf %arg21, %428 : vector<1x128xf32>
      %430 = arith.mulf %406, %379 : vector<1x128xf32>
      %431 = arith.mulf %430, %420 : vector<1x128xf32>
      %432 = arith.addf %arg22, %431 : vector<1x128xf32>
      %433 = arith.mulf %406, %384 : vector<1x128xf32>
      %434 = arith.mulf %433, %420 : vector<1x128xf32>
      %435 = arith.addf %arg23, %434 : vector<1x128xf32>
      %436 = arith.mulf %406, %389 : vector<1x128xf32>
      %437 = arith.mulf %436, %420 : vector<1x128xf32>
      %438 = arith.addf %arg24, %437 : vector<1x128xf32>
      %439 = arith.mulf %407, %379 : vector<1x128xf32>
      %440 = arith.mulf %439, %420 : vector<1x128xf32>
      %441 = arith.addf %arg25, %440 : vector<1x128xf32>
      %442 = arith.mulf %407, %384 : vector<1x128xf32>
      %443 = arith.mulf %442, %420 : vector<1x128xf32>
      %444 = arith.addf %arg26, %443 : vector<1x128xf32>
      %445 = arith.mulf %407, %389 : vector<1x128xf32>
      %446 = arith.mulf %445, %420 : vector<1x128xf32>
      %447 = arith.addf %arg27, %446 : vector<1x128xf32>
      %c1_i32 = arith.constant 1 : i32
      %448 = arith.addi %arg11, %c1_i32 : i32
      %449 = vector.shape_cast %374 : vector<1x128xf32> to vector<1x1x128xf32>
      %cst_78 = arith.constant dense<0xFF800000> : vector<1xf32>
      %450 = vector.multi_reduction <maximumf>, %449, %cst_78 [1, 2] : vector<1x1x128xf32> to vector<1xf32>
      %451 = vector.shape_cast %450 : vector<1xf32> to vector<1x1x1xf32>
      %452 = vector.extract %451[0, 0, 0] : f32 from vector<1x1x1xf32>
      scf.yield %448, %452, %244, %245, %246, %354, %355, %356, %423, %426, %429, %432, %435, %438, %441, %444, %447, %364, %365, %366, %363, %374 : i32, f32, vector<1x128xf32>, vector<1x128xf32>, vector<1x128xf32>, vector<1x128xf32>, vector<1x128xf32>, vector<1x128xf32>, vector<1x128xf32>, vector<1x128xf32>, vector<1x128xf32>, vector<1x128xf32>, vector<1x128xf32>, vector<1x128xf32>, vector<1x128xf32>, vector<1x128xf32>, vector<1x128xf32>, vector<1x128xf32>, vector<1x128xf32>, vector<1x128xf32>, vector<1x128xf32>, vector<1x128xf32>
    }
    %209 = tpu.concatenate %208#17, %208#18, %208#19 in 0 : vector<1x128xf32>, vector<1x128xf32>, vector<1x128xf32> -> vector<3x128xf32>
    %c0_40 = arith.constant 0 : index
    %c0_41 = arith.constant 0 : index
    %c0_42 = arith.constant 0 : index
    %210 = vector.load %arg9[%c0_40, %c0_41, %c0_42] : memref<1x3x128xf32, #tpu.memory_space<vmem>>, vector<1x3x128xf32>
    %211 = vector.shape_cast %210 : vector<1x3x128xf32> to vector<3x128xf32>
    %212 = vector.shape_cast %209 : vector<3x128xf32> to vector<1x3x128xf32>
    tpu.vector_store %arg9[%c0_40, %c0_41, %c0_42], %212 {strides = array<i32>} : memref<1x3x128xf32, #tpu.memory_space<vmem>>, vector<1x3x128xf32>,
    %213 = math.sqrt %208#20 : vector<1x128xf32>
    %c0_43 = arith.constant 0 : index
    %c0_44 = arith.constant 0 : index
    %c0_45 = arith.constant 0 : index
    %214 = vector.load %arg10[%c0_43, %c0_44, %c0_45] : memref<1x1x128xf32, #tpu.memory_space<vmem>>, vector<1x1x128xf32>
    %215 = vector.shape_cast %214 : vector<1x1x128xf32> to vector<1x128xf32>
    %216 = vector.shape_cast %213 : vector<1x128xf32> to vector<1x1x128xf32>
    tpu.vector_store %arg10[%c0_43, %c0_44, %c0_45], %216 {strides = array<i32>} : memref<1x1x128xf32, #tpu.memory_space<vmem>>, vector<1x1x128xf32>,
    return
  }
  func.func @transform_0(%arg0: i32, %arg1: i32) -> (i32, i32, i32) {
    %c0_i32 = arith.constant 0 : i32
    %c0_i32_0 = arith.constant 0 : i32
    return %arg0, %c0_i32, %arg1 : i32, i32, i32
  }
  func.func @transform_1(%arg0: i32, %arg1: i32) -> (i32, i32, i32) {
    %c0_i32 = arith.constant 0 : i32
    %c0_i32_0 = arith.constant 0 : i32
    return %arg0, %c0_i32, %arg1 : i32, i32, i32
  }
  func.func @transform_2(%arg0: i32, %arg1: i32) -> (i32, i32, i32) {
    %c0_i32 = arith.constant 0 : i32
    %c0_i32_0 = arith.constant 0 : i32
    %c0_i32_1 = arith.constant 0 : i32
    return %arg0, %c0_i32, %c0_i32_0 : i32, i32, i32
  }
  func.func @transform_3(%arg0: i32, %arg1: i32) -> (i32, i32) {
    %c0_i32 = arith.constant 0 : i32
    %c0_i32_0 = arith.constant 0 : i32
    %c0_i32_1 = arith.constant 0 : i32
    return %c0_i32, %c0_i32_0 : i32, i32
  }
  func.func @transform_4(%arg0: i32, %arg1: i32) -> (i32, i32) {
    %c0_i32 = arith.constant 0 : i32
    %c0_i32_0 = arith.constant 0 : i32
    %c0_i32_1 = arith.constant 0 : i32
    return %c0_i32, %c0_i32_0 : i32, i32
  }
  func.func @transform_5(%arg0: i32, %arg1: i32) -> (i32, i32) {
    %c0_i32 = arith.constant 0 : i32
    %c0_i32_0 = arith.constant 0 : i32
    %c0_i32_1 = arith.constant 0 : i32
    return %c0_i32, %c0_i32_0 : i32, i32
  }
  func.func @transform_6(%arg0: i32, %arg1: i32) -> (i32, i32) {
    %c0_i32 = arith.constant 0 : i32
    %c0_i32_0 = arith.constant 0 : i32
    %c0_i32_1 = arith.constant 0 : i32
    return %c0_i32, %c0_i32_0 : i32, i32
  }
  func.func @transform_7(%arg0: i32, %arg1: i32) -> (i32, i32, i32) {
    %c0_i32 = arith.constant 0 : i32
    %c0_i32_0 = arith.constant 0 : i32
    return %arg0, %c0_i32, %arg1 : i32, i32, i32
  }
  func.func @transform_8(%arg0: i32, %arg1: i32) -> (i32, i32, i32) {
    %c0_i32 = arith.constant 0 : i32
    %c0_i32_0 = arith.constant 0 : i32
    return %arg0, %c0_i32, %arg1 : i32, i32, i32
  }
}

</mosaic_0001>

<bundles_post_ra>
// kernel: custom-call.11
= control target key start
LH: loop header
LB: loop body
LE: loop exit
PB: predicated region body
PF: predicated region fallthrough
CT: control target
= control target key end

     0   :  { %s1033_s0 = inlined_call_operand.vmem [shape: f32[2,24,4,4], index: 0, kind: input, shape index: {}]   ;;  %s1034_s1 = inlined_call_operand.vmem [shape: f32[2,24,4,4], index: 1, kind: output, shape index: {0}]   ;;  %s1035_s2 = inlined_call_operand.hbm [shape: s32[2,24,4], index: 2, kind: output, shape index: {1}]   ;;  %s1036_s3 = inlined_call_operand.vmem [shape: s32[2,24,4], index: 3, kind: output, shape index: {2}]  }
   0x1   :  { %1042 = sst [smem:[#allocation12_spill]] %s1033_s0 }
   0x2   :  { %5 = vsyncpa [#allocation5], 0 }
   0x3   :  { %7 = vsyncpa [#allocation5 + $0x1], 0  ;;  %s816_s12 = smov 0   ;;  %s818_s13 = smov 0  }
   0x4   :  { %s820_s14 = smov 0   ;;  %s822_s15 = smov 0  }
   0x5   :  { %s824_s16 = smov 0   ;;  %s826_s17 = smov 0  }
   0x6   :  { %s828_s18 = smov 0   ;;  %s830_s19 = smov 0  }
   0x7 LB: > { %1043 = sst [smem:[#allocation9_spill]] %s784_s18  ;;  %s582_s20 = sadd.s32 4294967295, %s788_s19   ;;  %s788_s19 = sphi %s830_s19, %s13_s19   ;;  %s784_s18 = sphi %s828_s18, %s1053_s18   ;;  %s780_s17 = sphi %s826_s17, %s1058_s17   ;;  %s776_s16 = sphi %s824_s16, %s1051_s16   ;;  %s772_s15 = sphi %s822_s15, %s1057_s15   ;;  %s768_s14 = sphi %s820_s14, %s1056_s14   ;;  %s764_s13 = sphi %s818_s13, %s1055_s13   ;;  %s760_s12 = sphi %s816_s12, %s1054_s12  }
   0x8   : > { %s583_s21 = sadd.s32 4294967294, %s788_s19   ;;  %s22_s22 = sadd.s32 1, %s780_s17 }
   0x9   : > { %p23_p0 = scmp.ge.s32.totalorder %s22_s22, 24  ;;  %s25_s23 = sadd.s32 1, %s784_s18 }
   0xa   : > { %s29_s24 = sshrl.u32 %s780_s17, 3  ;;  %p46_p1 = scmp.ne.s32.totalorder %s768_s14, %s764_s13 }
   0xb   : > { %s1060_s22 = smov (%p23_p0, %s22_s22), 0  ;;  %s1062_s23 = smov (!%p23_p0, %s25_s23), %s784_s18 }
   0xc   : > { %1044 = sst [smem:[#allocation10_spill]] %s1060_s22  ;;  %s30_s25 = sshrl.u32 %s1060_s22, 3 }
   0xd   : > { %p47_p2 = scmp.eq.s32.totalorder %s582_s20, 47  ;;  %p27_p3 = scmp.ge.s32.totalorder %s1062_s23, 2 }
   0xe   : > { %s32_s26 = ssub.s32 %s29_s24, %s30_s25  ;;  %p52_p5 = scmp.ne.s32.totalorder %s764_s13, %s760_s12 }
   0xf   : > { %p869_p4 = por %p47_p2, %p46_p1  ;;  %s1064_s23 = smov (%p27_p3, %s1062_s23), 0 }
  0x10   : > { %1046 = sst [smem:[#allocation11_spill]] %s1064_s23  ;;  %p53_p6 = scmp.eq.s32.totalorder %s583_s21, 47 }
  0x11   : > { %s31_s28 = ssub.s32 %s784_s18, %s1064_s23  ;;  %s36_s29 = sadd.s32 1, %s768_s14 }
  0x12   : > { %s33_s30 = sor.u32 %s32_s26, %s31_s28  ;;  %p880_p7 = por %p53_p6, %p52_p5 }
  0x13   : > { %p34_p8 = scmp.eq.s32.totalorder %s33_s30, 0  ;;  %p585_p9 = scmp.ge.s32.totalorder %s788_s19, 48 }
  0x14   : > { %s101_s6 = sand.u32 (!%p585_p9), 1, %s788_s19   ;;  %s602_s7 = smul.u32 (!%p585_p9), 24, %s784_s18 }
  0x15   : > { %s885_s5 = scalar_select %p34_p8, %s768_s14, %s36_s29  }
  0x16   : > { %99 = sbr.rel (%p585_p9) target bundleno = 32 (0x20), region = 16  ;;  %s586_s8 = sshll.u32 (!%p585_p9), %s101_s6, 2 }
  0x17   : > { %s105_s9 = sadd.s32 (!%p585_p9), %s780_s17, %s602_s7  ;;  %s1048_s0 = sld [smem:[#allocation12_spill]] (!%p585_p9) }
  0x18   : > { %s587_s10 = sshll.u32 (!%p585_p9), %s105_s9, 2  ;;  %s103_s25 = scalar_lea.vmem (!%p585_p9), [#allocation1], %s586_s8 }
  0x1d   : > { %s107_s24 = scalar_lea.vmem %s1048_s0, %s587_s10 }
  0x1e   : > { %v123_v0 = vld [vmem:[%s107_s24] sm:$0xf] }
  0x1f   : > { %124 = vst [vmem:[%s103_s25] sm:$0xf] %v123_v0 }
  0x20 PF: > { %p588_p10 = scmp.ge.s32.totalorder %s788_s19, 1  ;;  %p140_p11 = scmp.lt.s32.totalorder %s788_s19, 49 }
  0x22   : > { %p141_p12 = pnand %p588_p10, %p140_p11 }
  0x24   : > { %144 = sbr.rel (%p141_p12) target bundleno = 453 (0x1c5), region = 50 }
  0x2b   : > { %s151_s26 = sand.u32 1, %s582_s20   ;;  %s1038_s28 = sand.u32 1, %s764_s13   ;;  %v184_v1 = vlaneseq  ;;  %v794_v4 = vmov 0  }
  0x2c   : > { %s589_s29 = sshll.u32 %s151_s26, 2  ;;  %s901_s30 = sshll.u32 %s1038_s28, 3 }
  0x2d   : > { %v904_v2 = vshrl.u32 %v184_v1, 7  ;;  %s153_s6 = scalar_lea.vmem [#allocation1], %s589_s29  ;;  %s179_s7 = sand.u32 7, %s772_s15  }
  0x2e   : > { %v173_v3 = vld [vmem:[%s153_s6] sm:$0xf]  ;;  %s164_s20 = scalar_lea.vmem [#allocation4], %s901_s30  ;;  %s1037_s9 = scalar_lea.vmem [#allocation6], %s901_s30 }
  0x2f   : > { %174 = vst [vmem:[#allocation0] sm:$0xf] %v173_v3  ;;  %188 = vst [vmem:[#allocation7] sm:$0xff] %v904_v2  ;;  %s911_s8 = scalar_lea.vmem %s164_s20, %s179_s7 [#allocation4]  ;;  %s916_s10 = scalar_lea.vmem %s1037_s9, %s179_s7 [#allocation6] }
  0x30   : > { %183 = vst [vmem:[%s911_s8] sm:$0x1] %v794_v4  ;;  %s919_s11 = scalar_lea.vmem [#allocation3], %s589_s29  ;;  %s921_s21 = smov 0  }
  0x36   : > { %v177_v5 = vld [vmem:[#allocation0] sm:$0xff] }
  0x37   : > { %178 = vst [vmem:[#allocation2] sm:$0xff] %v177_v5 }
  0x38 LB: >> { %vm204_vm0 = vcmp.lt.s32.totalorder %v904_v2, 4  ;;  %v928_v8 = vstv %s792_s21  ;;  %s245_s24 = ssub.s32 128, %s792_s21  ;;  %v251_v38 = vand.u32 127, %v184_v1  ;;  %v254_v40 = vld [vmem:[%s911_s8] ss:$0 sm:$0xff]  ;;  %s257_s25 = scalar_lea.vmem [#allocation2], %s792_s21  ;;  %s792_s21 = sphi %s921_s21, %s194_s21  }
  0x39   : >> { %vm203_vm1 = vcmp.ge.s32.totalorder %v904_v2, %v928_v8  ;;  %s263_s29 = scalar_lea.vmem [#allocation7], %s792_s21  ;;  %vm283_vm15 = vcmp.gt.s32.totalorder %v904_v2, %v928_v8  ;;  %s194_s21 = sadd.s32 1, %s792_s21  }
  0x3a   : >> { %vm205_vm3 = vmand %vm203_vm1, %vm204_vm0  ;;  %vm275_vm12 = vcmp.gt.s32.totalorder %v251_v38, %v928_v8  ;;  %vm252_vm13 = vcmp.eq.s32.totalorder %v251_v38, %v928_v8  ;;  %v265_v42 = vld [vmem:[%s263_s29] ss:$0 sm:$0xff]  ;;  %p191_p13 = scmp.ge.s32.totalorder %s194_s21, 4  }
  0x3b   : >> { %vm287_vm1 = vmand %vm283_vm15, %vm252_vm13 }
  0x3e   : >> { %v199_v6 = vld [vmem:[#allocation2] sm:$0xff]  ;;  %v259_v41 = vld [vmem:[%s257_s25] ss:$0 sm:$0xff] }
  0x3f   : >> { %v200_v7 = vand.u32 2147483647, %v199_v6 }
  0x41   : >> { %vm593_vm2 = vcmp.gt.f32.partialorder %v200_v7, -inf }
  0x42   : >> { %vm207_vm4 = vmand %vm205_vm3, %vm593_vm2 }
  0x43   : >> { %v208_v9 = vsel %vm207_vm4, %v904_v2, %v928_v8  ;;  %v209_v10 = vsel %vm207_vm4, %v200_v7, -inf }
  0x44   : >> { %v210_v11 = vrot.slane %v209_v10, 1  ;;  %v211_v12 = vrot.slane %v208_v9, 1 }
  0x46   : >> { %vm212_vm5 = vcmp.ge.f32.partialorder %v210_v11, %v209_v10  ;;  %v215_v13 = vrot.slane %v210_v11, 1  ;;  %v216_v14 = vrot.slane %v211_v12, 1 }
  0x47   : >> { %v213_v15 = vsel %vm212_vm5, %v210_v11, %v209_v10  ;;  %v214_v16 = vsel %vm212_vm5, %v211_v12, %v208_v9 }
  0x48   : >> { %vm217_vm6 = vcmp.ge.f32.partialorder %v215_v13, %v213_v15  ;;  %v220_v17 = vrot.slane %v215_v13, 1  ;;  %v221_v18 = vrot.slane %v216_v14, 1 }
  0x49   : >> { %v218_v19 = vsel %vm217_vm6, %v215_v13, %v213_v15  ;;  %v219_v20 = vsel %vm217_vm6, %v216_v14, %v214_v16 }
  0x4a   : >> { %vm222_vm7 = vcmp.ge.f32.partialorder %v220_v17, %v218_v19  ;;  %v225_v21 = vrot.slane %v220_v17, 1  ;;  %v226_v22 = vrot.slane %v221_v18, 1 }
  0x4b   : >> { %v223_v23 = vsel %vm222_vm7, %v220_v17, %v218_v19  ;;  %v224_v24 = vsel %vm222_vm7, %v221_v18, %v219_v20 }
  0x4c   : >> { %vm227_vm8 = vcmp.ge.f32.partialorder %v225_v21, %v223_v23  ;;  %v230_v25 = vrot.slane %v225_v21, 1  ;;  %v231_v26 = vrot.slane %v226_v22, 1 }
  0x4d   : >> { %v228_v27 = vsel %vm227_vm8, %v225_v21, %v223_v23  ;;  %v229_v28 = vsel %vm227_vm8, %v226_v22, %v224_v24 }
  0x4e   : >> { %vm232_vm9 = vcmp.ge.f32.partialorder %v230_v25, %v228_v27  ;;  %v235_v29 = vrot.slane %v230_v25, 1  ;;  %v236_v30 = vrot.slane %v231_v26, 1 }
  0x4f   : >> { %v233_v31 = vsel %vm232_vm9, %v230_v25, %v228_v27  ;;  %v234_v32 = vsel %vm232_vm9, %v231_v26, %v229_v28 }
  0x50   : >> { %vm237_vm10 = vcmp.ge.f32.partialorder %v235_v29, %v233_v31  ;;  %v240_v33 = vrot.slane %v235_v29, 1  ;;  %v241_v34 = vrot.slane %v236_v30, 1 }
  0x51   : >> { %v238_v35 = vsel %vm237_vm10, %v235_v29, %v233_v31  ;;  %v239_v36 = vsel %vm237_vm10, %v236_v30, %v234_v32 }
  0x52   : >> { %vm242_vm11 = vcmp.ge.f32.partialorder %v240_v33, %v238_v35 }
  0x53   : >> { %v244_v37 = vsel %vm242_vm11, %v241_v34, %v239_v36 }
  0x54   : >> { %246 = vrot.lane.b32.xlu0 %v244_v37, %s245_s24  ;;  %s605_s24 = smul.u32 (%p191_p13), 24, %s776_s16 }
  0xc6   : >> { %v247_v39 = vpop.permute.xlu0 %246 }
  0xc7   : >> { %603 = vpush %v247_v39 }
  0xf8   : >> { %s604_s26 = spop %603 }
  0xf9   : >> { %v253_v43 = vstv %s604_s26  ;;  %s258_s6 = scalar_lea.vmem [#allocation2], %s604_s26  ;;  %s264_s7 = scalar_lea.vmem [#allocation7], %s604_s26 }
  0xfa   : >> { %v260_v44 = vld [vmem:[%s258_s6] ss:$0 sm:$0xff]  ;;  %v255_v46 = vsel %vm252_vm13, %v253_v43, %v254_v40  ;;  %s606_s26 = smul.u32 (%p191_p13), 3, %s776_s16  ;;  %s1049_s16 = sand.u32 (%p191_p13), 1, %s764_s13  }
  0xfb   : >> { %v266_v45 = vld [vmem:[%s264_s7] ss:$0 sm:$0xff]  ;;  %261 = vst [vmem:[%s258_s6] sm:$0x1] %v259_v41  ;;  %vm269_vm14 = vcmp.ne.f32.partialorder %v260_v44, 0.0  ;;  %256 = vst [vmem:[%s911_s8] sm:$0x1] %v255_v46  ;;  %v276_v53 = vsel %vm275_vm12, %v260_v44, 0.0 }
  0xfc   : >> { %267 = vst [vmem:[%s264_s7] sm:$0x1] %v265_v42  ;;  %262 = vst [vmem:[%s257_s25] sm:$0x1] %v260_v44  ;;  %s400_s25 = sshrl.u32 (%p191_p13), %s772_s15, 3  ;;  %s409_s6 = sshll.u32 (%p191_p13), %s164_s20, 4  ;;  %s410_s6 = int_to_ptr.vmem [resolvable:$true] %s409_s6 }
  0xfd   : >> { %268 = vst [vmem:[%s263_s29] sm:$0x1] %v266_v45  ;;  %vm270_vm0 = vmand %vm252_vm13, %vm269_vm14  ;;  %s363_s29 = sadd.s32 (%p191_p13), %s772_s15, %s605_s24  ;;  %s962_s7 = sadd.s32 (%p191_p13), %s606_s26, %s400_s25 }
  0xfe   : >> { %v271_v47 = vsel %vm270_vm0, %v260_v44, 1.0  ;;  %s597_s21 = sshll.u32 (%p191_p13), %s363_s29, 2  ;;  %s598_s0 = sshll.u32 (%p191_p13), %s962_s7, 7 }
  0xff   : >> { %v284_v48 = vsel %vm283_vm15, %v271_v47, 1.0  ;;  %s967_s28 = scalar_lea.vmem (%p191_p13), %s1034_s1, %s597_s21  ;;  %s973_s18 = scalar_lea.hbm (%p191_p13), %s1035_s2, %s598_s0 }
 0x100   : >> { %688 = vrcp.f32 %v284_v48  ;;  %s354_s15 = scalar_lea.sflag (%p191_p13), [#allocation5], %s1049_s16  ;;  %s690_s24 = scalar_lea.vmem (%p191_p13), %s410_s6, 128 }
 0x101   : > { %p691_p0 = scmp.ne.s32.totalorder (%p191_p13), %s410_s6, %s690_s24  ;;  %s795_s20 = smov (%p191_p13), [#allocation4]  }
 0x102   : > { %s694_s25 = sshll.u32 (%p191_p13), %s795_s20, 4  ;;  %s695_s25 = int_to_ptr.vmem [resolvable:$false] %s694_s25 }
 0x103   : >> { %v280_v50 = vld [vmem:[#allocation2] sm:$0xff]  ;;  %p692_p1 = pnand (%p191_p13), %p691_p0, %p869_p4  ;;  %s696_s9 = scalar_lea.vmem (%p191_p13), %s695_s25, 256 }
 0x104   : > { %v294_v57 = vld [vmem:[#allocation7] sm:$0xff] (%p191_p13)  ;;  %p697_p3 = scmp.lt.s32.totalorder (%p191_p13), %s410_s6, %s695_s25  ;;  %p698_p5 = scmp.lt.s32.totalorder (%p191_p13), %s696_s9, %s690_s24 }
 0x105   : > { %p693_p2 = pneg (%p191_p13), %p692_p1 }
 0x106   : > { %p699_p6 = por (%p191_p13), %p698_p5, %p697_p3 }
 0x108   : > { %p700_p8 = pnand (%p191_p13), %p699_p6, %p693_p2 }
 0x10a   : >> { %v689_v49 = vpop.eup %688 }
 0x10b   : >> { %v286_v51 = vmul.f32 %v689_v49, %v280_v50 }
 0x10d   : >> { %v288_v52 = vsel %vm287_vm1, %v286_v51, 0.0 }
 0x10e   : >> { %289 = vadd.xlane.f32.xlu0 %v288_v52 }
 0x13b   : > { %310 = vxpose.xlu0.b32.start.end [1/1] (short) (narrow) (%p191_p13), %v294_v57, 8 }
 0x19a   : > { %193 = sbr.rel (!%p191_p13) target bundleno = 56 (0x38), region = 206 }
 0x19b   : >> { %v290_v54 = vpop.xlane.xlu0 %289 }
 0x19c   : >> { %v291_v55 = vmul.f32 %v290_v54, %v276_v53 }
 0x19e   : >> { %v292_v56 = vsub.f32 %v286_v51, %v291_v55 }
 0x1a0   : >> { %293 = vst [vmem:[#allocation2] sm:$0xff] %v292_v56 }
 0x1a7   : > { %v346_v58 = vld [vmem:[#allocation2] sm:$0xf] }
 0x1a8   : > { %348 = vst [vmem:[%s919_s11] sm:$0xf] %v346_v58 }
 0x1a9   : > { %703 = shalt.err (!%p700_p8)
}
 0x1aa   : > { %s704_s0 = scalar_lea.hbm %s973_s18, 128  ;;  %s708_s26 = scalar_lea.hbm %s1035_s2, 768 }
 0x1ab   : > { %p705_p9 = scmp.ne.s32.totalorder %s973_s18, %s704_s0  ;;  %p709_p12 = scmp.lt.u32.totalorder %s973_s18, %s1035_s2 }
 0x1ac   : > { %p710_p13 = scmp.lt.u32.totalorder %s708_s26, %s704_s0  ;;  %p712_p1 = scmp.lt.u32.totalorder %s704_s0, %s973_s18 }
 0x1ad   : > { %p706_p10 = pnand %p705_p9, %p869_p4 }
 0x1ae   : > { %p711_p0 = por %p710_p13, %p709_p12 }
 0x1af   : > { %p707_p11 = pneg %p706_p10 }
 0x1b0   : > { %p713_p2 = por %p712_p1, %p711_p0 }
 0x1b2   : > { %p714_p3 = pnand %p713_p2, %p707_p11 }
 0x1b4   : > { %717 = shalt.err (!%p714_p3)
}
 0x1b5   : > { %608 = dma.vmem_to_hbm [thread:$0]  (%p869_p4), %s410_s6, 128, %s973_s18, %s354_s15   ;;  %v381_v59 = vld [vmem:[%s919_s11] sm:$0xf] }
 0x1b6   : > { %382 = vst [vmem:[%s967_s28] sm:$0xf] %v381_v59  ;;  %415 = sbr.rel (!%p869_p4) target bundleno = 453 (0x1c5), region = 96  ;;  %s599_s8 = sshll.u32 (%p869_p4), %s962_s7, 3 }
 0x1b7   : > { %s1050_s16 = scalar_lea.vmem (%p869_p4), [#allocation6], %s901_s30  ;;  %s420_s25 = scalar_lea.vmem (%p869_p4), %s1036_s3, %s599_s8 }
 0x1bb   : > { %v326_v60 = vpop.trf.xlu0 }
 0x1bc   : > { %342 = vst [vmem:[%s916_s10] sm:$0x1] %v326_v60 }
 0x1c3   : > { %v448_v61 = vld [vmem:[%s1050_s16] sm:$0xff] }
 0x1c4   : > { %449 = vst [vmem:[%s420_s25] sm:$0xff] %v448_v61 }
 0x1c5 PF: > { %p614_p5 = scmp.ge.s32.totalorder %s788_s19, 2  ;;  %s465_s18 = sand.u32 1, %s760_s12  }
 0x1c6   : > { %s466_s27 = scalar_lea.sflag [#allocation5], %s465_s18 }
 0x1c7   : > { %p611_p6 = pnand %p614_p5, %p880_p7 }
 0x1c9   : > { %755 = dma.done.wait (!%p611_p6), %s466_s27, 128  }
 0x1ca   : > { %757 = vsyncadd (!%p611_p6), %s466_s27, 4294967168  ;;  %s13_s19 = sadd.s32 1, %s788_s19   ;;  %s1051_s16 = sld [smem:[#allocation9_spill]] }
 0x1cb   : > { %p10_p4 = scmp.ge.s32.totalorder %s13_s19, 50   ;;  %s1052_s28 = sld [smem:[#allocation10_spill]] }
 0x1cc   : > { %s1053_s18 = sld [smem:[#allocation11_spill]]  ;;  %s1054_s12 = smov %s764_s13 }
 0x1cd   : > { %s1055_s13 = smov %s768_s14  ;;  %s1056_s14 = smov %s885_s5 }
 0x1ce   : > { %s1057_s15 = smov %s780_s17  ;;  %12 = sbr.rel (!%p10_p4) target bundleno = 7 (0x7), region = 217 }
 0x1d1   : > { %s1058_s17 = smov %s1052_s28 }
 0x1d5   :  { %478 = vsyncpa [#allocation5], 1 }
 0x1d6   :  { %480 = vsyncpa [#allocation5 + $0x1], 1 }

// kernel: custom-call.13
= control target key start
LH: loop header
LB: loop body
LE: loop exit
PB: predicated region body
PF: predicated region fallthrough
CT: control target
= control target key end

     0   :  { %s408_s6 = smov 0   ;;  %s410_s7 = smov 0   ;;  %s477_s0 = inlined_call_operand.vmem [shape: f32[2,24,1,4,4], index: 0, kind: input, shape index: {}]   ;;  %s478_s1 = inlined_call_operand.vmem [shape: f32[2,24,1,4,4], index: 1, kind: output, shape index: {}]  }
   0x1   :  { %s412_s8 = smov 0   ;;  %s414_s9 = smov 0  }
   0x2   :  { %s416_s10 = smov 0  }
   0x3 LB: > { %s300_s11 = sadd.s32 4294967295, %s395_s10   ;;  %s36_s12 = sadd.s32 1, %s387_s8  ;;  %s395_s10 = sphi %s416_s10, %s7_s10   ;;  %s391_s9 = sphi %s414_s9, %s482_s9   ;;  %s387_s8 = sphi %s412_s8, %s481_s8   ;;  %s383_s7 = sphi %s410_s7, %s480_s7   ;;  %s379_s6 = sphi %s408_s6, %s479_s6  }
   0x4   : > { %p38_p0 = scmp.ge.s32.totalorder %s36_s12, 24  ;;  %s40_s13 = sadd.s32 1, %s391_s9 }
   0x5   : > { %p302_p2 = scmp.ge.s32.totalorder %s395_s10, 48 }
   0x6   : > { %s484_s12 = smov (%p38_p0, %s36_s12), 0  ;;  %s486_s13 = smov (!%p38_p0, %s40_s13), %s391_s9 }
   0x7   : > { %p42_p1 = scmp.ge.s32.totalorder %s486_s13, 2  ;;  %54 = sbr.rel (%p302_p2) target bundleno = 15 (0xf), region = 16 }
   0x8   : > { %s56_s14 = sand.u32 (!%p302_p2), 1, %s395_s10   ;;  %s312_s15 = smul.u32 (!%p302_p2), 24, %s391_s9 }
   0x9   : > { %s488_s13 = smov (%p42_p1, %s486_s13), 0  ;;  %s303_s16 = sshll.u32 (!%p302_p2), %s56_s14, 2 }
   0xa   : > { %s63_s17 = sadd.s32 (!%p302_p2), %s387_s8, %s312_s15  ;;  %s58_s22 = scalar_lea.vmem (!%p302_p2), [#allocation1], %s303_s16 }
   0xb   : > { %s304_s18 = sshll.u32 (!%p302_p2), %s63_s17, 2 }
   0xc   : > { %s65_s21 = scalar_lea.vmem (!%p302_p2), %s477_s0, %s304_s18 }
   0xd   : > { %v81_v0 = vld [vmem:[%s65_s21] sm:$0xf] (!%p302_p2) }
   0xe   : > { %82 = vst [vmem:[%s58_s22] sm:$0xf] %v81_v0 }
   0xf PF: > { %p305_p3 = scmp.ge.s32.totalorder %s395_s10, 1  ;;  %p98_p4 = scmp.lt.s32.totalorder %s395_s10, 49 }
  0x11   : > { %p99_p5 = pnand %p305_p3, %p98_p4 }
  0x13   : > { %102 = sbr.rel (%p99_p5) target bundleno = 659 (0x293), region = 50 }
  0x1a   : > { %s450_s23 = sand.u32 1, %s300_s11   ;;  %v120_v1 = vlaneseq  ;;  %v397_v11 = vmov -1.0   ;;  %s313_s26 = smul.u32 24, %s383_s7 }
  0x1b   : > { %s306_s24 = sshll.u32 %s450_s23, 2 }
  0x1c   : > { %s111_s25 = scalar_lea.vmem [#allocation1], %s306_s24  ;;  %v121_v3 = vand.u32 127, %v120_v1  ;;  %v124_v4 = vshrl.u32 %v120_v1, 7  ;;  %s197_s27 = sadd.s32 %s379_s6, %s313_s26 }
  0x1d   : > { %v118_v2 = vld [vmem:[%s111_s25] sm:$0xf]  ;;  %s115_s28 = scalar_lea.vmem [#allocation3], %s306_s24  ;;  %s309_s29 = sshll.u32 %s197_s27, 2 }
  0x1e   : > { %119 = vst [vmem:[#allocation0] sm:$0xf] %v118_v2  ;;  %vm122_vm0 = vcmp.lt.s32.totalorder %v121_v3, 4  ;;  %vm131_vm1 = vcmp.ge.s32.totalorder %v124_v4, %v121_v3  ;;  %vm126_vm2 = vcmp.eq.s32.totalorder %v124_v4, %v121_v3  ;;  %vm145_vm4 = vcmp.eq.s32.totalorder %v121_v3, 0  ;;  %s199_s3 = scalar_lea.vmem %s478_s1, %s309_s29 }
  0x1f   : > { %vm132_vm3 = vmand %vm131_vm1, %vm122_vm0  ;;  %vm142_vm5 = vcmp.eq.s32.totalorder %v121_v3, %v124_v4  ;;  %v146_v12 = vsel %vm145_vm4, 1.0, %v397_v11  ;;  %vm153_vm6 = vcmp.eq.s32.totalorder %v121_v3, 1  ;;  %vm163_vm7 = vcmp.eq.s32.totalorder %v121_v3, 2 }
  0x20   : > { %v147_v13 = vsel %vm142_vm5, %v146_v12, 0.0  ;;  %vm173_vm8 = vcmp.eq.s32.totalorder %v121_v3, 3 }
  0x25   : > { %v127_v5 = vld [vmem:[#allocation0] sm:$0xff] }
  0x26   : > { %v128_v6 = vsel %vm126_vm2, %v127_v5, 0.0  ;;  %v133_v7 = vsel %vm132_vm3, %v127_v5, 0.0 }
  0x27   : > { %129 = vadd.xlane.f32.xlu0 %v128_v6 }
  0xb4   : > { %v130_v8 = vpop.xlane.xlu0 %129 }
  0xb5   : > { %355 = vrcp.f32 %v130_v8  ;;  %vm180_vm9 = vweird.f32 %v130_v8 }
  0xbf   : > { %v356_v9 = vpop.eup %355 }
  0xc0   : > { %v135_v10 = vmul.f32 %v356_v9, %v133_v7 }
  0xc2   : > { %136 = vst [vmem:[#allocation4] sm:$0xff] %v135_v10 }
  0xc9   : > { %v149_v14 = vld [vmem:[#allocation4 + $0x1] ss:$0 sm:$0xff]  ;;  %v159_v17 = vld [vmem:[#allocation4 + $0x2] ss:$0 sm:$0xff]  ;;  %v169_v22 = vld [vmem:[#allocation4 + $0x3] ss:$0 sm:$0xff] }
  0xca   : > { %v150_v15 = vxor.u32 2147483648, %v149_v14  ;;  %v160_v19 = vxor.u32 2147483648, %v159_v17  ;;  %v170_v24 = vxor.u32 2147483648, %v169_v22 }
  0xcc   : > { %v154_v16 = vmul.f32 %v150_v15, %v147_v13 }
  0xce   : > { %155 = vadd.xlane.f32.xlu0 %v154_v16 }
 0x15b   : > { %v156_v18 = vpop.xlane.xlu0 %155 }
 0x15c   : > { %v157_v20 = vsel %vm153_vm6, %v156_v18, %v147_v13 }
 0x15d   : > { %v164_v21 = vmul.f32 %v160_v19, %v157_v20 }
 0x15f   : > { %165 = vadd.xlane.f32.xlu1 %v164_v21 }
 0x1ec   : > { %v166_v23 = vpop.xlane.xlu1 %165 }
 0x1ed   : > { %v167_v25 = vsel %vm163_vm7, %v166_v23, %v157_v20 }
 0x1ee   : > { %v174_v26 = vmul.f32 %v170_v24, %v167_v25 }
 0x1f0   : > { %175 = vadd.xlane.f32.xlu1 %v174_v26 }
 0x27d   : > { %v176_v27 = vpop.xlane.xlu1 %175 }
 0x27e   : > { %v177_v28 = vsel %vm173_vm8, %v176_v27, %v167_v25 }
 0x27f   : > { %v179_v29 = vmul.f32 %v356_v9, %v177_v28 }
 0x281   : > { %v181_v30 = vsel %vm180_vm9, %v177_v28, %v179_v29 }
 0x282   : > { %182 = vst [vmem:[#allocation2] sm:$0xff] %v181_v30 }
 0x289   : > { %v186_v31 = vld [vmem:[#allocation2] sm:$0xf] }
 0x28a   : > { %188 = vst [vmem:[%s115_s28] sm:$0xf] %v186_v31 }
 0x291   : > { %v215_v32 = vld [vmem:[%s115_s28] sm:$0xf] }
 0x292   : > { %216 = vst [vmem:[%s199_s3] sm:$0xf] %v215_v32 }
 0x293 PF: > { %s7_s10 = sadd.s32 1, %s395_s10   ;;  %s479_s6 = smov %s387_s8 }
 0x294   : > { %p4_p6 = scmp.ge.s32.totalorder %s7_s10, 50   ;;  %s480_s7 = smov %s391_s9 }
 0x295   : > { %s481_s8 = smov %s484_s12  ;;  %s482_s9 = smov %s488_s13 }
 0x296   :  { %6 = sbr.rel (!%p4_p6) target bundleno = 3 (0x3), region = 113 }

// kernel: custom-call.12
= control target key start
LH: loop header
LB: loop body
LE: loop exit
PB: predicated region body
PF: predicated region fallthrough
CT: control target
= control target key end

     0   :  { %s407_s6 = smov 0   ;;  %s409_s7 = smov 0   ;;  %s476_s0 = inlined_call_operand.vmem [shape: f32[2,24,1,4,4], index: 0, kind: input, shape index: {}]   ;;  %s477_s1 = inlined_call_operand.vmem [shape: f32[2,24,1,4,4], index: 1, kind: output, shape index: {}]  }
   0x1   :  { %s411_s8 = smov 0   ;;  %s413_s9 = smov 0  }
   0x2   :  { %s415_s10 = smov 0  }
   0x3 LB: > { %s299_s11 = sadd.s32 4294967295, %s394_s10   ;;  %s36_s12 = sadd.s32 1, %s386_s8  ;;  %s394_s10 = sphi %s415_s10, %s7_s10   ;;  %s390_s9 = sphi %s413_s9, %s481_s9   ;;  %s386_s8 = sphi %s411_s8, %s480_s8   ;;  %s382_s7 = sphi %s409_s7, %s479_s7   ;;  %s378_s6 = sphi %s407_s6, %s478_s6  }
   0x4   : > { %p38_p0 = scmp.ge.s32.totalorder %s36_s12, 24  ;;  %s40_s13 = sadd.s32 1, %s390_s9 }
   0x5   : > { %p301_p2 = scmp.ge.s32.totalorder %s394_s10, 48 }
   0x6   : > { %s483_s12 = smov (%p38_p0, %s36_s12), 0  ;;  %s485_s13 = smov (!%p38_p0, %s40_s13), %s390_s9 }
   0x7   : > { %p42_p1 = scmp.ge.s32.totalorder %s485_s13, 2  ;;  %54 = sbr.rel (%p301_p2) target bundleno = 15 (0xf), region = 16 }
   0x8   : > { %s56_s14 = sand.u32 (!%p301_p2), 1, %s394_s10   ;;  %s311_s15 = smul.u32 (!%p301_p2), 24, %s390_s9 }
   0x9   : > { %s487_s13 = smov (%p42_p1, %s485_s13), 0  ;;  %s302_s16 = sshll.u32 (!%p301_p2), %s56_s14, 2 }
   0xa   : > { %s63_s17 = sadd.s32 (!%p301_p2), %s386_s8, %s311_s15  ;;  %s58_s22 = scalar_lea.vmem (!%p301_p2), [#allocation1], %s302_s16 }
   0xb   : > { %s303_s18 = sshll.u32 (!%p301_p2), %s63_s17, 2 }
   0xc   : > { %s65_s21 = scalar_lea.vmem (!%p301_p2), %s476_s0, %s303_s18 }
   0xd   : > { %v81_v0 = vld [vmem:[%s65_s21] sm:$0xf] (!%p301_p2) }
   0xe   : > { %82 = vst [vmem:[%s58_s22] sm:$0xf] %v81_v0 }
   0xf PF: > { %p304_p3 = scmp.ge.s32.totalorder %s394_s10, 1  ;;  %p98_p4 = scmp.lt.s32.totalorder %s394_s10, 49 }
  0x11   : > { %p99_p5 = pnand %p304_p3, %p98_p4 }
  0x13   : > { %102 = sbr.rel (%p99_p5) target bundleno = 659 (0x293), region = 50 }
  0x1a   : > { %s449_s23 = sand.u32 1, %s299_s11   ;;  %v120_v1 = vlaneseq  ;;  %v396_v11 = vmov -1.0   ;;  %s312_s26 = smul.u32 24, %s382_s7 }
  0x1b   : > { %s305_s24 = sshll.u32 %s449_s23, 2 }
  0x1c   : > { %s111_s25 = scalar_lea.vmem [#allocation1], %s305_s24  ;;  %v121_v3 = vand.u32 127, %v120_v1  ;;  %v124_v4 = vshrl.u32 %v120_v1, 7  ;;  %s196_s27 = sadd.s32 %s378_s6, %s312_s26 }
  0x1d   : > { %v118_v2 = vld [vmem:[%s111_s25] sm:$0xf]  ;;  %s115_s28 = scalar_lea.vmem [#allocation3], %s305_s24  ;;  %s308_s29 = sshll.u32 %s196_s27, 2 }
  0x1e   : > { %119 = vst [vmem:[#allocation0] sm:$0xf] %v118_v2  ;;  %vm122_vm0 = vcmp.lt.s32.totalorder %v121_v3, 4  ;;  %vm131_vm1 = vcmp.le.s32.totalorder %v124_v4, %v121_v3  ;;  %vm126_vm2 = vcmp.eq.s32.totalorder %v124_v4, %v121_v3  ;;  %vm145_vm4 = vcmp.eq.s32.totalorder %v121_v3, 3  ;;  %s198_s3 = scalar_lea.vmem %s477_s1, %s308_s29 }
  0x1f   : > { %vm132_vm3 = vmand %vm131_vm1, %vm122_vm0  ;;  %vm142_vm5 = vcmp.eq.s32.totalorder %v121_v3, %v124_v4  ;;  %v146_v12 = vsel %vm145_vm4, 1.0, %v396_v11  ;;  %vm153_vm6 = vcmp.eq.s32.totalorder %v121_v3, 2  ;;  %vm163_vm7 = vcmp.eq.s32.totalorder %v121_v3, 1 }
  0x20   : > { %v147_v13 = vsel %vm142_vm5, %v146_v12, 0.0  ;;  %vm172_vm8 = vcmp.eq.s32.totalorder %v121_v3, 0 }
  0x25   : > { %v127_v5 = vld [vmem:[#allocation0] sm:$0xff] }
  0x26   : > { %v128_v6 = vsel %vm126_vm2, %v127_v5, 0.0  ;;  %v133_v7 = vsel %vm132_vm3, %v127_v5, 0.0 }
  0x27   : > { %129 = vadd.xlane.f32.xlu0 %v128_v6 }
  0xb4   : > { %v130_v8 = vpop.xlane.xlu0 %129 }
  0xb5   : > { %354 = vrcp.f32 %v130_v8  ;;  %vm179_vm9 = vweird.f32 %v130_v8 }
  0xbf   : > { %v355_v9 = vpop.eup %354 }
  0xc0   : > { %v135_v10 = vmul.f32 %v355_v9, %v133_v7 }
  0xc2   : > { %136 = vst [vmem:[#allocation4] sm:$0xff] %v135_v10 }
  0xc9   : > { %v149_v14 = vld [vmem:[#allocation4 + $0x2] ss:$0 sm:$0xff]  ;;  %v159_v17 = vld [vmem:[#allocation4 + $0x1] ss:$0 sm:$0xff]  ;;  %v168_v22 = vld [vmem:[#allocation4] ss:$0 sm:$0xff] }
  0xca   : > { %v150_v15 = vxor.u32 2147483648, %v149_v14  ;;  %v160_v19 = vxor.u32 2147483648, %v159_v17  ;;  %v169_v24 = vxor.u32 2147483648, %v168_v22 }
  0xcc   : > { %v154_v16 = vmul.f32 %v150_v15, %v147_v13 }
  0xce   : > { %155 = vadd.xlane.f32.xlu0 %v154_v16 }
 0x15b   : > { %v156_v18 = vpop.xlane.xlu0 %155 }
 0x15c   : > { %v157_v20 = vsel %vm153_vm6, %v156_v18, %v147_v13 }
 0x15d   : > { %v164_v21 = vmul.f32 %v160_v19, %v157_v20 }
 0x15f   : > { %165 = vadd.xlane.f32.xlu1 %v164_v21 }
 0x1ec   : > { %v166_v23 = vpop.xlane.xlu1 %165 }
 0x1ed   : > { %v167_v25 = vsel %vm163_vm7, %v166_v23, %v157_v20 }
 0x1ee   : > { %v173_v26 = vmul.f32 %v169_v24, %v167_v25 }
 0x1f0   : > { %174 = vadd.xlane.f32.xlu1 %v173_v26 }
 0x27d   : > { %v175_v27 = vpop.xlane.xlu1 %174 }
 0x27e   : > { %v176_v28 = vsel %vm172_vm8, %v175_v27, %v167_v25 }
 0x27f   : > { %v178_v29 = vmul.f32 %v355_v9, %v176_v28 }
 0x281   : > { %v180_v30 = vsel %vm179_vm9, %v176_v28, %v178_v29 }
 0x282   : > { %181 = vst [vmem:[#allocation2] sm:$0xff] %v180_v30 }
 0x289   : > { %v185_v31 = vld [vmem:[#allocation2] sm:$0xf] }
 0x28a   : > { %187 = vst [vmem:[%s115_s28] sm:$0xf] %v185_v31 }
 0x291   : > { %v214_v32 = vld [vmem:[%s115_s28] sm:$0xf] }
 0x292   : > { %215 = vst [vmem:[%s198_s3] sm:$0xf] %v214_v32 }
 0x293 PF: > { %s7_s10 = sadd.s32 1, %s394_s10   ;;  %s478_s6 = smov %s386_s8 }
 0x294   : > { %p4_p6 = scmp.ge.s32.totalorder %s7_s10, 50   ;;  %s479_s7 = smov %s390_s9 }
 0x295   : > { %s480_s8 = smov %s483_s12  ;;  %s481_s9 = smov %s487_s13 }
 0x296   :  { %6 = sbr.rel (!%p4_p6) target bundleno = 3 (0x3), region = 112 }

// kernel: squeeze.3
= control target key start
LH: loop header
LB: loop body
LE: loop exit
PB: predicated region body
PF: predicated region fallthrough
CT: control target
= control target key end

     0   :  { %s66_s8 = smov 101   ;;  %vm7_vm0 = vcmask 72704   ;;  %s67_s11 = smov 110   ;;  %s117_s0 = inlined_call_operand.vmem [shape: f32[2,72], index: 0, kind: input, shape index: {}]   ;;  %s118_s1 = inlined_call_operand.vmem [shape: f32[2,8,9], index: 1, kind: output, shape index: {}]  }
   0x1   :  { %v4_v0 = vld [vmem:[%s117_s0] sm:$0x3]  ;;  %s65_s0 = smov 119   ;;  %s68_s12 = smov 92  }
   0x2   :  { %5 = vst [vmem:[#allocation0] sm:$0x3] %v4_v0  ;;  %s69_s13 = smov 83   ;;  %s70_s14 = smov 74  }
   0x3   :  { %s71_s15 = smov 65  }
   0x9   :  { %v9_v1 = vld [vmem:[#allocation0] sm:$0x3]  }
   0xa   :  { %v21_v2 = vld [vmem:[#allocation0] sm:$0x3]   ;;  %10 = vrot.lane.b32.xlu0 %v9_v1, %s65_s0 }
   0xb   :  { %22 = vrot.lane.b32.xlu1 %v21_v2, %s66_s8  ;;  %v15_v3 = vld [vmem:[#allocation0] sm:$0x3]  }
   0xc   :  { %v27_v4 = vld [vmem:[#allocation0] sm:$0x3]  }
   0xd   :  { %v6_v5 = vld [vmem:[#allocation0] sm:$0x3]  }
   0xe   :  { %8 = vst.msk [vmem:[%s118_s1] ss:$8 sm:$0x3] %vm7_vm0, %v6_v5   ;;  %16 = vrot.lane.b32.xlu0 %v15_v3, %s67_s11  ;;  %v33_v6 = vld [vmem:[#allocation0] sm:$0x3]  }
   0xf   :  { %28 = vrot.lane.b32.xlu1 %v27_v4, %s68_s12  ;;  %v39_v7 = vld [vmem:[#allocation0] sm:$0x3]  }
  0x10   :  { %v45_v8 = vld [vmem:[#allocation0] sm:$0x3]  }
  0x12   :  { %34 = vrot.lane.b32.xlu0 %v33_v6, %s69_s13 }
  0x13   :  { %40 = vrot.lane.b32.xlu1 %v39_v7, %s70_s14 }
  0x16   :  { %46 = vrot.lane.b32.xlu0 %v45_v8, %s71_s15 }
  0x7c   :  { %v11_v9 = vpop.permute.xlu0 %10  }
  0x7d   :  { %v23_v10 = vpop.permute.xlu1 %22   ;;  %51 = vst.msk [vmem:[%s118_s1 + $0x1] ss:$8 sm:$0x3] %vm7_vm0, %v11_v9  }
  0x7e   :  { %53 = vst.msk [vmem:[%s118_s1 + $0x3] ss:$8 sm:$0x3] %vm7_vm0, %v23_v10  }
  0x80   :  { %v17_v11 = vpop.permute.xlu0 %16  }
  0x81   :  { %v29_v12 = vpop.permute.xlu1 %28   ;;  %52 = vst.msk [vmem:[%s118_s1 + $0x2] ss:$8 sm:$0x3] %vm7_vm0, %v17_v11  }
  0x82   :  { %54 = vst.msk [vmem:[%s118_s1 + $0x4] ss:$8 sm:$0x3] %vm7_vm0, %v29_v12  }
  0x84   :  { %v35_v13 = vpop.permute.xlu0 %34  }
  0x85   :  { %v41_v14 = vpop.permute.xlu1 %40   ;;  %55 = vst.msk [vmem:[%s118_s1 + $0x5] ss:$8 sm:$0x3] %vm7_vm0, %v35_v13  }
  0x86   :  { %56 = vst.msk [vmem:[%s118_s1 + $0x6] ss:$8 sm:$0x3] %vm7_vm0, %v41_v14  }
  0x88   :  { %v47_v15 = vpop.permute.xlu0 %46  }
  0x89   :  { %57 = vst.msk [vmem:[%s118_s1 + $0x7] ss:$8 sm:$0x3] %vm7_vm0, %v47_v15  }

// kernel: forward_deformer_eval.1
= control target key start
LH: loop header
LB: loop body
LE: loop exit
PB: predicated region body
PF: predicated region fallthrough
CT: control target
= control target key end

     0   :  { %s4329_s27 = smov 0   ;;  %s4331_s28 = smov 0   ;;  %s6006_s0 = inlined_call_operand.vmem [shape: f32[2,3,128], index: 0, kind: input, shape index: {}]   ;;  %s6007_s1 = inlined_call_operand.vmem [shape: f32[2,3,128], index: 1, kind: input, shape index: {}]   ;;  %s6008_s2 = inlined_call_operand.vmem [shape: f32[2,12,24], index: 2, kind: input, shape index: {}]   ;;  %s6009_s3 = inlined_call_operand.vmem [shape: f32[64,6], index: 3, kind: input, shape index: {}]   ;;  %s6010_s4 = inlined_call_operand.vmem [shape: f32[64,64], index: 4, kind: input, shape index: {}]   ;;  %s6011_s5 = inlined_call_operand.vmem [shape: f32[64,64], index: 5, kind: input, shape index: {}]   ;;  %s6012_s6 = inlined_call_operand.vmem [shape: f32[24,65], index: 6, kind: input, shape index: {}]   ;;  %s6013_s7 = inlined_call_operand.vmem [shape: f32[2,3,128], index: 7, kind: output, shape index: {0}]   ;;  %s6014_s8 = inlined_call_operand.vmem [shape: f32[2,1,128], index: 8, kind: output, shape index: {1}]  }
   0x1   :  { %s4333_s29 = smov 0  }
   0x2 LB: > { %s31_s30 = sadd.s32 1, %s4164_s28  ;;  %p3140_p0 = scmp.ge.s32.totalorder %s4168_s29, 1  ;;  %s4168_s29 = sphi %s4333_s29, %s19_s29   ;;  %s4164_s28 = sphi %s4331_s28, %s6357_s28   ;;  %s4160_s27 = sphi %s4329_s27, %s6356_s27  }
   0x3   : > { %p33_p1 = scmp.ge.s32.totalorder %s31_s30, 2  ;;  %p309_p2 = scmp.lt.s32.totalorder %s4168_s29, 3 }
   0x5   : > { %s6359_s30 = smov (%p33_p1, %s31_s30), 0  ;;  %p310_p3 = pnand %p3140_p0, %p309_p2 }
   0x7   : > { %313 = sbr.rel (%p310_p3) target bundleno = 2772 (0xad4), region = 48 }
   0xe   : > { %v4350_v0 = vld [vmem:[%s6009_s3 + $0x8] sm:$0xff]  ;;  %v4355_v1 = vld [vmem:[%s6009_s3] sm:$0xff]  ;;  %v4270_v2 = vmov 3   ;;  %v4271_v3 = vmov 1   ;;  %p365_p4 = scmp.lt.s32.totalorder %s4160_s27, 1  ;;  %v4272_v4 = vmov 2   ;;  %v6018_v20 = vlaneseq }
   0xf   : > { %3812 = vset.pattern.permute.xlu0 %v4270_v2  ;;  %3806 = vset.pattern.permute.xlu1 %v4271_v3  ;;  %v4387_v6 = vld [vmem:[%s6009_s3 + $0x10] sm:$0xff]  ;;  %v4396_v9 = vld [vmem:[%s6009_s3 + $0x28] sm:$0xff]  ;;  %v4273_v10 = vmov 0   ;;  %v4405_v11 = vld [vmem:[%s6009_s3 + $0x18] sm:$0xff]  ;;  %vm791_vm0 = vcmask 523264   ;;  %v4274_v31 = vmov 4  }
  0x10   : > { %595 = vperm.xlu0 %3812, %v4350_v0   ;;  %487 = vperm.xlu1 %3806, %v4355_v1   ;;  %s6361_s27 = smov (!%p365_p4, %s4160_s27), 1  ;;  %v4413_v12 = vld [vmem:[%s6009_s3 + $0x30] sm:$0xff]  ;;  %v4421_v13 = vld [vmem:[%s6009_s3 + $0x20] sm:$0xff]  ;;  %v4428_v14 = vld [vmem:[%s6009_s3 + $0x38] sm:$0xff]  ;;  %v4468_v23 = vshrl.u32 %v6018_v20, 7 }
  0x11   : > { %s4363_s13 = sshll.u32 %s6361_s27, 2  ;;  %s396_s16 = scalar_lea.vmem %s6014_s8, %s6361_s27  ;;  %v4455_v17 = vld [vmem:[%s6010_s4] sm:$0xff] }
  0x12   : > { %s4374_s19 = scalar_lea.vmem %s6006_s0, %s4363_s13  ;;  %s390_s22 = scalar_lea.vmem %s6013_s7, %s4363_s13  ;;  %6120 = vst [vmem:[#allocation4_spill] sm:$0xff] %v4455_v17  ;;  %3304 = vmatprep.mubr.msk.f32.mxu0 %vm791_vm0, %v4455_v17  ;;  %6125 = vst [vmem:[#allocation9_spill] sm:$0xff] %v4468_v23  ;;  %v6016_v26 = vsub.s32 1, %v4468_v23  ;;  %v6015_v27 = vsub.s32 2, %v4468_v23  ;;  %v6017_v28 = vsub.s32 0, %v4468_v23 }
  0x13   : > { %v4382_v5 = vld [vmem:[%s4374_s19] sm:$0x7]   ;;  %s3191_s14 = sshll.u32 %s6361_s27, 4  ;;  %s378_s24 = scalar_lea.vmem %s6007_s1, %s4363_s13 }
  0x14   : > { %3813 = vset.pattern.permute.xlu0 %v4272_v4  ;;  %491 = vperm.xlu1 %3806, %v4350_v0   ;;  %v4486_v32 = vrot.slane %v4382_v5, %v6016_v26  ;;  %v4491_v33 = vrot.slane %v4382_v5, %v6015_v27  ;;  %v4496_v34 = vrot.slane %v4382_v5, %v6017_v28  ;;  %s5085_s18 = scalar_lea.vmem %s6008_s2, %s3191_s14 }
  0x15   : > { %539 = vperm.xlu0 %3813, %v4355_v1  }
  0x18   : > { %3807 = vset.pattern.permute.xlu1 %v4272_v4 }
  0x19   : > { %547 = vperm.xlu0 %3813, %v4387_v6   ;;  %543 = vperm.xlu1 %3807, %v4350_v0  }
  0x1d   : > { %559 = vperm.xlu0 %3813, %v4396_v9   ;;  %3808 = vset.pattern.permute.xlu1 %v4273_v10 }
  0x1e   : > { %446 = vperm.xlu1 %3808, %v4387_v6  }
  0x21   : > { %3817 = vset.pattern.permute.xlu0 %v4273_v10 }
  0x22   : > { %436 = vperm.xlu0 %3817, %v4355_v1   ;;  %3809 = vset.pattern.permute.xlu1 %v4271_v3 }
  0x23   : > { %495 = vperm.xlu1 %3809, %v4387_v6  }
  0x26   : > { %441 = vperm.xlu0 %3817, %v4350_v0  }
  0x27   : > { %499 = vperm.xlu1 %3809, %v4405_v11  }
  0x2a   : > { %451 = vperm.xlu0 %3817, %v4405_v11  }
  0x2b   : > { %3810 = vset.pattern.permute.xlu1 %v4272_v4 }
  0x2c   : > { %551 = vperm.xlu1 %3810, %v4405_v11  }
  0x2e   : > { %466 = vperm.xlu0 %3817, %v4413_v12  }
  0x30   : > { %3811 = vset.pattern.permute.xlu1 %v4270_v2 }
  0x31   : > { %591 = vperm.xlu1 %3811, %v4355_v1  }
  0x32   : > { %3819 = vset.pattern.permute.xlu0 %v4271_v3 }
  0x33   : > { %503 = vperm.xlu0 %3819, %v4421_v13  }
  0x35   : > { %3814 = vset.pattern.permute.xlu1 %v4273_v10 }
  0x36   : > { %456 = vperm.xlu1 %3814, %v4421_v13  }
  0x37   : > { %515 = vperm.xlu0 %3819, %v4428_v14  }
  0x3a   : > { %461 = vperm.xlu1 %3814, %v4396_v9  }
  0x3b   : > { %3823 = vset.pattern.permute.xlu0 %v4270_v2 }
  0x3c   : > { %607 = vperm.xlu0 %3823, %v4421_v13  }
  0x3e   : > { %3815 = vset.pattern.permute.xlu1 %v4271_v3 }
  0x3f   : > { %507 = vperm.xlu1 %3815, %v4396_v9  }
  0x40   : > { %619 = vperm.xlu0 %3823, %v4428_v14  }
  0x43   : > { %3816 = vset.pattern.permute.xlu1 %v4272_v4 }
  0x44   : > { %555 = vperm.xlu1 %3816, %v4421_v13   ;;  %3826 = vset.pattern.permute.xlu0 %v4274_v31 }
  0x45   : > { %764 = vperm.xlu0 %3826, %v4350_v0  }
  0x48   : > { %3818 = vset.pattern.permute.xlu1 %v4270_v2 }
  0x49   : > { %599 = vperm.xlu1 %3818, %v4387_v6   ;;  %776 = vperm.xlu0 %3826, %v4421_v13  }
  0x4d   : > { %603 = vperm.xlu1 %3818, %v4405_v11   ;;  %784 = vperm.xlu0 %3826, %v4413_v12  }
  0x51   : > { %3820 = vset.pattern.permute.xlu1 %v4273_v10 }
  0x52   : > { %471 = vperm.xlu1 %3820, %v4428_v14  }
  0x56   : > { %3821 = vset.pattern.permute.xlu1 %v4271_v3 }
  0x57   : > { %511 = vperm.xlu1 %3821, %v4413_v12  }
  0x5b   : > { %3822 = vset.pattern.permute.xlu1 %v4272_v4 }
  0x5c   : > { %563 = vperm.xlu1 %3822, %v4413_v12  }
  0x60   : > { %567 = vperm.xlu1 %3822, %v4428_v14  }
  0x64   : > { %3824 = vset.pattern.permute.xlu1 %v4270_v2 }
  0x65   : > { %611 = vperm.xlu1 %3824, %v4396_v9  }
  0x69   : > { %615 = vperm.xlu1 %3824, %v4413_v12  }
  0x6d   : > { %3825 = vset.pattern.permute.xlu1 %v4274_v31 }
  0x6e   : > { %760 = vperm.xlu1 %3825, %v4355_v1  }
  0x72   : > { %768 = vperm.xlu1 %3825, %v4387_v6  }
  0x76   : > { %772 = vperm.xlu1 %3825, %v4405_v11  }
  0x7a   : > { %780 = vperm.xlu1 %3825, %v4396_v9  }
  0x7e   : > { %788 = vperm.xlu1 %3825, %v4428_v14  }
  0x8f   : > { %v4448_v15 = vpop.permute.xlu1 %487  ;;  %v4450_v16 = vpop.permute.xlu0 %595 }
  0x90   : > { %6118 = vst [vmem:[#allocation2_spill] sm:$0xff] %v4448_v15  ;;  %6119 = vst [vmem:[#allocation3_spill] sm:$0xff] %v4450_v16  ;;  %v522_v42 = vmul.f32 %v4486_v32, %v4448_v15 }
  0x93   : > { %v4457_v18 = vpop.permute.xlu1 %491 }
  0x94   : > { %6121 = vst [vmem:[#allocation5_spill] sm:$0xff] %v4457_v18  ;;  %v4461_v19 = vpop.permute.xlu0 %539  ;;  %v523_v36 = vmul.f32 %v4486_v32, %v4457_v18 }
  0x95   : > { %6122 = vst [vmem:[#allocation6_spill] sm:$0xff] %v4461_v19  ;;  %v574_v44 = vmul.f32 %v4491_v33, %v4461_v19 }
  0x98   : > { %v4463_v21 = vpop.permute.xlu1 %543  ;;  %v4465_v22 = vpop.permute.xlu0 %547 }
  0x99   : > { %6123 = vst [vmem:[#allocation7_spill] sm:$0xff] %v4463_v21  ;;  %6124 = vst [vmem:[#allocation8_spill] sm:$0xff] %v4465_v22  ;;  %v575_v40 = vmul.f32 %v4491_v33, %v4463_v21  ;;  %v576_v31 = vmul.f32 %v4491_v33, %v4465_v22 }
  0x9c   : > { %v4470_v24 = vpop.permute.xlu0 %559 }
  0x9d   : > { %6126 = vst [vmem:[#allocation10_spill] sm:$0xff] %v4470_v24  ;;  %v4472_v25 = vpop.permute.xlu1 %446 }
  0x9e   : > { %6127 = vst [vmem:[#allocation11_spill] sm:$0xff] %v4472_v25  ;;  %v480_v3 = vmul.f32 %v4496_v34, %v4472_v25 }
  0xa1   : > { %v4477_v29 = vpop.permute.xlu0 %436 }
  0xa2   : > { %6128 = vst [vmem:[#allocation12_spill] sm:$0xff] %v4477_v29  ;;  %v4479_v30 = vpop.permute.xlu1 %495  ;;  %v478_v39 = vmul.f32 %v4496_v34, %v4477_v29 }
  0xa3   : > { %6129 = vst [vmem:[#allocation13_spill] sm:$0xff] %v4479_v30  ;;  %v524_v63 = vmul.f32 %v4486_v32, %v4479_v30 }
  0xa4   : > { %v530_v45 = vadd.f32 %v522_v42, %v478_v39 }
  0xa5   : > { %v4498_v35 = vpop.permute.xlu0 %441 }
  0xa6   : > { %6130 = vst [vmem:[#allocation14_spill] sm:$0xff] %v4498_v35  ;;  %v479_v37 = vmul.f32 %v4496_v34, %v4498_v35  ;;  %v4504_v38 = vpop.permute.xlu1 %499  ;;  %v582_v49 = vadd.f32 %v574_v44, %v530_v45 }
  0xa7   : > { %6131 = vst [vmem:[#allocation15_spill] sm:$0xff] %v4504_v38 }
  0xa8   : > { %v531_v41 = vadd.f32 %v523_v36, %v479_v37  ;;  %v532_v36 = vadd.f32 %v524_v63, %v480_v3 }
  0xa9   : > { %v4540_v58 = vpop.permute.xlu0 %451 }
  0xaa   : > { %v583_v43 = vadd.f32 %v575_v40, %v531_v41  ;;  %6135 = vst [vmem:[#allocation19_spill] sm:$0xff] %v4540_v58  ;;  %v481_v37 = vmul.f32 %v4496_v34, %v4540_v58  ;;  %v525_v41 = vmul.f32 %v4486_v32, %v4504_v38 }
  0xab   : > { %v4516_v46 = vpop.permute.xlu1 %551 }
  0xac   : > { %6132 = vst [vmem:[#allocation16_spill] sm:$0xff] %v4516_v46  ;;  %v4521_v47 = vadd.f32 %v4450_v16, %v583_v43 }
  0xad   : > { %v4544_v60 = vpop.permute.xlu0 %466 }
  0xae   : > { %v4524_v48 = vmul.f32 100.0, %v4521_v47  ;;  %6137 = vst [vmem:[#allocation21_spill] sm:$0xff] %v4544_v60 }
  0xb0   : > { %v4527_v50 = vpop.permute.xlu1 %591  ;;  %v639_v51 = vmin.f32 %v4524_v48, 20.0  ;;  %vm647_vm4 = vcmp.gt.f32.partialorder %v4524_v48, 20.0 }
  0xb1   : > { %6133 = vst [vmem:[#allocation17_spill] sm:$0xff] %v4527_v50  ;;  %v4531_v52 = vadd.f32 %v4527_v50, %v582_v49  ;;  %v533_v49 = vadd.f32 %v525_v41, %v481_v37 }
  0xb2   : > { %v656_v53 = vmul.f32 1.442695, %v639_v51  ;;  %v4552_v4 = vpop.permute.xlu0 %503  ;;  %v577_v51 = vmul.f32 %v4491_v33, %v4516_v46 }
  0xb3   : > { %v4534_v54 = vmul.f32 100.0, %v4531_v52  ;;  %6139 = vst [vmem:[#allocation23_spill] sm:$0xff] %v4552_v4  ;;  %v526_v42 = vmul.f32 %v4486_v32, %v4552_v4 }
  0xb4   : > { %3831 = vpow2.f32 %v656_v53 }
  0xb5   : > { %v638_v55 = vmin.f32 %v4534_v54, 20.0  ;;  %v4538_v56 = vpop.permute.xlu1 %456  ;;  %vm646_vm3 = vcmp.gt.f32.partialorder %v4534_v54, 20.0 }
  0xb6   : > { %6134 = vst [vmem:[#allocation18_spill] sm:$0xff] %v4538_v56  ;;  %v482_v43 = vmul.f32 %v4496_v34, %v4538_v56  ;;  %v4566_v45 = vpop.permute.xlu0 %515 }
  0xb7   : > { %v654_v57 = vmul.f32 1.442695, %v638_v55  ;;  %6141 = vst [vmem:[#allocation25_spill] sm:$0xff] %v4566_v45  ;;  %v584_v55 = vadd.f32 %v576_v31, %v532_v36  ;;  %v529_v48 = vmul.f32 %v4486_v32, %v4566_v45 }
  0xb8   : > { %v534_v63 = vadd.f32 %v526_v42, %v482_v43 }
  0xb9   : > { %3833 = vpow2.f32 %v654_v57  ;;  %v4542_v59 = vpop.permute.xlu1 %461 }
  0xba   : > { %6136 = vst [vmem:[#allocation20_spill] sm:$0xff] %v4542_v59 }
  0xbb   : > { %v4580_v41 = vpop.permute.xlu0 %607 }
  0xbc   : > { %6143 = vst [vmem:[#allocation27_spill] sm:$0xff] %v4580_v41 }
  0xbe   : > { %v3832_v61 = vpop.eup %3831  ;;  %v4546_v62 = vpop.permute.xlu1 %507 }
  0xbf   : > { %6138 = vst [vmem:[#allocation22_spill] sm:$0xff] %v4546_v62  ;;  %v679_v2 = vadd.f32 1.0, %v3832_v61  ;;  %v682_v44 = vmul.f32 -0.5, %v3832_v61  ;;  %v685_v26 = vand.u32 2147483647, %v3832_v61 }
  0xc1   : > { %3835 = vlog2.f32 %v679_v2  ;;  %v683_v27 = vadd.f32 1.0, %v682_v44  ;;  %vm686_vm1 = vcmp.lt.f32.partialorder %v685_v26, 0.0004427343 }
  0xc3   : > { %v3834_v10 = vpop.eup %3833  ;;  %v4558_v39 = vpop.permute.xlu1 %555 }
  0xc4   : > { %6140 = vst [vmem:[#allocation24_spill] sm:$0xff] %v4558_v39  ;;  %v670_v40 = vadd.f32 1.0, %v3834_v10  ;;  %v578_v53 = vmul.f32 %v4491_v33, %v4558_v39  ;;  %v673_v3 = vmul.f32 -0.5, %v3834_v10  ;;  %v676_v44 = vand.u32 2147483647, %v3834_v10 }
  0xc6   : > { %3837 = vlog2.f32 %v670_v40  ;;  %v586_v7 = vadd.f32 %v578_v53, %v534_v63  ;;  %v585_v40 = vadd.f32 %v577_v51, %v533_v49  ;;  %v674_v43 = vadd.f32 1.0, %v673_v3 }
  0xc7   : > { %vm677_vm2 = vcmp.lt.f32.partialorder %v676_v44, 0.0004427343 }
  0xc8   : > { %v4572_v57 = vpop.permute.xlu1 %599  ;;  %v4589_v53 = vadd.f32 %v4580_v41, %v586_v7 }
  0xc9   : > { %6142 = vst [vmem:[#allocation26_spill] sm:$0xff] %v4572_v57  ;;  %v4575_v2 = vadd.f32 %v4572_v57, %v584_v55  ;;  %v684_v55 = vmul.f32 %v3832_v61, %v683_v27 }
  0xca   : > { %v4598_v26 = vmul.f32 100.0, %v4589_v53 }
  0xcb   : > { %v3836_v28 = vpop.eup %3835  ;;  %v4578_v37 = vmul.f32 100.0, %v4575_v2 }
  0xcc   : > { %v4582_v8 = vpop.permute.xlu1 %603  ;;  %v681_v31 = vmul.f32 0.6931472, %v3836_v28  ;;  %vm650_vm12 = vcmp.gt.f32.partialorder %v4598_v26, 20.0 }
  0xcd   : > { %6144 = vst [vmem:[#allocation28_spill] sm:$0xff] %v4582_v8  ;;  %v640_v36 = vmin.f32 %v4578_v37, 20.0  ;;  %v4586_v42 = vadd.f32 %v4582_v8, %v585_v40  ;;  %v675_v8 = vmul.f32 %v3834_v10, %v674_v43  ;;  %v642_v10 = vmin.f32 %v4598_v26, 20.0 }
  0xce   : > { %v687_v51 = vsel %vm686_vm1, %v684_v55, %v681_v31  ;;  %vm648_vm7 = vcmp.gt.f32.partialorder %v4578_v37, 20.0 }
  0xcf   : > { %v658_v63 = vmul.f32 1.442695, %v640_v36  ;;  %v4592_v49 = vmul.f32 100.0, %v4586_v42  ;;  %v744_v27 = vmul.f32 0.01, %v687_v51 }
  0xd0   : > { %v3838_v20 = vpop.eup %3837  ;;  %v662_v44 = vmul.f32 1.442695, %v642_v10  ;;  %v4625_v10 = vpop.permute.xlu0 %619 }
  0xd1   : > { %3839 = vpow2.f32 %v658_v63  ;;  %v641_v28 = vmin.f32 %v4592_v49, 20.0  ;;  %v4595_v57 = vpop.permute.xlu1 %471  ;;  %v672_v40 = vmul.f32 0.6931472, %v3838_v20  ;;  %v752_v20 = vsel %vm647_vm4, %v4521_v47, %v744_v27  ;;  %6149 = vst [vmem:[#allocation33_spill] sm:$0xff] %v4625_v10 }
  0xd2   : > { %6145 = vst [vmem:[#allocation29_spill] sm:$0xff] %v4595_v57  ;;  %v483_v47 = vmul.f32 %v4496_v34, %v4542_v59  ;;  %vm649_vm8 = vcmp.gt.f32.partialorder %v4592_v49, 20.0 }
  0xd3   : > { %v660_v7 = vmul.f32 1.442695, %v641_v28  ;;  %v678_v61 = vsel %vm677_vm2, %v675_v8, %v672_v40  ;;  %v527_v8 = vmul.f32 %v4486_v32, %v4546_v62 }
  0xd4   : > { %v743_v3 = vmul.f32 0.01, %v678_v61 }
  0xd5   : > { %3841 = vpow2.f32 %v660_v7  ;;  %v535_v28 = vadd.f32 %v527_v8, %v483_v47  ;;  %v484_v8 = vmul.f32 %v4496_v34, %v4544_v60 }
  0xd6   : > { %v4602_v31 = vpop.permute.xlu1 %511  ;;  %v751_v36 = vsel %vm646_vm3, %v4531_v52, %v743_v3  ;;  %v485_v52 = vmul.f32 %v4496_v34, %v4595_v57 }
  0xd7   : > { %6146 = vst [vmem:[#allocation30_spill] sm:$0xff] %v4602_v31  ;;  %v3468_v43 = vpack.c.bf16 %v752_v20, %v751_v36  ;;  %v579_v36 = vmul.f32 %v4491_v33, %v4470_v24  ;;  %v528_v20 = vmul.f32 %v4486_v32, %v4602_v31 }
  0xd8   : > { %v537_v27 = vadd.f32 %v529_v48, %v485_v52 }
  0xd9   : > { %3469 = vmatprep.subr.bf16.mxu0 %v3468_v43  ;;  %v587_v48 = vadd.f32 %v579_v36, %v535_v28 }
  0xda   : > { %3471 = vmatpush3.bf16.msra.mxu0 %v3468_v43 }
  0xdb   : > { %v3840_v55 = vpop.eup %3839  ;;  %v4609_v54 = vpop.permute.xlu1 %563 }
  0xdc   : > { %6147 = vst [vmem:[#allocation31_spill] sm:$0xff] %v4609_v54  ;;  %v688_v63 = vadd.f32 1.0, %v3840_v55  ;;  %v691_v61 = vmul.f32 -0.5, %v3840_v55 }
  0xde   : > { %3843 = vlog2.f32 %v688_v63  ;;  %v692_v47 = vadd.f32 1.0, %v691_v61 }
  0xdf   : > { %v3842_v51 = vpop.eup %3841  ;;  %3845 = vpow2.f32 %v662_v44  ;;  %v4617_v40 = vpop.permute.xlu1 %567  ;;  %v580_v44 = vmul.f32 %v4491_v33, %v4609_v54 }
  0xe0   : > { %6148 = vst [vmem:[#allocation32_spill] sm:$0xff] %v4617_v40  ;;  %v581_v7 = vmul.f32 %v4491_v33, %v4617_v40  ;;  %v697_v3 = vadd.f32 1.0, %v3842_v51  ;;  %v536_v40 = vadd.f32 %v528_v20, %v484_v8  ;;  %v700_v41 = vmul.f32 -0.5, %v3842_v51 }
  0xe2   : > { %v589_v43 = vadd.f32 %v581_v7, %v537_v27  ;;  %3847 = vlog2.f32 %v697_v3  ;;  %v694_v7 = vand.u32 2147483647, %v3840_v55  ;;  %v588_v33 = vadd.f32 %v580_v44, %v536_v40 }
  0xe4   : > { %v4632_v52 = vadd.f32 %v4625_v10, %v589_v43  ;;  %v4634_v63 = vpop.permute.xlu1 %611  ;;  %v693_v43 = vmul.f32 %v3840_v55, %v692_v47  ;;  %v701_v10 = vadd.f32 1.0, %v700_v41  ;;  %vm695_vm5 = vcmp.lt.f32.partialorder %v694_v7, 0.0004427343 }
  0xe5   : > { %6150 = vst [vmem:[#allocation34_spill] sm:$0xff] %v4634_v63  ;;  %v4637_v32 = vadd.f32 %v4634_v63, %v587_v48  ;;  %v703_v63 = vand.u32 2147483647, %v3842_v51 }
  0xe6   : > { %v4640_v27 = vmul.f32 100.0, %v4632_v52  ;;  %v702_v31 = vmul.f32 %v3842_v51, %v701_v10 }
  0xe7   : > { %v4643_v34 = vmul.f32 100.0, %v4637_v32  ;;  %vm704_vm6 = vcmp.lt.f32.partialorder %v703_v63, 0.0004427343 }
  0xe8   : > { %v3844_v28 = vpop.eup %3843  ;;  %v645_v3 = vmin.f32 %v4640_v27, 20.0  ;;  %v4646_v36 = vpop.permute.xlu1 %615  ;;  %vm653_vm15 = vcmp.gt.f32.partialorder %v4640_v27, 20.0  ;;  %v4690_v27 = vld [vmem:[%s6010_s4 + $0x20] sm:$0xff] }
  0xe9   : > { %6151 = vst [vmem:[#allocation35_spill] sm:$0xff] %v4646_v36  ;;  %v3846_v61 = vpop.eup %3845  ;;  %v643_v20 = vmin.f32 %v4643_v34, 20.0  ;;  %v4650_v8 = vadd.f32 %v4646_v36, %v588_v33  ;;  %v690_v48 = vmul.f32 0.6931472, %v3844_v28  ;;  %vm651_vm13 = vcmp.gt.f32.partialorder %v4643_v34, 20.0  ;;  %6155 = vst [vmem:[#allocation39_spill] sm:$0xff] %v4690_v27 }
  0xea   : > { %v668_v54 = vmul.f32 1.442695, %v645_v3  ;;  %v706_v45 = vadd.f32 1.0, %v3846_v61  ;;  %v709_v51 = vmul.f32 -0.5, %v3846_v61 }
  0xeb   : > { %v664_v16 = vmul.f32 1.442695, %v643_v20  ;;  %v4653_v40 = vmul.f32 100.0, %v4650_v8  ;;  %v696_v44 = vsel %vm695_vm5, %v693_v43, %v690_v48  ;;  %v712_v20 = vand.u32 2147483647, %v3846_v61 }
  0xec   : > { %v3848_v50 = vpop.eup %3847  ;;  %3849 = vpow2.f32 %v668_v54  ;;  %v745_v33 = vmul.f32 0.01, %v696_v44  ;;  %v710_v37 = vadd.f32 1.0, %v709_v51 }
  0xed   : > { %3851 = vpow2.f32 %v664_v16  ;;  %v644_v55 = vmin.f32 %v4653_v40, 20.0  ;;  %v699_v47 = vmul.f32 0.6931472, %v3848_v50  ;;  %vm713_vm9 = vcmp.lt.f32.partialorder %v712_v20, 0.0004427343 }
  0xee   : > { %3853 = vlog2.f32 %v706_v45  ;;  %v753_v7 = vsel %vm648_vm7, %v4575_v2, %v745_v33  ;;  %vm652_vm1 = vcmp.gt.f32.partialorder %v4653_v40, 20.0  ;;  %v4713_v40 = vld [vmem:[%s6010_s4 + $0x38] sm:$0xff] }
  0xef   : > { %v666_v28 = vmul.f32 1.442695, %v644_v55  ;;  %v705_v41 = vsel %vm704_vm6, %v702_v31, %v699_v47  ;;  %6158 = vst [vmem:[#allocation42_spill] sm:$0xff] %v4713_v40 }
  0xf0   : > { %v746_v3 = vmul.f32 0.01, %v705_v41 }
  0xf1   : > { %3855 = vpow2.f32 %v666_v28 }
  0xf2   : > { %v754_v54 = vsel %vm649_vm8, %v4586_v42, %v746_v3  ;;  %v711_v42 = vmul.f32 %v3846_v61, %v710_v37 }
  0xf3   : > { %v3472_v16 = vpack.c.bf16 %v754_v54, %v753_v7 }
  0xf5   : > { %3473 = vmatprep.subr.bf16.mxu0 %v3472_v16 }
  0xf6   : > { %v3850_v43 = vpop.eup %3849  ;;  %3475 = vmatpush3.bf16.msra.mxu0 %v3472_v16 }
  0xf7   : > { %v3852_v50 = vpop.eup %3851  ;;  %v733_v10 = vadd.f32 1.0, %v3850_v43  ;;  %v736_v2 = vmul.f32 -0.5, %v3850_v43  ;;  %v739_v3 = vand.u32 2147483647, %v3850_v43 }
  0xf8   : > { %v715_v63 = vadd.f32 1.0, %v3852_v50  ;;  %v3854_v31 = vpop.eup %3853  ;;  %v718_v44 = vmul.f32 -0.5, %v3852_v50  ;;  %v721_v41 = vand.u32 2147483647, %v3852_v50 }
  0xf9   : > { %3857 = vlog2.f32 %v733_v10  ;;  %v708_v48 = vmul.f32 0.6931472, %v3854_v31  ;;  %v737_v28 = vadd.f32 1.0, %v736_v2  ;;  %vm740_vm11 = vcmp.lt.f32.partialorder %v739_v3, 0.0004427343  ;;  %v4736_v3 = vpop.permute.xlu0 %764 }
  0xfa   : > { %3859 = vlog2.f32 %v715_v63  ;;  %v719_v47 = vadd.f32 1.0, %v718_v44  ;;  %vm722_vm10 = vcmp.lt.f32.partialorder %v721_v41, 0.0004427343  ;;  %6162 = vst [vmem:[#allocation46_spill] sm:$0xff] %v4736_v3 }
  0xfb   : > { %v3856_v45 = vpop.eup %3855  ;;  %v714_v55 = vsel %vm713_vm9, %v711_v42, %v708_v48  ;;  %v738_v24 = vmul.f32 %v3850_v43, %v737_v28  ;;  %v4732_v28 = vpop.permute.xlu1 %760 }
  0xfc   : > { %v724_v49 = vadd.f32 1.0, %v3856_v45  ;;  %v727_v33 = vmul.f32 -0.5, %v3856_v45  ;;  %v747_v16 = vmul.f32 0.01, %v714_v55  ;;  %v720_v51 = vmul.f32 %v3852_v50, %v719_v47  ;;  %6160 = vst [vmem:[#allocation44_spill] sm:$0xff] %v4732_v28 }
  0xfd   : > { %v730_v31 = vand.u32 2147483647, %v3856_v45 }
  0xfe   : > { %3861 = vlog2.f32 %v724_v49  ;;  %v728_v36 = vadd.f32 1.0, %v727_v33  ;;  %v755_v2 = vsel %vm650_vm12, %v4589_v53, %v747_v16  ;;  %v4671_v53 = vld [vmem:[%s6010_s4 + $0x8] sm:$0xff]  ;;  %v4275_v33 = vmov 5  }
  0xff   : > { %vm731_vm14 = vcmp.lt.f32.partialorder %v730_v31, 0.0004427343  ;;  %6152 = vst [vmem:[#allocation36_spill] sm:$0xff] %v4671_v53  ;;  %3827 = vset.pattern.permute.xlu0 %v4275_v33  ;;  %3828 = vset.pattern.permute.xlu1 %v4275_v33  ;;  %v4734_v41 = vpop.permute.xlu1 %768  ;;  %v4762_v31 = vpop.permute.xlu0 %776 }
 0x100   : > { %v729_v44 = vmul.f32 %v3856_v45, %v728_v36  ;;  %v4699_v36 = vld [vmem:[%s6010_s4 + $0x28] sm:$0xff]  ;;  %v4720_v45 = vld [vmem:[%s6011_s5] sm:$0xff]  ;;  %1050 = vperm.xlu0 %3827, %v4355_v1   ;;  %1054 = vperm.xlu1 %3828, %v4350_v0   ;;  %6161 = vst [vmem:[#allocation45_spill] sm:$0xff] %v4734_v41  ;;  %6165 = vst [vmem:[#allocation49_spill] sm:$0xff] %v4762_v31 }
 0x101   : > { %6156 = vst [vmem:[#allocation40_spill] sm:$0xff] %v4699_v36  ;;  %6159 = vst [vmem:[#allocation43_spill] sm:$0xff] %v4720_v45  ;;  %3332 = vmatprep.mubr.msk.f32.mxu1 %vm791_vm0, %v4720_v45 }
 0x103   : > { %v3858_v7 = vpop.eup %3857  ;;  %v4738_v1 = vpop.permute.xlu1 %772 }
 0x104   : > { %v3860_v54 = vpop.eup %3859  ;;  %v735_v10 = vmul.f32 0.6931472, %v3858_v7  ;;  %1062 = vperm.xlu0 %3827, %v4405_v11   ;;  %1058 = vperm.xlu1 %3828, %v4387_v6   ;;  %6163 = vst [vmem:[#allocation47_spill] sm:$0xff] %v4738_v1 }
 0x105   : > { %v717_v63 = vmul.f32 0.6931472, %v3860_v54 }
 0x106   : > { %v741_v61 = vsel %vm740_vm11, %v738_v24, %v735_v10 }
 0x107   : > { %v723_v49 = vsel %vm722_vm10, %v720_v51, %v717_v63  ;;  %v750_v50 = vmul.f32 0.01, %v741_v61  ;;  %v4756_v10 = vpop.permute.xlu1 %780 }
 0x108   : > { %v3862_v37 = vpop.eup %3861  ;;  %v748_v20 = vmul.f32 0.01, %v723_v49  ;;  %1070 = vperm.xlu0 %3827, %v4396_v9   ;;  %1066 = vperm.xlu1 %3828, %v4421_v13   ;;  %6164 = vst [vmem:[#allocation48_spill] sm:$0xff] %v4756_v10 }
 0x109   : > { %v726_v48 = vmul.f32 0.6931472, %v3862_v37  ;;  %v758_v26 = vsel %vm653_vm15, %v4632_v52, %v750_v50  ;;  %v4685_v52 = vld [vmem:[%s6010_s4 + $0x18] sm:$0xff] }
 0x10a   : > { %v756_v42 = vsel %vm651_vm13, %v4637_v32, %v748_v20  ;;  %v4676_v32 = vld [vmem:[%s6010_s4 + $0x10] sm:$0xff]  ;;  %6154 = vst [vmem:[#allocation38_spill] sm:$0xff] %v4685_v52 }
 0x10b   : > { %v3476_v43 = vpack.c.bf16 %v756_v42, %v755_v2  ;;  %v732_v55 = vsel %vm731_vm14, %v729_v44, %v726_v48  ;;  %6153 = vst [vmem:[#allocation37_spill] sm:$0xff] %v4676_v32 }
 0x10c   : > { %v749_v47 = vmul.f32 0.01, %v732_v55  ;;  %1078 = vperm.xlu0 %3827, %v4428_v14   ;;  %1074 = vperm.xlu1 %3828, %v4413_v12  }
 0x10d   : > { %3477 = vmatprep.subr.bf16.mxu0 %v3476_v43 }
 0x10e   : > { %3479 = vmatpush3.bf16.msra.mxu0 %v3476_v43  ;;  %v757_v24 = vsel %vm652_vm1, %v4650_v8, %v749_v47  ;;  %v4704_v8 = vld [vmem:[%s6010_s4 + $0x30] sm:$0xff] }
 0x10f   : > { %v3480_v34 = vpack.c.bf16 %v758_v26, %v757_v24  ;;  %6157 = vst [vmem:[#allocation41_spill] sm:$0xff] %v4704_v8  ;;  %v4781_v24 = vpop.permute.xlu1 %788 }
 0x110   : > { %6166 = vst [vmem:[#allocation50_spill] sm:$0xff] %v4781_v24 }
 0x111   : > { %3481 = vmatprep.subr.bf16.mxu0 %v3480_v34 }
 0x112   : > { %3483 = vmatpush3.bf16.msra.mxu0 %v3480_v34 }
 0x115   : > { %3305 = vmatmul.mubr.msk.f32.vlgmr.msra.gmra.mrb[0].mxu0 %vm791_vm0, %v4671_v53 }
 0x116   : > { %3307 = vmatprep.mubr.msk.f32.mxu0 %vm791_vm0, %v4676_v32 }
 0x119   : > { %3308 = vmatmul.mubr.msk.f32.gmra.mrb[2].mxu0 %vm791_vm0, %v4685_v52 }
 0x11a   : > { %3310 = vmatprep.mubr.msk.f32.mxu0 %vm791_vm0, %v4690_v27 }
 0x11d   : > { %3311 = vmatmul.mubr.msk.f32.gmra.mrb[4].mxu0 %vm791_vm0, %v4699_v36 }
 0x11e   : > { %3313 = vmatprep.mubr.msk.f32.mxu0 %vm791_vm0, %v4704_v8 }
 0x121   : > { %3314 = vmatmul.mubr.msk.f32.gmra.mrb[6].mxu0 %vm791_vm0, %v4713_v40 }
 0x1e8   : > { %v3306_v0 = vpop.f32.mrb[0].mxu0 }
 0x1e9   : > { %v4741_v11 = vadd.f32 %v3306_v0, %v4736_v3  ;;  %v882_v6 = vpop.f32.mrb[1].mxu0  ;;  %v4786_v0 = vpop.permute.xlu0 %784 }
 0x1ea   : > { %v4744_v9 = vadd.f32 %v882_v6, %v4732_v28  ;;  %6167 = vst [vmem:[#allocation51_spill] sm:$0xff] %v4786_v0 }
 0x1eb   : > { %v4747_v13 = vmul.f32 100.0, %v4741_v11 }
 0x1ec   : > { %v4750_v12 = vmul.f32 100.0, %v4744_v9  ;;  %v3309_v14 = vpop.f32.mrb[2].mxu0 }
 0x1ed   : > { %v930_v7 = vmin.f32 %v4747_v13, 20.0  ;;  %v4754_v54 = vadd.f32 %v3309_v14, %v4738_v1  ;;  %v892_v16 = vpop.f32.mrb[3].mxu0  ;;  %vm938_vm2 = vcmp.gt.f32.partialorder %v4747_v13, 20.0 }
 0x1ee   : > { %v929_v63 = vmin.f32 %v4750_v12, 20.0  ;;  %v4760_v51 = vadd.f32 %v892_v16, %v4734_v41  ;;  %vm937_vm3 = vcmp.gt.f32.partialorder %v4750_v12, 20.0 }
 0x1ef   : > { %v947_v49 = vmul.f32 1.442695, %v930_v7  ;;  %v4765_v61 = vmul.f32 100.0, %v4754_v54 }
 0x1f0   : > { %v945_v37 = vmul.f32 1.442695, %v929_v63  ;;  %v4768_v20 = vmul.f32 100.0, %v4760_v51  ;;  %v3312_v48 = vpop.f32.mrb[4].mxu0 }
 0x1f1   : > { %3863 = vpow2.f32 %v947_v49  ;;  %v932_v44 = vmin.f32 %v4765_v61, 20.0  ;;  %v4772_v2 = vadd.f32 %v3312_v48, %v4756_v10  ;;  %v902_v42 = vpop.f32.mrb[5].mxu0  ;;  %vm940_vm6 = vcmp.gt.f32.partialorder %v4765_v61, 20.0 }
 0x1f2   : > { %3865 = vpow2.f32 %v945_v37  ;;  %v931_v50 = vmin.f32 %v4768_v20, 20.0  ;;  %v4776_v43 = vadd.f32 %v902_v42, %v4762_v31  ;;  %vm939_vm7 = vcmp.gt.f32.partialorder %v4768_v20, 20.0 }
 0x1f3   : > { %v951_v55 = vmul.f32 1.442695, %v932_v44  ;;  %v4779_v47 = vmul.f32 100.0, %v4772_v2 }
 0x1f4   : > { %v949_v26 = vmul.f32 1.442695, %v931_v50  ;;  %v4784_v34 = vmul.f32 100.0, %v4776_v43  ;;  %v3315_v33 = vpop.f32.mrb[6].mxu0 }
 0x1f5   : > { %3867 = vpow2.f32 %v951_v55  ;;  %v934_v6 = vmin.f32 %v4779_v47, 20.0  ;;  %v4790_v14 = vadd.f32 %v3315_v33, %v4781_v24  ;;  %v912_v7 = vpop.f32.mrb[7].mxu0  ;;  %vm942_vm12 = vcmp.gt.f32.partialorder %v4779_v47, 20.0 }
 0x1f6   : > { %3869 = vpow2.f32 %v949_v26  ;;  %v933_v16 = vmin.f32 %v4784_v34, 20.0  ;;  %v4794_v63 = vadd.f32 %v912_v7, %v4786_v0  ;;  %vm941_vm13 = vcmp.gt.f32.partialorder %v4784_v34, 20.0 }
 0x1f7   : > { %v955_v49 = vmul.f32 1.442695, %v934_v6  ;;  %v4797_v37 = vmul.f32 100.0, %v4790_v14 }
 0x1f8   : > { %v953_v48 = vmul.f32 1.442695, %v933_v16  ;;  %v4800_v44 = vmul.f32 100.0, %v4794_v63 }
 0x1f9   : > { %3871 = vpow2.f32 %v955_v49  ;;  %v936_v42 = vmin.f32 %v4797_v37, 20.0  ;;  %vm944_vm1 = vcmp.gt.f32.partialorder %v4797_v37, 20.0  ;;  %v4884_v37 = vld [vmem:[%s6011_s5 + $0x10] sm:$0xff] }
 0x1fa   : > { %3873 = vpow2.f32 %v953_v48  ;;  %v935_v50 = vmin.f32 %v4800_v44, 20.0  ;;  %6179 = vst [vmem:[#allocation53_spill] sm:$0xff] %v4884_v37 }
 0x1fb   : > { %v3864_v55 = vpop.eup %3863  ;;  %v959_v26 = vmul.f32 1.442695, %v936_v42 }
 0x1fc   : > { %v3866_v33 = vpop.eup %3865  ;;  %v957_v24 = vmul.f32 1.442695, %v935_v50  ;;  %v970_v7 = vadd.f32 1.0, %v3864_v55  ;;  %v973_v49 = vmul.f32 -0.5, %v3864_v55  ;;  %v976_v28 = vand.u32 2147483647, %v3864_v55 }
 0x1fd   : > { %3875 = vpow2.f32 %v959_v26  ;;  %v961_v6 = vadd.f32 1.0, %v3866_v33  ;;  %v964_v10 = vmul.f32 -0.5, %v3866_v33  ;;  %v967_v50 = vand.u32 2147483647, %v3866_v33 }
 0x1fe   : > { %3877 = vpow2.f32 %v957_v24  ;;  %v974_v40 = vadd.f32 1.0, %v973_v49  ;;  %vm4811_vm4 = vcmp.lt.f32.partialorder %v976_v28, 0.0004427343 }
 0x1ff   : > { %v3868_v0 = vpop.eup %3867  ;;  %3879 = vlog2.f32 %v961_v6  ;;  %v965_v26 = vadd.f32 1.0, %v964_v10  ;;  %vm4817_vm5 = vcmp.lt.f32.partialorder %v967_v50, 0.0004427343 }
 0x200   : > { %v3870_v16 = vpop.eup %3869  ;;  %3881 = vlog2.f32 %v970_v7  ;;  %v988_v31 = vadd.f32 1.0, %v3868_v0  ;;  %v991_v48 = vmul.f32 -0.5, %v3868_v0  ;;  %v975_v32 = vmul.f32 %v3864_v55, %v974_v40 }
 0x201   : > { %v979_v41 = vadd.f32 1.0, %v3870_v16  ;;  %v982_v24 = vmul.f32 -0.5, %v3870_v16  ;;  %v985_v8 = vand.u32 2147483647, %v3870_v16  ;;  %v966_v28 = vmul.f32 %v3866_v33, %v965_v26 }
 0x202   : > { %3883 = vlog2.f32 %v988_v31  ;;  %v992_v7 = vadd.f32 1.0, %v991_v48  ;;  %v994_v48 = vand.u32 2147483647, %v3868_v0 }
 0x203   : > { %v3872_v1 = vpop.eup %3871  ;;  %3885 = vlog2.f32 %v979_v41  ;;  %v983_v53 = vadd.f32 1.0, %v982_v24  ;;  %vm4826_vm8 = vcmp.lt.f32.partialorder %v985_v8, 0.0004427343  ;;  %v4936_v41 = vld [vmem:[%s6012_s6 + $0x8] sm:$0xff] }
 0x204   : > { %v4804_v42 = vpop.eup %3873  ;;  %v1006_v3 = vadd.f32 1.0, %v3872_v1  ;;  %v1009_v31 = vmul.f32 -0.5, %v3872_v1  ;;  %v993_v4 = vmul.f32 %v3868_v0, %v992_v7  ;;  %v1012_v21 = vand.u32 2147483647, %v3872_v1 }
 0x205   : > { %v997_v6 = vadd.f32 1.0, %v4804_v42  ;;  %vm4832_vm9 = vcmp.lt.f32.partialorder %v994_v48, 0.0004427343 }
 0x206   : > { %3887 = vlog2.f32 %v1006_v3  ;;  %v1000_v3 = vmul.f32 -0.5, %v4804_v42  ;;  %v1010_v22 = vadd.f32 1.0, %v1009_v31  ;;  %v984_v31 = vmul.f32 %v3870_v16, %v983_v53 }
 0x207   : > { %v4807_v36 = vpop.eup %3875  ;;  %3889 = vlog2.f32 %v997_v6  ;;  %vm4846_vm10 = vcmp.lt.f32.partialorder %v1012_v21, 0.0004427343 }
 0x208   : > { %v4815_v10 = vpop.eup %3877  ;;  %v1024_v27 = vadd.f32 1.0, %v4807_v36  ;;  %v1001_v33 = vadd.f32 1.0, %v1000_v3  ;;  %v1027_v26 = vmul.f32 -0.5, %v4807_v36  ;;  %v1030_v13 = vand.u32 2147483647, %v4807_v36 }
 0x209   : > { %v3880_v52 = vpop.eup %3879  ;;  %v1015_v6 = vadd.f32 1.0, %v4815_v10  ;;  %v1018_v49 = vmul.f32 -0.5, %v4815_v10 }
 0x20a   : > { %v3882_v39 = vpop.eup %3881  ;;  %v963_v50 = vmul.f32 0.6931472, %v3880_v52  ;;  %3891 = vlog2.f32 %v1024_v27  ;;  %v1003_v52 = vand.u32 2147483647, %v4804_v42  ;;  %v1002_v12 = vmul.f32 %v4804_v42, %v1001_v33 }
 0x20b   : > { %v972_v46 = vmul.f32 0.6931472, %v3882_v39  ;;  %3893 = vlog2.f32 %v1015_v6  ;;  %v1021_v42 = vand.u32 2147483647, %v4815_v10  ;;  %vm1031_vm14 = vcmp.lt.f32.partialorder %v1030_v13, 0.0004427343 }
 0x20c   : > { %v3884_v19 = vpop.eup %3883  ;;  %v969_v40 = vsel %vm4817_vm5, %v966_v28, %v963_v50  ;;  %v1011_v28 = vmul.f32 %v3872_v1, %v1010_v22  ;;  %v1028_v22 = vadd.f32 1.0, %v1027_v26  ;;  %v1019_v50 = vadd.f32 1.0, %v1018_v49  ;;  %v4921_v49 = vld [vmem:[%s6011_s5 + $0x38] sm:$0xff] }
 0x20d   : > { %v3886_v8 = vpop.eup %3885  ;;  %v978_v0 = vsel %vm4811_vm4, %v975_v32, %v972_v46  ;;  %v1033_v27 = vmul.f32 0.01, %v969_v40  ;;  %v990_v39 = vmul.f32 0.6931472, %v3884_v19  ;;  %vm1004_vm11 = vcmp.lt.f32.partialorder %v1003_v52, 0.0004427343 }
 0x20e   : > { %v1034_v24 = vmul.f32 0.01, %v978_v0  ;;  %v981_v7 = vmul.f32 0.6931472, %v3886_v8  ;;  %vm1022_vm15 = vcmp.lt.f32.partialorder %v1021_v42, 0.0004427343 }
 0x20f   : > { %v1041_v48 = vsel %vm937_vm3, %v4744_v9, %v1033_v27  ;;  %v996_v3 = vsel %vm4832_vm9, %v993_v4, %v990_v39  ;;  %v1020_v27 = vmul.f32 %v4815_v10, %v1019_v50  ;;  %6184 = vst [vmem:[#allocation58_spill] sm:$0xff] %v4921_v49  ;;  %vm4277_vm3 = vmmov 0  }
 0x210   : > { %v3888_v19 = vpop.eup %3887  ;;  %v1042_v46 = vsel %vm938_vm2, %v4741_v11, %v1034_v24  ;;  %v987_v53 = vsel %vm4826_vm8, %v984_v31, %v981_v7  ;;  %v1036_v32 = vmul.f32 0.01, %v996_v3  ;;  %vm943_vm2 = vcmp.gt.f32.partialorder %v4800_v44, 20.0  ;;  %v4907_v44 = vld [vmem:[%s6011_s5 + $0x28] sm:$0xff]  ;;  %v4912_v31 = vld [vmem:[%s6011_s5 + $0x30] sm:$0xff] }
 0x211   : > { %v3890_v9 = vpop.eup %3889  ;;  %v3484_v16 = vpack.c.bf16 %v1042_v46, %v1041_v48  ;;  %v1035_v6 = vmul.f32 0.01, %v987_v53  ;;  %v1008_v4 = vmul.f32 0.6931472, %v3888_v19  ;;  %6182 = vst [vmem:[#allocation56_spill] sm:$0xff] %v4907_v44  ;;  %6183 = vst [vmem:[#allocation57_spill] sm:$0xff] %v4912_v31  ;;  %v4946_v53 = vpop.permute.xlu0 %1050 }
 0x212   : > { %v1044_v21 = vsel %vm940_vm6, %v4754_v54, %v1036_v32  ;;  %v999_v1 = vmul.f32 0.6931472, %v3890_v9  ;;  %v6056_v48 = vmov 0.0|0.0   ;;  %v6054_v3 = vmov 0.0   ;;  %v4943_v46 = vld [vmem:[%s6012_s6 + $0x10] sm:$0xff]  ;;  %6185 = vst [vmem:[#allocation59_spill] sm:$0xff] %v4946_v53  ;;  %v4948_v32 = vpop.permute.xlu1 %1054 }
 0x213   : > { %3485 = vmatprep.subr.bf16.mxu1 %v3484_v16  ;;  %v1043_v62 = vsel %vm939_vm7, %v4760_v51, %v1035_v6  ;;  %v1014_v11 = vsel %vm4846_vm10, %v1011_v28, %v1008_v4  ;;  %v1029_v51 = vmul.f32 %v4807_v36, %v1028_v22  ;;  %3500 = vmatprep.subr.bf16.mxu0 %v6056_v48  ;;  %v4931_v28 = vld [vmem:[%s6012_s6] sm:$0xff]  ;;  %v4279_v19 = vmov 64  }
 0x214   : > { %v3892_v40 = vpop.eup %3891  ;;  %3487 = vmatpush3.bf16.msra.mxu1 %v3484_v16  ;;  %v3488_v54 = vpack.c.bf16 %v1044_v21, %v1043_v62  ;;  %v1005_v61 = vsel %vm1004_vm11, %v1002_v12, %v999_v1  ;;  %v1038_v55 = vmul.f32 0.01, %v1014_v11  ;;  %3360 = vmatprep.mubr.msk.f32.mxu0 %vm4277_vm3, %v6054_v3  ;;  %6186 = vst [vmem:[#allocation60_spill] sm:$0xff] %v4948_v32 }
 0x215   : > { %v3894_v33 = vpop.eup %3893  ;;  %v1037_v8 = vmul.f32 0.01, %v1005_v61  ;;  %v1026_v0 = vmul.f32 0.6931472, %v3892_v40  ;;  %3829 = vset.pattern.permute.xlu1 %v4279_v19  ;;  %3830 = vset.pattern.permute.xlu0 %v4279_v19  ;;  %v4950_v12 = vpop.permute.xlu0 %1062 }
 0x216   : > { %3489 = vmatprep.subr.bf16.mxu1 %v3488_v54  ;;  %v1046_v20 = vsel %vm942_vm12, %v4772_v2, %v1038_v55  ;;  %v1017_v52 = vmul.f32 0.6931472, %v3894_v33  ;;  %1340 = vperm.xlu1 %3829, %v4931_v28   ;;  %6187 = vst [vmem:[#allocation61_spill] sm:$0xff] %v4950_v12  ;;  %v4958_v22 = vpop.permute.xlu1 %1058 }
 0x217   : > { %v1045_v47 = vsel %vm941_vm13, %v4776_v43, %v1037_v8  ;;  %v1032_v39 = vsel %vm1031_vm14, %v1029_v51, %v1026_v0  ;;  %v4879_v43 = vld [vmem:[%s6011_s5 + $0x8] sm:$0xff]  ;;  %1345 = vperm.xlu0 %3830, %v4936_v41   ;;  %6188 = vst [vmem:[#allocation62_spill] sm:$0xff] %v4958_v22 }
 0x218   : > { %3491 = vmatpush3.bf16.msra.mxu1 %v3488_v54  ;;  %v3492_v26 = vpack.c.bf16 %v1046_v20, %v1045_v47  ;;  %v1023_v24 = vsel %vm1022_vm15, %v1020_v27, %v1017_v52  ;;  %v1040_v7 = vmul.f32 0.01, %v1032_v39  ;;  %6178 = vst [vmem:[#allocation52_spill] sm:$0xff] %v4879_v43 }
 0x219   : > { %v1039_v34 = vmul.f32 0.01, %v1023_v24  ;;  %v4970_v42 = vpop.permute.xlu0 %1070 }
 0x21a   : > { %3493 = vmatprep.subr.bf16.mxu1 %v3492_v26  ;;  %v1048_v36 = vsel %vm944_vm1, %v4790_v14, %v1040_v7  ;;  %v4893_v14 = vld [vmem:[%s6011_s5 + $0x18] sm:$0xff]  ;;  %1350 = vperm.xlu1 %3829, %v4943_v46   ;;  %6189 = vst [vmem:[#allocation63_spill] sm:$0xff] %v4970_v42  ;;  %v4982_v51 = vpop.permute.xlu1 %1066 }
 0x21b   : > { %v1047_v2 = vsel %vm943_vm2, %v4794_v63, %v1039_v34  ;;  %6180 = vst [vmem:[#allocation54_spill] sm:$0xff] %v4893_v14  ;;  %v4898_v63 = vld [vmem:[%s6011_s5 + $0x20] sm:$0xff]  ;;  %6190 = vst [vmem:[#allocation64_spill] sm:$0xff] %v4982_v51 }
 0x21c   : > { %3495 = vmatpush3.bf16.msra.mxu1 %v3492_v26  ;;  %v3496_v10 = vpack.c.bf16 %v1048_v36, %v1047_v2  ;;  %6181 = vst [vmem:[#allocation55_spill] sm:$0xff] %v4898_v63 }
 0x21d   : > { %v4995_v7 = vpop.permute.xlu0 %1078 }
 0x21e   : > { %3497 = vmatprep.subr.bf16.mxu1 %v3496_v10  ;;  %6191 = vst [vmem:[#allocation65_spill] sm:$0xff] %v4995_v7 }
 0x220   : > { %3499 = vmatpush3.bf16.msra.mxu1 %v3496_v10 }
 0x223   : > { %3333 = vmatmul.mubr.msk.f32.vlgmr.msra.gmra.mrb[0].mxu1 %vm791_vm0, %v4879_v43 }
 0x224   : > { %3335 = vmatprep.mubr.msk.f32.mxu1 %vm791_vm0, %v4884_v37 }
 0x227   : > { %3336 = vmatmul.mubr.msk.f32.gmra.mrb[2].mxu1 %vm791_vm0, %v4893_v14 }
 0x228   : > { %3338 = vmatprep.mubr.msk.f32.mxu1 %vm791_vm0, %v4898_v63 }
 0x22b   : > { %3339 = vmatmul.mubr.msk.f32.gmra.mrb[4].mxu1 %vm791_vm0, %v4907_v44 }
 0x22c   : > { %3341 = vmatprep.mubr.msk.f32.mxu1 %vm791_vm0, %v4912_v31 }
 0x22f   : > { %3342 = vmatmul.mubr.msk.f32.gmra.mrb[6].mxu1 %vm791_vm0, %v4921_v49 }
 0x2f6   : > { %v3334_v9 = vpop.f32.mrb[0].mxu1 }
 0x2f7   : > { %v4953_v16 = vadd.f32 %v3334_v9, %v4948_v32  ;;  %v1171_v6 = vpop.f32.mrb[1].mxu1 }
 0x2f8   : > { %v4956_v4 = vadd.f32 %v1171_v6, %v4946_v53 }
 0x2f9   : > { %v4961_v21 = vmul.f32 100.0, %v4953_v16 }
 0x2fa   : > { %v4964_v1 = vmul.f32 100.0, %v4956_v4  ;;  %v3337_v50 = vpop.f32.mrb[2].mxu1 }
 0x2fb   : > { %v1219_v13 = vmin.f32 %v4961_v21, 20.0  ;;  %v4968_v62 = vadd.f32 %v3337_v50, %v4950_v12  ;;  %v1181_v11 = vpop.f32.mrb[3].mxu1  ;;  %vm1227_vm4 = vcmp.gt.f32.partialorder %v4961_v21, 20.0 }
 0x2fc   : > { %v1218_v40 = vmin.f32 %v4964_v1, 20.0  ;;  %v4974_v54 = vadd.f32 %v1181_v11, %v4958_v22  ;;  %v5008_v11 = vpop.permute.xlu1 %1074  ;;  %vm1226_vm6 = vcmp.gt.f32.partialorder %v4964_v1, 20.0 }
 0x2fd   : > { %v1236_v61 = vmul.f32 1.442695, %v1219_v13  ;;  %v4977_v55 = vmul.f32 100.0, %v4968_v62  ;;  %6192 = vst [vmem:[#allocation66_spill] sm:$0xff] %v5008_v11 }
 0x2fe   : > { %v1234_v33 = vmul.f32 1.442695, %v1218_v40  ;;  %v4980_v8 = vmul.f32 100.0, %v4974_v54  ;;  %v3340_v0 = vpop.f32.mrb[4].mxu1 }
 0x2ff   : > { %3895 = vpow2.f32 %v1236_v61  ;;  %v1221_v20 = vmin.f32 %v4977_v55, 20.0  ;;  %v4986_v52 = vadd.f32 %v3340_v0, %v4970_v42  ;;  %v1191_v27 = vpop.f32.mrb[5].mxu1  ;;  %vm1229_vm10 = vcmp.gt.f32.partialorder %v4977_v55, 20.0 }
 0x300   : > { %3897 = vpow2.f32 %v1234_v33  ;;  %v1220_v47 = vmin.f32 %v4980_v8, 20.0  ;;  %v4990_v39 = vadd.f32 %v1191_v27, %v4982_v51  ;;  %vm1228_vm11 = vcmp.gt.f32.partialorder %v4980_v8, 20.0 }
 0x301   : > { %v1240_v26 = vmul.f32 1.442695, %v1221_v20  ;;  %v4993_v24 = vmul.f32 100.0, %v4986_v52 }
 0x302   : > { %v1238_v34 = vmul.f32 1.442695, %v1220_v47  ;;  %v4998_v36 = vmul.f32 100.0, %v4990_v39  ;;  %v3343_v2 = vpop.f32.mrb[6].mxu1 }
 0x303   : > { %3899 = vpow2.f32 %v1240_v26  ;;  %v1223_v10 = vmin.f32 %v4993_v24, 20.0  ;;  %v5002_v19 = vadd.f32 %v3343_v2, %v4995_v7  ;;  %v1201_v9 = vpop.f32.mrb[7].mxu1  ;;  %vm1231_vm14 = vcmp.gt.f32.partialorder %v4993_v24, 20.0 }
 0x304   : > { %3901 = vpow2.f32 %v1238_v34  ;;  %v1222_v6 = vmin.f32 %v4998_v36, 20.0  ;;  %v5012_v33 = vadd.f32 %v1201_v9, %v5008_v11  ;;  %vm1230_vm15 = vcmp.gt.f32.partialorder %v4998_v36, 20.0 }
 0x305   : > { %v1244_v50 = vmul.f32 1.442695, %v1223_v10  ;;  %v5006_v13 = vmul.f32 100.0, %v5002_v19 }
 0x306   : > { %v1242_v40 = vmul.f32 1.442695, %v1222_v6  ;;  %v5015_v34 = vmul.f32 100.0, %v5012_v33 }
 0x307   : > { %3903 = vpow2.f32 %v1244_v50  ;;  %v1225_v61 = vmin.f32 %v5006_v13, 20.0 }
 0x308   : > { %3905 = vpow2.f32 %v1242_v40  ;;  %v1224_v9 = vmin.f32 %v5015_v34, 20.0 }
 0x309   : > { %v3896_v0 = vpop.eup %3895  ;;  %v1248_v20 = vmul.f32 1.442695, %v1225_v61 }
 0x30a   : > { %v3898_v27 = vpop.eup %3897  ;;  %v1259_v47 = vadd.f32 1.0, %v3896_v0  ;;  %v1262_v6 = vmul.f32 -0.5, %v3896_v0  ;;  %v1265_v11 = vand.u32 2147483647, %v3896_v0  ;;  %v1246_v51 = vmul.f32 1.442695, %v1224_v9 }
 0x30b   : > { %v1250_v26 = vadd.f32 1.0, %v3898_v27  ;;  %3907 = vpow2.f32 %v1248_v20  ;;  %v1253_v48 = vmul.f32 -0.5, %v3898_v27 }
 0x30c   : > { %3909 = vlog2.f32 %v1259_v47  ;;  %v1263_v20 = vadd.f32 1.0, %v1262_v6  ;;  %vm5027_vm5 = vcmp.lt.f32.partialorder %v1265_v11, 0.0004427343 }
 0x30d   : > { %v3900_v2 = vpop.eup %3899  ;;  %3911 = vlog2.f32 %v1250_v26  ;;  %v1254_v42 = vadd.f32 1.0, %v1253_v48 }
 0x30e   : > { %v3902_v10 = vpop.eup %3901  ;;  %v1277_v50 = vadd.f32 1.0, %v3900_v2  ;;  %v1280_v47 = vmul.f32 -0.5, %v3900_v2  ;;  %v1283_v53 = vand.u32 2147483647, %v3900_v2  ;;  %v1264_v32 = vmul.f32 %v3896_v0, %v1263_v20 }
 0x30f   : > { %v1268_v3 = vadd.f32 1.0, %v3902_v10  ;;  %v1271_v22 = vmul.f32 -0.5, %v3902_v10  ;;  %v1255_v63 = vmul.f32 %v3898_v27, %v1254_v42  ;;  %v1274_v20 = vand.u32 2147483647, %v3902_v10 }
 0x310   : > { %3913 = vlog2.f32 %v1277_v50  ;;  %v1256_v50 = vand.u32 2147483647, %v3898_v27  ;;  %vm5037_vm8 = vcmp.lt.f32.partialorder %v1283_v53, 0.0004427343 }
 0x311   : > { %v5018_v40 = vpop.eup %3903  ;;  %3915 = vlog2.f32 %v1268_v3  ;;  %v1272_v14 = vadd.f32 1.0, %v1271_v22  ;;  %vm1275_vm9 = vcmp.lt.f32.partialorder %v1274_v20, 0.0004427343  ;;  %v6197_v20 = vmov 0.0|0.0  }
 0x312   : > { %v5020_v61 = vpop.eup %3905  ;;  %v1295_v7 = vadd.f32 1.0, %v5018_v40  ;;  %v1298_v31 = vmul.f32 -0.5, %v5018_v40  ;;  %vm1257_vm7 = vcmp.lt.f32.partialorder %v1256_v50, 0.0004427343  ;;  %v1301_v43 = vand.u32 2147483647, %v5018_v40 }
 0x313   : > { %v1286_v26 = vadd.f32 1.0, %v5020_v61 }
 0x314   : > { %3917 = vlog2.f32 %v1295_v7  ;;  %v1281_v7 = vadd.f32 1.0, %v1280_v47  ;;  %vm1302_vm12 = vcmp.lt.f32.partialorder %v1301_v43, 0.0004427343 }
 0x315   : > { %v5024_v12 = vpop.eup %3907  ;;  %3919 = vlog2.f32 %v1286_v26  ;;  %v1289_v26 = vmul.f32 -0.5, %v5020_v61 }
 0x316   : > { %v3910_v3 = vpop.eup %3909  ;;  %v1313_v9 = vadd.f32 1.0, %v5024_v12  ;;  %3921 = vpow2.f32 %v1246_v51  ;;  %v1282_v27 = vmul.f32 %v3900_v2, %v1281_v7  ;;  %v1316_v0 = vmul.f32 -0.5, %v5024_v12 }
 0x317   : > { %v3912_v48 = vpop.eup %3911  ;;  %v1261_v49 = vmul.f32 0.6931472, %v3910_v3  ;;  %v1290_v50 = vadd.f32 1.0, %v1289_v26 }
 0x318   : > { %v1252_v44 = vmul.f32 0.6931472, %v3912_v48  ;;  %3923 = vlog2.f32 %v1313_v9  ;;  %v1299_v48 = vadd.f32 1.0, %v1298_v31 }
 0x319   : > { %v1267_v11 = vsel %vm5027_vm5, %v1264_v32, %v1261_v49  ;;  %v1273_v32 = vmul.f32 %v3902_v10, %v1272_v14  ;;  %v1291_v7 = vmul.f32 %v5020_v61, %v1290_v50  ;;  %vm1232_vm5 = vcmp.gt.f32.partialorder %v5015_v34, 20.0 }
 0x31a   : > { %v3914_v37 = vpop.eup %3913  ;;  %v1323_v3 = vmul.f32 0.01, %v1267_v11  ;;  %v1258_v47 = vsel %vm1257_vm7, %v1255_v63, %v1252_v44  ;;  %v1292_v44 = vand.u32 2147483647, %v5020_v61  ;;  %v1300_v1 = vmul.f32 %v5018_v40, %v1299_v48 }
 0x31b   : > { %v3916_v51 = vpop.eup %3915  ;;  %v1322_v42 = vmul.f32 0.01, %v1258_v47  ;;  %v1279_v22 = vmul.f32 0.6931472, %v3914_v37 }
 0x31c   : > { %v1331_v49 = vsel %vm1227_vm4, %v4953_v16, %v1323_v3  ;;  %v1270_v53 = vmul.f32 0.6931472, %v3916_v51  ;;  %vm1293_vm13 = vcmp.lt.f32.partialorder %v1292_v44, 0.0004427343  ;;  %v1317_v51 = vadd.f32 1.0, %v1316_v0 }
 0x31d   : > { %v1330_v6 = vsel %vm1226_vm6, %v4956_v4, %v1322_v42  ;;  %v1285_v63 = vsel %vm5037_vm8, %v1282_v27, %v1279_v22  ;;  %v1319_v22 = vand.u32 2147483647, %v5024_v12  ;;  %vm1233_vm4 = vcmp.gt.f32.partialorder %v5006_v13, 20.0 }
 0x31e   : > { %v3918_v37 = vpop.eup %3917  ;;  %v3501_v2 = vpack.c.bf16 %v1331_v49, %v1330_v6  ;;  %v1325_v31 = vmul.f32 0.01, %v1285_v63  ;;  %v1276_v21 = vsel %vm1275_vm9, %v1273_v32, %v1270_v53  ;;  %v1318_v24 = vmul.f32 %v5024_v12, %v1317_v51 }
 0x31f   : > { %v3920_v16 = vpop.eup %3919  ;;  %v1324_v14 = vmul.f32 0.01, %v1276_v21  ;;  %v1297_v10 = vmul.f32 0.6931472, %v3918_v37  ;;  %vm1320_vm1 = vcmp.lt.f32.partialorder %v1319_v22, 0.0004427343  ;;  %v6199_v13 = vlaneseq }
 0x320   : > { %v1333_v4 = vsel %vm1229_vm10, %v4968_v62, %v1325_v31  ;;  %v1288_v9 = vmul.f32 0.6931472, %v3920_v16  ;;  %3502 = vmatpush3.bf16.msra.mxu0 %v3501_v2  ;;  %v3922_v26 = vpop.eup %3921  ;;  %v6198_v2 = vmov 0.0   ;;  %vm1471_vm6 = vcmask 195584   ;;  %v5102_v31 = vpop.permute.xlu1 %1340 }
 0x321   : > { %v1332_v11 = vsel %vm1228_vm11, %v4974_v54, %v1324_v14  ;;  %v1303_v55 = vsel %vm1302_vm12, %v1300_v1, %v1297_v10  ;;  %3503 = vmatprep.subr.bf16.mxu0 %v6197_v20  ;;  %v1304_v40 = vadd.f32 1.0, %v3922_v26  ;;  %v1307_v48 = vmul.f32 -0.5, %v3922_v26  ;;  %v5104_v14 = vpop.permute.xlu0 %1345 }
 0x322   : > { %v3504_v8 = vpack.c.bf16 %v1333_v4, %v1332_v11  ;;  %v1327_v3 = vmul.f32 0.01, %v1303_v55  ;;  %v1294_v47 = vsel %vm1293_vm13, %v1291_v7, %v1288_v9  ;;  %v3924_v62 = vpop.eup %3923  ;;  %v1310_v49 = vand.u32 2147483647, %v3922_v26 }
 0x323   : > { %v1326_v43 = vmul.f32 0.01, %v1294_v47  ;;  %3925 = vlog2.f32 %v1304_v40  ;;  %v1315_v27 = vmul.f32 0.6931472, %v3924_v62  ;;  %v1308_v36 = vadd.f32 1.0, %v1307_v48 }
 0x324   : > { %v1335_v61 = vsel %vm1231_vm14, %v4986_v52, %v1327_v3  ;;  %3505 = vmatpush3.bf16.msra.mxu0 %v3504_v8  ;;  %vm1311_vm2 = vcmp.lt.f32.partialorder %v1310_v49, 0.0004427343  ;;  %v5108_v11 = vpop.permute.xlu1 %1350 }
 0x325   : > { %v1334_v54 = vsel %vm1230_vm15, %v4990_v39, %v1326_v43  ;;  %3506 = vmatprep.subr.bf16.mxu0 %v6197_v20  ;;  %v1321_v52 = vsel %vm1320_vm1, %v1318_v24, %v1315_v27  ;;  %v1309_v50 = vmul.f32 %v3922_v26, %v1308_v36 }
 0x326   : > { %v3507_v42 = vpack.c.bf16 %v1335_v61, %v1334_v54  ;;  %v1329_v32 = vmul.f32 0.01, %v1321_v52 }
 0x328   : > { %3508 = vmatpush3.bf16.msra.mxu0 %v3507_v42  ;;  %v1337_v63 = vsel %vm1233_vm4, %v5002_v19, %v1329_v32  ;;  %v5088_v19 = vld [vmem:[%s5085_s18] sm:$0xff] }
 0x329   : > { %3509 = vmatprep.subr.bf16.mxu0 %v6197_v20  ;;  %3375 = vmatprep.mubr.msk.f32.mxu1 %vm1471_vm6, %v5088_v19 }
 0x32d   : > { %v3926_v53 = vpop.eup %3925 }
 0x32e   : > { %v1306_v39 = vmul.f32 0.6931472, %v3926_v53 }
 0x330   : > { %v1312_v6 = vsel %vm1311_vm2, %v1309_v50, %v1306_v39 }
 0x331   : > { %v1328_v44 = vmul.f32 0.01, %v1312_v6 }
 0x333   : > { %v1336_v12 = vsel %vm1232_vm5, %v5012_v33, %v1328_v44  ;;  %v5093_v33 = vand.u32 127, %v6199_v13 }
 0x334   : > { %v3510_v37 = vpack.c.bf16 %v1337_v63, %v1336_v12 }
 0x336   : > { %3511 = vmatpush3.bf16.msra.mxu0 %v3510_v37 }
 0x339   : > { %3361 = vmatmul.mubr.msk.f32.vlgmr.msra.gmra.mrb[8].mxu0 %vm791_vm0, %v4931_v28 }
 0x33a   : > { %3363 = vmatprep.mubr.msk.f32.mxu0 %vm4277_vm3, %v6198_v2 }
 0x33d   : > { %3364 = vmatmul.mubr.msk.f32.gmra.mrb[10].mxu0 %vm791_vm0, %v4936_v41 }
 0x33e   : > { %3366 = vmatprep.mubr.msk.f32.mxu0 %vm4277_vm3, %v6198_v2  ;;  %vm433_vm3 = vcmp.lt.s32.totalorder %v5093_v33, 72 }
 0x33f   : > { %v5099_v34 = vsel %vm433_vm3, 1.0, %v6198_v2  }
 0x340   : > { %1702 = vmax.xlane.f32.xlu1 %v5099_v34 }
 0x341   : > { %3367 = vmatmul.mubr.msk.f32.gmra.mrb[12].mxu0 %vm791_vm0, %v4943_v46 }
 0x40c   : > { %v1425_v21 = vpop.f32.mrb[8].mxu0 }
 0x40d   : > { %v3362_v16 = vpop.f32.mrb[9].mxu0  ;;  %v1426_v10 = vadd.f32 %v1425_v21, %v5102_v31 }
 0x40f   : > { %v1439_v7 = vmul.f32 20.0, %v1426_v10 }
 0x410   : > { %v1430_v1 = vpop.f32.mrb[10].mxu0 }
 0x411   : > { %v1431_v4 = vadd.f32 %v1430_v1, %v5104_v14  ;;  %v3365_v9 = vpop.f32.mrb[11].mxu0  ;;  %v5112_v1 = vld [vmem:[%s5085_s18 + $0x8] sm:$0xf] }
 0x412   : > { %v3937_v9 = vld [vmem:[%s4374_s19] sm:$0x7] }
 0x413   : > { %v1440_v26 = vmul.f32 20.0, %v1431_v4  ;;  %v1703_v4 = vpop.xlane.xlu1 %1702 }
 0x414   : > { %v1435_v55 = vpop.f32.mrb[12].mxu0  ;;  %3564 = vpush %v1703_v4 }
 0x415   : > { %v1442_v0 = vmax.f32 %v1439_v7, %v1440_v26  ;;  %v1436_v20 = vadd.f32 %v1435_v55, %v5108_v11  ;;  %v3368_v8 = vpop.f32.mrb[13].mxu0 }
 0x417   : > { %v1441_v3 = vmul.f32 20.0, %v1436_v20 }
 0x419   : > { %v1443_v47 = vmax.f32 %v1442_v0, %v1441_v3 }
 0x41b   : > { %v1444_v40 = vrot.slane %v1443_v47, 4 }
 0x41d   : > { %v1445_v43 = vmax.f32 %v1443_v47, %v1444_v40 }
 0x41f   : > { %v1446_v62 = vrot.slane %v1445_v43, 2 }
 0x421   : > { %v1447_v61 = vmax.f32 %v1445_v43, %v1446_v62 }
 0x423   : > { %v1448_v54 = vrot.slane %v1447_v61, 1 }
 0x425   : > { %v1449_v51 = vmax.f32 %v1447_v61, %v1448_v54 }
 0x427   : > { %v1450_v42 = vsub.f32 %v1439_v7, %v1449_v51  ;;  %v1451_v22 = vsub.f32 %v1440_v26, %v1449_v51  ;;  %v1452_v27 = vsub.f32 %v1441_v3, %v1449_v51  ;;  %v1566_v7 = vrot.slane %v3937_v9, 4 }
 0x429   : > { %v1453_v48 = vmul.f32 1.442695, %v1450_v42  ;;  %v1455_v24 = vmul.f32 1.442695, %v1451_v22  ;;  %v1457_v52 = vmul.f32 1.442695, %v1452_v27 }
 0x42b   : > { %3927 = vpow2.f32 %v1453_v48 }
 0x42c   : > { %3929 = vpow2.f32 %v1455_v24 }
 0x42d   : > { %3931 = vpow2.f32 %v1457_v52 }
 0x435   : > { %v3928_v36 = vpop.eup %3927 }
 0x436   : > { %v3930_v49 = vpop.eup %3929 }
 0x437   : > { %v1459_v53 = vadd.f32 %v3930_v49, %v3928_v36  ;;  %v3932_v32 = vpop.eup %3931 }
 0x439   : > { %v1460_v39 = vadd.f32 %v3932_v32, %v1459_v53 }
 0x43b   : > { %v1461_v50 = vrot.slane %v1460_v39, 4 }
 0x43d   : > { %v1462_v6 = vadd.f32 %v1461_v50, %v1460_v39 }
 0x43f   : > { %v1463_v63 = vrot.slane %v1462_v6, 2 }
 0x441   : > { %v1464_v44 = vadd.f32 %v1463_v63, %v1462_v6 }
 0x443   : > { %v1465_v12 = vrot.slane %v1464_v44, 1 }
 0x445   : > { %v1466_v37 = vadd.f32 %v1465_v12, %v1464_v44  ;;  %s5116_s20 = spop %3564 }
 0x446   : > { %p3042_p5 = scmp.gt.f32.partialorder %s5116_s20, 0.5 }
 0x447   : > { %3933 = vrcp.f32 %v1466_v37  ;;  %s5230_s19 = smov (%p3042_p5), 0  }
 0x451   : > { %v3934_v2 = vpop.eup %3933 }
 0x452   : > { %v1468_v13 = vmul.f32 %v3934_v2, %v3928_v36  ;;  %v1469_v21 = vmul.f32 %v3934_v2, %v3930_v49  ;;  %v1470_v16 = vmul.f32 %v3934_v2, %v3932_v32  ;;  %v5130_v49 = vld [vmem:[%s378_s24] sm:$0x7] }
 0x453   : > { %6200 = vst [vmem:[#allocation67_spill] sm:$0xff] %v5130_v49 }
 0x454   : > { %v3512_v10 = vpack.c.bf16 %v1469_v21, %v1468_v13 }
 0x456   : > { %3513 = vmatprep.subr.bf16.mxu1 %v3512_v10 }
 0x457   : > { %3515 = vmatpush3.bf16.msra.mxu1 %v3512_v10 }
 0x458   : > { %3373 = vmatprep.subr.mxu1 %v1470_v16 }
 0x45b   : > { %3374 = vmatpush3.msra.mxu1 %v1470_v16  ;;  %v6073_v16 = vrot.slane %v5130_v49, 5 }
 0x45c   : > { %3376 = vmatmul.mubr.msk.f32.vlgmr.msra.gmra.mrb[8].mxu1 %vm1471_vm6, %v5112_v1 }
 0x52f   : > { %v3377_v26 = vpop.f32.mrb[8].mxu1 }
 0x530   : > { %v1577_v55 = vmul.f32 %v3937_v9, %v3377_v26  ;;  %v1586_v0 = vrot.slane %v3377_v26, 3  ;;  %v1597_v20 = vrot.slane %v3377_v26, 5  ;;  %v1609_v8 = vrot.slane %v3377_v26, 6  ;;  %v5119_v3 = vpop.f32.mrb[9].mxu1 }
 0x531   : > { %v1612_v47 = vrot.slane %v3377_v26, 2  ;;  %v1641_v40 = vrot.slane %v3377_v26, 7  ;;  %v1553_v43 = vmul.f32 %v3937_v9, %v5119_v3  ;;  %v1644_v61 = vrot.slane %v3377_v26, 1 }
 0x532   : > { %v1579_v62 = vrot.slane %v1577_v55, 1  ;;  %v1568_v54 = vmul.f32 %v1566_v7, %v5119_v3  ;;  %v1582_v51 = vrot.slane %v1577_v55, 2  ;;  %v1599_v22 = vmul.f32 %v1597_v20, %v5119_v3 }
 0x533   : > { %v1555_v42 = vrot.slane %v1553_v43, 1  ;;  %v1600_v27 = vmul.f32 %v1586_v0, %v5119_v3  ;;  %v1558_v24 = vrot.slane %v1553_v43, 2  ;;  %v1611_v36 = vmul.f32 %v1609_v8, %v5119_v3 }
 0x534   : > { %v1581_v48 = vadd.f32 %v1579_v62, %v1577_v55  ;;  %v1570_v52 = vrot.slane %v1568_v54, 1  ;;  %v1614_v39 = vmul.f32 %v1612_v47, %v5119_v3  ;;  %v1643_v50 = vmul.f32 %v1641_v40, %v5119_v3 }
 0x535   : > { %v1557_v53 = vadd.f32 %v1555_v42, %v1553_v43  ;;  %v1602_v32 = vrot.slane %v1600_v27, 1  ;;  %v1573_v44 = vrot.slane %v1568_v54, 2  ;;  %v1646_v12 = vmul.f32 %v1644_v61, %v5119_v3 }
 0x536   : > { %v1584_v6 = vadd.f32 %v1582_v51, %v1581_v48  ;;  %v1572_v63 = vadd.f32 %v1570_v52, %v1568_v54  ;;  %v1562_v2 = vrot.slane %v5119_v3, 3  ;;  %v1616_v21 = vrot.slane %v1614_v39, 2 }
 0x537   : > { %v1560_v37 = vadd.f32 %v1558_v24, %v1557_v53  ;;  %v1604_v13 = vsub.f32 %v1599_v22, %v1602_v32  ;;  %v1648_v4 = vrot.slane %v1646_v12, 7  ;;  %v6074_v8 = vrot.slane %v5130_v49, 2 }
 0x538   : > { %v1575_v10 = vadd.f32 %v1573_v44, %v1572_v63  ;;  %v1618_v26 = vsub.f32 %v1611_v36, %v1616_v21  ;;  %v1588_v20 = vadd.f32 %v1586_v0, %v1584_v6  ;;  %v1666_v42 = vrot.slane %v1611_v36, 6 }
 0x539   : > { %v1564_v9 = vadd.f32 %v1562_v2, %v1560_v37  ;;  %v1606_v7 = vrot.slane %v1604_v13, 5  ;;  %v1627_v55 = vrot.slane %v1604_v13, 2  ;;  %v1650_v40 = vsub.f32 %v1643_v50, %v1648_v4 }
 0x53a   : > { %v1576_v47 = vadd.f32 %v1575_v10, %v1562_v2  ;;  %v1620_v62 = vrot.slane %v1618_v26, 3  ;;  %v1672_v0 = vrot.slane %v1611_v36, 2  ;;  %v1596_v27 = vsub.f32 %v1588_v20, %v6074_v8  }
 0x53b   : > { %v1608_v43 = vmul.f32 %v1606_v7, %v5119_v3  ;;  %v1629_v61 = vmul.f32 %v1627_v55, %v5119_v3  ;;  %v5141_v54 = vsub.f32 %v1564_v9, %v5130_v49   ;;  %v1668_v48 = vsub.f32 %v1614_v39, %v1666_v42 }
 0x53c   : > { %v5145_v51 = vsub.f32 %v1576_v47, %v6073_v16   ;;  %v1622_v22 = vmul.f32 %v1620_v62, %v5119_v3  ;;  %v1674_v53 = vsub.f32 %v1614_v39, %v1672_v0  ;;  %v1698_v44 = vmul.f32 %v1596_v27, %v1596_v27 }
 0x53d   : > { %v1692_v32 = vmul.f32 %v5141_v54, %v5141_v54  ;;  %v1631_v63 = vrot.slane %v1629_v61, 2  ;;  %v1679_v10 = vrot.slane %v5119_v3, 6  ;;  %v1657_v39 = vmul.f32 %v1562_v2, %v5119_v3 }
 0x53e   : > { %v1693_v24 = vmul.f32 %v5145_v51, %v5145_v51  ;;  %v1624_v52 = vrot.slane %v1622_v22, 1  ;;  %v1654_v9 = vrot.slane %v5119_v3, 5  ;;  %v1676_v55 = vrot.slane %v5119_v3, 2 }
 0x53f   : > { %v1681_v7 = vmul.f32 %v1679_v10, %v5119_v3  ;;  %v1659_v26 = vrot.slane %v1657_v39, 1  ;;  %v6204_v10 = vmov %v4382_v5  ;;  %v6208_v39 = vmov (%p3042_p5), %v4382_v5 }
 0x540   : > { %v1695_v50 = vrot.slane %v1693_v24, 4  ;;  %v1626_v6 = vsub.f32 %v1608_v43, %v1624_v52  ;;  %v1656_v20 = vmul.f32 %v1654_v9, %v5119_v3  ;;  %v1678_v61 = vmul.f32 %v1676_v55, %v5119_v3 }
 0x541   : > { %v1683_v47 = vrot.slane %v1681_v7, 6  ;;  %v6202_v3 = vrot.slane %v4382_v5, 2   ;;  %v6209_v9 = vmov (%p3042_p5), %v4382_v5 }
 0x542   : > { %v1697_v12 = vadd.f32 %v1695_v50, %v1692_v32  ;;  %v1633_v37 = vadd.f32 %v1631_v63, %v1626_v6  ;;  %v1661_v62 = vsub.f32 %v1656_v20, %v1659_v26 }
 0x543   : > { %v1685_v2 = vsub.f32 %v1678_v61, %v1683_v47 }
 0x544   : > { %v1699_v21 = vadd.f32 %v1698_v44, %v1697_v12  ;;  %v1634_v36 = vsel %vm433_vm3, %v1633_v37, 1.0 }
 0x545   : > { %3935 = vrcp.f32 %v1634_v36 }
 0x546   : > { %v1700_v4 = vsel %vm433_vm3, %v1699_v21, 0.0  }
 0x547   : > { %v6201_v36 = vmov %v1700_v4 }
 0x54d   : > { %3044 = sbr.rel (!%p3042_p5) target bundleno = 2755 (0xac3), region = 97 }
 0x54f   : > { %v3936_v43 = vpop.eup %3935 }
 0x550   : > { %v1638_v42 = vrot.slane %v3936_v43, 3  ;;  %v1651_v22 = vrot.slane %v3936_v43, 6  ;;  %v1662_v33 = vrot.slane %v3936_v43, 7  ;;  %v1669_v0 = vrot.slane %v3936_v43, 2 }
 0x551   : > { %v1675_v24 = vmul.f32 %v3936_v43, %v1674_v53   ;;  %v1687_v52 = vrot.slane %v3936_v43, 4  ;;  %v1691_v32 = vmul.f32 %v3936_v43, %v1661_v62   ;;  %v6203_v53 = vrot.slane %v4382_v5, 1  }
 0x552   : > { %v1640_v50 = vmul.f32 %v1638_v42, %v1604_v13   ;;  %v1653_v6 = vmul.f32 %v1651_v22, %v1650_v40   ;;  %v1664_v63 = vmul.f32 %v1662_v33, %v1661_v62   ;;  %v1671_v44 = vmul.f32 %v1669_v0, %v1668_v48  }
 0x553   : > { %v1686_v12 = vmul.f32 %v1685_v2, %v1651_v22   ;;  %v1689_v37 = vmul.f32 %v1687_v52, %v1604_v13   ;;  %v1690_v21 = vmul.f32 %v1662_v33, %v1650_v40   ;;  %v6205_v13 = vrot.slane (%p3042_p5), %v4382_v5, 2  }
 0x554   : > { %v6206_v40 = vrot.slane %v4382_v5, 1   ;;  %v6207_v48 = vmov %v4382_v5 }
 0x555 LB: >> { %v6210_v23 = vld [vmem:[#allocation9_spill] sm:$0xff]  ;;  %6211 = vst [vmem:[#allocation68_spill] sm:$0xff] %v4172_v34  ;;  %6212 = vst [vmem:[#allocation69_spill] sm:$0xff] %v4176_v4  ;;  %v6225_v17 = vld [vmem:[#allocation4_spill] sm:$0xff]  ;;  %v1740_v7 = vrot.slane %v4236_v54, 3  ;;  %v1744_v26 = vrot.slane %v4232_v51, 2  ;;  %v4172_v34 = vphi %v5099_v34, %v2745_v34   ;;  %s4252_s19 = sphi %s5230_s19, %s6351_s19   ;;  %v4248_v5 = vphi %v4382_v5, %v5321_v5   ;;  %v4244_v9 = vphi %v6209_v9, %v5332_v9   ;;  %v4240_v39 = vphi %v6208_v39, %v5334_v39   ;;  %v4236_v54 = vphi %v5141_v54, %v5854_v54   ;;  %v4232_v51 = vphi %v5145_v51, %v5859_v51   ;;  %v4228_v27 = vphi %v1596_v27, %v6350_v27   ;;  %v4224_v50 = vphi %v1640_v50, %v2858_v50   ;;  %v4220_v6 = vphi %v1653_v6, %v2864_v6   ;;  %v4216_v63 = vphi %v1664_v63, %v2870_v63   ;;  %v4212_v44 = vphi %v1671_v44, %v2876_v44   ;;  %v4208_v24 = vphi %v1675_v24, %v2879_v24   ;;  %v4204_v12 = vphi %v1686_v12, %v2885_v12   ;;  %v4200_v37 = vphi %v1689_v37, %v2891_v37   ;;  %v4196_v21 = vphi %v1690_v21, %v2897_v21   ;;  %v4192_v32 = vphi %v1691_v32, %v2900_v32   ;;  %v4188_v48 = vphi %v6207_v48, %v6349_v48   ;;  %v4184_v40 = vphi %v6206_v40, %v6348_v40   ;;  %v4180_v13 = vphi %v6205_v13, %v6347_v13   ;;  %v4176_v4 = vphi %v1700_v4, %v6346_v4  }
 0x556   : >> { %6213 = vst [vmem:[#allocation70_spill] sm:$0xff] %v4180_v13  ;;  %6214 = vst [vmem:[#allocation71_spill] sm:$0xff] %v4184_v40  ;;  %3394 = vmatprep.mubr.msk.f32.mxu0 %vm791_vm0, %v6225_v17  ;;  %v6226_v45 = vld [vmem:[#allocation43_spill] sm:$0xff]  ;;  %v1752_v55 = vrot.slane %v4228_v27, 7  ;;  %v1760_v20 = vrot.slane %v4236_v54, 2  ;;  %v1763_v47 = vrot.slane %v4232_v51, 4 }
 0x557   : >> { %6215 = vst [vmem:[#allocation72_spill] sm:$0xff] %v4188_v48  ;;  %6216 = vst [vmem:[#allocation73_spill] sm:$0xff] %v4192_v32  ;;  %3422 = vmatprep.mubr.msk.f32.mxu1 %vm791_vm0, %v6226_v45  ;;  %v1770_v43 = vrot.slane %v4228_v27, 6  ;;  %v1778_v62 = vrot.slane %v4236_v54, 4  ;;  %v1742_v61 = vmul.f32 %v4224_v50, %v1740_v7  ;;  %v1746_v42 = vmul.f32 %v4220_v6, %v1744_v26  ;;  %v6230_v29 = vld [vmem:[#allocation12_spill] sm:$0xff]  ;;  %v6231_v35 = vld [vmem:[#allocation14_spill] sm:$0xff] }
 0x558   : >> { %6217 = vst [vmem:[#allocation74_spill] sm:$0xff] %v4196_v21  ;;  %6218 = vst [vmem:[#allocation75_spill] sm:$0xff] %v4200_v37  ;;  %v1754_v22 = vmul.f32 %v4216_v63, %v1752_v55  ;;  %v1781_v33 = vrot.slane %v4232_v51, 3  ;;  %v1762_v0 = vmul.f32 %v4212_v44, %v1760_v20  ;;  %v1765_v2 = vmul.f32 %v4208_v24, %v1763_v47  ;;  %v6233_v25 = vld [vmem:[#allocation11_spill] sm:$0xff]  ;;  %v6235_v56 = vld [vmem:[#allocation18_spill] sm:$0xff]  ;;  %s2901_s25 = sadd.s32 1, %s4252_s19  }
 0x559   : >> { %6219 = vst [vmem:[#allocation76_spill] sm:$0xff] %v4208_v24  ;;  %6220 = vst [vmem:[#allocation77_spill] sm:$0xff] %v4212_v44  ;;  %v1772_v52 = vmul.f32 %v4204_v12, %v1770_v43  ;;  %v1780_v36 = vmul.f32 %v4200_v37, %v1778_v62  ;;  %v1748_v3 = vrot.slane %v1746_v42, 5  ;;  %v1788_v7 = vmul.f32 %v4192_v32, %v4228_v27  ;;  %v6234_v58 = vld [vmem:[#allocation19_spill] sm:$0xff]  ;;  %v6237_v59 = vld [vmem:[#allocation20_spill] sm:$0xff]  ;;  %p1732_p6 = scmp.lt.s32.totalorder %s2901_s25, 10  ;;  %s6351_s19 = smov %s2901_s25 }
 0x55a   : >> { %6221 = vst [vmem:[#allocation78_spill] sm:$0xff] %v4220_v6  ;;  %6222 = vst [vmem:[#allocation79_spill] sm:$0xff] %v4228_v27  ;;  %v1756_v53 = vrot.slane %v1754_v22, 4  ;;  %v1783_v10 = vmul.f32 %v4196_v21, %v1781_v33  ;;  %v1767_v26 = vrot.slane %v1765_v2, 2  ;;  %vm1738_vm7 = vcmp.gt.f32.partialorder %v4172_v34, 0.5  ;;  %v6238_v60 = vld [vmem:[#allocation21_spill] sm:$0xff] }
 0x55b   : >> { %6223 = vst [vmem:[#allocation80_spill] sm:$0xff] %v4232_v51  ;;  %6224 = vst [vmem:[#allocation81_spill] sm:$0xff] %v4236_v54  ;;  %v1774_v16 = vrot.slane %v1772_v52, 4  ;;  %v1750_v55 = vadd.f32 %v1748_v3, %v1742_v61  ;;  %v1790_v17 = vrot.slane %v1788_v7, 4  ;;  %v6239_v57 = vld [vmem:[#allocation29_spill] sm:$0xff]  ;;  %v6240_v15 = vld [vmem:[#allocation2_spill] sm:$0xff] }
 0x55c   : >> { %v1785_v8 = vrot.slane %v1783_v10, 5  ;;  %v1769_v45 = vadd.f32 %v1767_v26, %v1762_v0  ;;  %v6232_v0 = vsub.s32 1, %v6210_v23  ;;  %v6236_v10 = vsub.s32 2, %v6210_v23  ;;  %v6241_v18 = vld [vmem:[#allocation5_spill] sm:$0xff]  ;;  %v6243_v38 = vld [vmem:[#allocation15_spill] sm:$0xff]  ;;  %v6252_v34 = vld [vmem:[#allocation30_spill] sm:$0xff] }
 0x55d   : >> { %v1758_v20 = vadd.f32 %v1756_v53, %v1750_v55  ;;  %v6242_v30 = vld [vmem:[#allocation13_spill] sm:$0xff] }
 0x55e   : >> { %v1787_v13 = vadd.f32 %v1785_v8, %v1780_v36  ;;  %v1776_v47 = vadd.f32 %v1774_v16, %v1769_v45  ;;  %v6229_v8 = vsub.s32 0, %v6210_v23 }
 0x55f   : >> { %v1759_v40 = vsub.f32 0.0, %v1758_v20 }
 0x560   : >> { %v1792_v43 = vadd.f32 %v1790_v17, %v1787_v13  ;;  %v1777_v48 = vsub.f32 0.0, %v1776_v47 }
 0x561   : >> { %v1795_v42 = vrot.slane %v1759_v40, 5 }
 0x562   : >> { %v1793_v62 = vsub.f32 0.0, %v1792_v43  ;;  %v1799_v22 = vrot.slane %v1777_v48, 6 }
 0x563   : >> { %v5314_v33 = vsel %vm1738_vm7, %v1795_v42, 0.0 }
 0x564   : >> { %v1803_v2 = vrot.slane %v1793_v62, 4  ;;  %v5318_v61 = vsel %vm1738_vm7, %v1799_v22, 0.0  ;;  %v5321_v5 = vadd.f32 %v4248_v5, %v5314_v33   ;;  %v6244_v22 = vld [vmem:[#allocation6_spill] sm:$0xff] }
 0x565   : >> { %6227 = vst [vmem:[#allocation82_spill] sm:$0xff] %v5318_v61  ;;  %v1808_v45 = vrot.slane %v5318_v61, 7 }
 0x566   : >> { %v5325_v17 = vsel %vm1738_vm7, %v1803_v2, 0.0  ;;  %v1818_v13 = vrot.slane %v5321_v5, %v6229_v8  ;;  %v6246_v8 = vld [vmem:[#allocation8_spill] sm:$0xff] }
 0x567   : >> { %6228 = vst [vmem:[#allocation83_spill] sm:$0xff] %v5325_v17  ;;  %v1812_v16 = vrot.slane %v5325_v17, 6  ;;  %v5332_v9 = vadd.f32 %v4244_v9, %v1808_v45   ;;  %v6245_v45 = vld [vmem:[#allocation7_spill] sm:$0xff] }
 0x568   : >> { %v1819_v40 = vmul.f32 %v1818_v13, %v6230_v29  ;;  %v1820_v48 = vmul.f32 %v1818_v13, %v6231_v35  ;;  %v1821_v36 = vmul.f32 %v1818_v13, %v6233_v25  ;;  %v1822_v3 = vmul.f32 %v1818_v13, %v6234_v58  ;;  %v6250_v58 = vld [vmem:[#allocation24_spill] sm:$0xff] }
 0x569   : >> { %v5334_v39 = vadd.f32 %v4240_v39, %v1812_v16   ;;  %v1830_v52 = vrot.slane %v5332_v9, %v6232_v0  ;;  %v1823_v53 = vmul.f32 %v1818_v13, %v6235_v56  ;;  %v1824_v26 = vmul.f32 %v1818_v13, %v6237_v59  ;;  %v6248_v56 = vld [vmem:[#allocation23_spill] sm:$0xff]  ;;  %v6251_v59 = vld [vmem:[#allocation10_spill] sm:$0xff] }
 0x56a   : >> { %v1825_v55 = vmul.f32 %v1818_v13, %v6238_v60  ;;  %v1826_v20 = vmul.f32 %v1818_v13, %v6239_v57  ;;  %v6249_v57 = vld [vmem:[#allocation22_spill] sm:$0xff] }
 0x56b   : >> { %v1850_v7 = vrot.slane %v5334_v39, %v6236_v10  ;;  %v1831_v47 = vmul.f32 %v1830_v52, %v6240_v15  ;;  %v1832_v43 = vmul.f32 %v1830_v52, %v6241_v18  ;;  %v1833_v62 = vmul.f32 %v1830_v52, %v6242_v30  ;;  %v6247_v10 = vld [vmem:[#allocation16_spill] sm:$0xff] }
 0x56c   : >> { %v1834_v42 = vmul.f32 %v1830_v52, %v6243_v38  ;;  %v1835_v15 = vmul.f32 %v1830_v52, %v6248_v56  ;;  %v1836_v18 = vmul.f32 %v1830_v52, %v6249_v57  ;;  %v6255_v56 = vld [vmem:[#allocation3_spill] sm:$0xff]  ;;  %v6256_v57 = vld [vmem:[#allocation26_spill] sm:$0xff] }
 0x56d   : >> { %v1851_v2 = vmul.f32 %v1850_v7, %v6244_v22  ;;  %v1852_v16 = vmul.f32 %v1850_v7, %v6245_v45  ;;  %v1853_v0 = vmul.f32 %v1850_v7, %v6246_v8  ;;  %v1854_v23 = vmul.f32 %v1850_v7, %v6247_v10 }
 0x56e   : >> { %v1839_v25 = vadd.f32 %v1831_v47, %v1819_v40  ;;  %v1840_v29 = vadd.f32 %v1832_v43, %v1820_v48  ;;  %v1841_v35 = vadd.f32 %v1833_v62, %v1821_v36  ;;  %v1842_v13 = vadd.f32 %v1834_v42, %v1822_v3  ;;  %v6253_v40 = vld [vmem:[#allocation25_spill] sm:$0xff] }
 0x56f   : >> { %v1855_v30 = vmul.f32 %v1850_v7, %v6250_v58  ;;  %v1856_v38 = vmul.f32 %v1850_v7, %v6251_v59  ;;  %v1843_v51 = vadd.f32 %v1835_v15, %v1823_v53  ;;  %v1844_v8 = vadd.f32 %v1836_v18, %v1824_v26  ;;  %v6254_v36 = vld [vmem:[#allocation17_spill] sm:$0xff]  ;;  %v6257_v59 = vld [vmem:[#allocation28_spill] sm:$0xff]  ;;  %v6259_v26 = vld [vmem:[#allocation34_spill] sm:$0xff] }
 0x570   : >> { %v1859_v60 = vadd.f32 %v1851_v2, %v1839_v25  ;;  %v1860_v22 = vadd.f32 %v1852_v16, %v1840_v29  ;;  %v1861_v4 = vadd.f32 %v1853_v0, %v1841_v35  ;;  %v1862_v45 = vadd.f32 %v1854_v23, %v1842_v13 }
 0x571   : >> { %v1837_v10 = vmul.f32 %v1830_v52, %v6252_v34  ;;  %v1838_v48 = vmul.f32 %v1830_v52, %v6253_v40  ;;  %v1863_v29 = vadd.f32 %v1855_v30, %v1843_v51  ;;  %v1864_v23 = vadd.f32 %v1856_v38, %v1844_v8  ;;  %v6260_v38 = vld [vmem:[#allocation31_spill] sm:$0xff] }
 0x572   : >> { %v5365_v3 = vadd.f32 %v1859_v60, %v6254_v36  ;;  %v5368_v47 = vadd.f32 %v1860_v22, %v6255_v56  ;;  %v5371_v58 = vadd.f32 %v1861_v4, %v6256_v57  ;;  %v5374_v25 = vadd.f32 %v1862_v45, %v6257_v59  ;;  %v6258_v4 = vld [vmem:[#allocation27_spill] sm:$0xff]  ;;  %v6263_v57 = vld [vmem:[#allocation33_spill] sm:$0xff] }
 0x573   : >> { %v1845_v15 = vadd.f32 %v1837_v10, %v1825_v55  ;;  %v1846_v18 = vadd.f32 %v1838_v48, %v1826_v20  ;;  %v5389_v53 = vadd.f32 %v1863_v29, %v6258_v4  ;;  %v5392_v30 = vadd.f32 %v1864_v23, %v6259_v26  ;;  %v6261_v55 = vld [vmem:[#allocation32_spill] sm:$0xff]  ;;  %v6262_v36 = vld [vmem:[#allocation35_spill] sm:$0xff] }
 0x574   : >> { %v5377_v35 = vmul.f32 100.0, %v5365_v3  ;;  %v5380_v34 = vmul.f32 100.0, %v5368_v47  ;;  %v5383_v60 = vmul.f32 100.0, %v5371_v58  ;;  %v5386_v52 = vmul.f32 100.0, %v5374_v25 }
 0x575   : >> { %v1857_v51 = vmul.f32 %v1850_v7, %v6260_v38  ;;  %v1858_v20 = vmul.f32 %v1850_v7, %v6261_v55  ;;  %v5401_v13 = vmul.f32 100.0, %v5389_v53  ;;  %v5404_v22 = vmul.f32 100.0, %v5392_v30 }
 0x576   : >> { %v1883_v43 = vmin.f32 %v5377_v35, 20.0  ;;  %v1884_v62 = vmin.f32 %v5380_v34, 20.0  ;;  %v1885_v42 = vmin.f32 %v5383_v60, 20.0  ;;  %v1886_v2 = vmin.f32 %v5386_v52, 20.0 }
 0x577   : >> { %v1865_v10 = vadd.f32 %v1857_v51, %v1845_v15  ;;  %v1866_v7 = vadd.f32 %v1858_v20, %v1846_v18  ;;  %v1887_v40 = vmin.f32 %v5401_v13, 20.0  ;;  %v1888_v48 = vmin.f32 %v5404_v22, 20.0 }
 0x578   : >> { %v1899_v16 = vmul.f32 1.442695, %v1883_v43  ;;  %v1901_v0 = vmul.f32 1.442695, %v1884_v62  ;;  %v1903_v45 = vmul.f32 1.442695, %v1885_v42 }
 0x579   : >> { %v1905_v8 = vmul.f32 1.442695, %v1886_v2  ;;  %v5409_v56 = vadd.f32 %v1865_v10, %v6262_v36  ;;  %v5412_v59 = vadd.f32 %v1866_v7, %v6263_v57  ;;  %v1907_v29 = vmul.f32 1.442695, %v1887_v40 }
 0x57a   : >> { %3938 = vpow2.f32 %v1899_v16  ;;  %v1909_v23 = vmul.f32 1.442695, %v1888_v48  ;;  %vm1891_vm8 = vcmp.gt.f32.partialorder %v5377_v35, 20.0  ;;  %vm1892_vm10 = vcmp.gt.f32.partialorder %v5380_v34, 20.0  ;;  %v6289_v34 = vld [vmem:[#allocation48_spill] sm:$0xff] }
 0x57b   : >> { %3940 = vpow2.f32 %v1901_v0  ;;  %v5415_v4 = vmul.f32 100.0, %v5409_v56  ;;  %v5418_v15 = vmul.f32 100.0, %v5412_v59  ;;  %vm1893_vm12 = vcmp.gt.f32.partialorder %v5383_v60, 20.0 }
 0x57c   : >> { %3942 = vpow2.f32 %v1903_v45  ;;  %vm1894_vm13 = vcmp.gt.f32.partialorder %v5386_v52, 20.0  ;;  %vm1895_vm1 = vcmp.gt.f32.partialorder %v5401_v13, 20.0  ;;  %vm1896_vm5 = vcmp.gt.f32.partialorder %v5404_v22, 20.0  ;;  %v6279_v22 = vld [vmem:[#allocation37_spill] sm:$0xff] }
 0x57d   : >> { %3944 = vpow2.f32 %v1905_v8  ;;  %v1889_v18 = vmin.f32 %v5415_v4, 20.0  ;;  %v1890_v26 = vmin.f32 %v5418_v15, 20.0 }
 0x57e   : >> { %3946 = vpow2.f32 %v1907_v29 }
 0x57f   : >> { %3948 = vpow2.f32 %v1909_v23  ;;  %v1911_v38 = vmul.f32 1.442695, %v1889_v18  ;;  %v1913_v51 = vmul.f32 1.442695, %v1890_v26 }
 0x581   : >> { %3950 = vpow2.f32 %v1911_v38 }
 0x582   : >> { %3952 = vpow2.f32 %v1913_v51 }
 0x584   : >> { %v3939_v55 = vpop.eup %3938 }
 0x585   : >> { %v3941_v20 = vpop.eup %3940  ;;  %v1915_v43 = vadd.f32 1.0, %v3939_v55  ;;  %v1918_v16 = vmul.f32 -0.5, %v3939_v55  ;;  %v1921_v8 = vand.u32 2147483647, %v3939_v55 }
 0x586   : >> { %v3943_v62 = vpop.eup %3942  ;;  %v1924_v42 = vadd.f32 1.0, %v3941_v20  ;;  %v1927_v10 = vmul.f32 -0.5, %v3941_v20  ;;  %v1930_v48 = vand.u32 2147483647, %v3941_v20 }
 0x587   : >> { %v3945_v2 = vpop.eup %3944  ;;  %3954 = vlog2.f32 %v1915_v43  ;;  %v1933_v0 = vadd.f32 1.0, %v3943_v62  ;;  %v1936_v36 = vmul.f32 -0.5, %v3943_v62  ;;  %v1919_v57 = vadd.f32 1.0, %v1918_v16 }
 0x588   : >> { %v3947_v45 = vpop.eup %3946  ;;  %3956 = vlog2.f32 %v1924_v42  ;;  %v1942_v7 = vadd.f32 1.0, %v3945_v2  ;;  %v1945_v29 = vmul.f32 -0.5, %v3945_v2  ;;  %vm5425_vm9 = vcmp.lt.f32.partialorder %v1921_v8, 0.0004427343 }
 0x589   : >> { %3958 = vlog2.f32 %v1933_v0  ;;  %v5422_v40 = vpop.eup %3948  ;;  %v1951_v23 = vadd.f32 1.0, %v3947_v45  ;;  %v1954_v26 = vmul.f32 -0.5, %v3947_v45  ;;  %v1928_v51 = vadd.f32 1.0, %v1927_v10 }
 0x58a   : >> { %3960 = vlog2.f32 %v1942_v7  ;;  %v1939_v43 = vand.u32 2147483647, %v3943_v62  ;;  %v1960_v42 = vadd.f32 1.0, %v5422_v40  ;;  %vm5435_vm11 = vcmp.lt.f32.partialorder %v1930_v48, 0.0004427343 }
 0x58b   : >> { %v5429_v38 = vpop.eup %3950  ;;  %3962 = vlog2.f32 %v1951_v23  ;;  %v1937_v8 = vadd.f32 1.0, %v1936_v36  ;;  %v1948_v7 = vand.u32 2147483647, %v3945_v2  ;;  %v1920_v27 = vmul.f32 %v3939_v55, %v1919_v57 }
 0x58c   : >> { %v5433_v16 = vpop.eup %3952  ;;  %v1969_v54 = vadd.f32 1.0, %v5429_v38  ;;  %v1946_v32 = vadd.f32 1.0, %v1945_v29  ;;  %3964 = vlog2.f32 %v1960_v42  ;;  %v1963_v10 = vmul.f32 -0.5, %v5422_v40 }
 0x58d   : >> { %v1955_v23 = vadd.f32 1.0, %v1954_v26  ;;  %v1957_v17 = vand.u32 2147483647, %v3947_v45  ;;  %v1978_v48 = vadd.f32 1.0, %v5433_v16  ;;  %v1929_v21 = vmul.f32 %v3941_v20, %v1928_v51 }
 0x58e   : >> { %3966 = vlog2.f32 %v1969_v54  ;;  %vm5444_vm14 = vcmp.lt.f32.partialorder %v1939_v43, 0.0004427343  ;;  %v1966_v36 = vand.u32 2147483647, %v5422_v40  ;;  %v1972_v55 = vmul.f32 -0.5, %v5429_v38 }
 0x58f   : >> { %v1938_v42 = vmul.f32 %v3943_v62, %v1937_v8  ;;  %vm5450_vm15 = vcmp.lt.f32.partialorder %v1948_v7, 0.0004427343  ;;  %3968 = vlog2.f32 %v1978_v48  ;;  %v1947_v26 = vmul.f32 %v3945_v2, %v1946_v32  ;;  %v6284_v48 = vld [vmem:[#allocation42_spill] sm:$0xff] }
 0x590   : >> { %v1964_v51 = vadd.f32 1.0, %v1963_v10  ;;  %v1981_v43 = vmul.f32 -0.5, %v5433_v16  ;;  %v1956_v44 = vmul.f32 %v3947_v45, %v1955_v23  ;;  %vm5458_vm2 = vcmp.lt.f32.partialorder %v1957_v17, 0.0004427343 }
 0x591   : >> { %v3955_v49 = vpop.eup %3954  ;;  %vm5464_vm4 = vcmp.lt.f32.partialorder %v1966_v36, 0.0004427343  ;;  %v1973_v32 = vadd.f32 1.0, %v1972_v55  ;;  %v1975_v17 = vand.u32 2147483647, %v5429_v38 }
 0x592   : >> { %v3957_v57 = vpop.eup %3956  ;;  %v1917_v29 = vmul.f32 0.6931472, %v3955_v49  ;;  %v1984_v36 = vand.u32 2147483647, %v5433_v16 }
 0x593   : >> { %v3959_v54 = vpop.eup %3958  ;;  %v1926_v20 = vmul.f32 0.6931472, %v3957_v57  ;;  %v1974_v35 = vmul.f32 %v5429_v38, %v1973_v32  ;;  %vm5488_vm3 = vcmp.lt.f32.partialorder %v1975_v17, 0.0004427343  ;;  %v6286_v17 = vld [vmem:[#allocation44_spill] sm:$0xff] }
 0x594   : >> { %v1923_v6 = vsel %vm5425_vm9, %v1920_v27, %v1917_v29  ;;  %v1935_v61 = vmul.f32 0.6931472, %v3959_v54  ;;  %v3961_v62 = vpop.eup %3960  ;;  %vm1985_vm9 = vcmp.lt.f32.partialorder %v1984_v36, 0.0004427343 }
 0x595   : >> { %v1932_v8 = vsel %vm5435_vm11, %v1929_v21, %v1926_v20  ;;  %v1987_v7 = vmul.f32 0.01, %v1923_v6  ;;  %v1944_v18 = vmul.f32 0.6931472, %v3961_v62  ;;  %v3963_v45 = vpop.eup %3962  ;;  %v1965_v6 = vmul.f32 %v5422_v40, %v1964_v51 }
 0x596   : >> { %v1988_v2 = vmul.f32 0.01, %v1932_v8  ;;  %v1941_v27 = vsel %vm5444_vm14, %v1938_v42, %v1935_v61  ;;  %v1982_v21 = vadd.f32 1.0, %v1981_v43  ;;  %v1953_v61 = vmul.f32 0.6931472, %v3963_v45  ;;  %v3965_v55 = vpop.eup %3964 }
 0x597   : >> { %v1995_v10 = vsel %vm1891_vm8, %v5365_v3, %v1987_v7  ;;  %v1989_v0 = vmul.f32 0.01, %v1941_v27  ;;  %v1950_v24 = vsel %vm5450_vm15, %v1947_v26, %v1944_v18  ;;  %v1962_v37 = vmul.f32 0.6931472, %v3965_v55  ;;  %v6278_v7 = vld [vmem:[#allocation36_spill] sm:$0xff]  ;;  %v6288_v55 = vld [vmem:[#allocation45_spill] sm:$0xff] }
 0x598   : >> { %v1996_v23 = vsel %vm1892_vm10, %v5368_v47, %v1988_v2  ;;  %v1990_v29 = vmul.f32 0.01, %v1950_v24  ;;  %v3967_v40 = vpop.eup %3966  ;;  %v1959_v47 = vsel %vm5458_vm2, %v1956_v44, %v1953_v61  ;;  %v1983_v38 = vmul.f32 %v5433_v16, %v1982_v21  ;;  %v6285_v2 = vld [vmem:[#allocation46_spill] sm:$0xff] }
 0x599   : >> { %v3516_v57 = vpack.c.bf16 %v1996_v23, %v1995_v10  ;;  %v1997_v3 = vsel %vm1893_vm12, %v5371_v58, %v1989_v0  ;;  %v1991_v60 = vmul.f32 0.01, %v1959_v47  ;;  %v1971_v58 = vmul.f32 0.6931472, %v3967_v40  ;;  %v3969_v54 = vpop.eup %3968  ;;  %v6287_v23 = vld [vmem:[#allocation47_spill] sm:$0xff] }
 0x59a   : >> { %v1998_v42 = vsel %vm1894_vm13, %v5374_v25, %v1990_v29  ;;  %v1968_v44 = vsel %vm5464_vm4, %v1965_v6, %v1962_v37  ;;  %vm1897_vm8 = vcmp.gt.f32.partialorder %v5415_v4, 20.0  ;;  %v1980_v52 = vmul.f32 0.6931472, %v3969_v54 }
 0x59b   : >> { %3517 = vmatprep.subr.bf16.mxu0 %v3516_v57  ;;  %v3520_v20 = vpack.c.bf16 %v1998_v42, %v1997_v3  ;;  %v1992_v26 = vmul.f32 0.01, %v1968_v44  ;;  %v1999_v51 = vsel %vm1895_vm1, %v5389_v53, %v1991_v60  ;;  %v1977_v25 = vsel %vm5488_vm3, %v1974_v35, %v1971_v58 }
 0x59c   : >> { %3519 = vmatpush3.bf16.msra.mxu0 %v3516_v57  ;;  %v1993_v16 = vmul.f32 0.01, %v1977_v25  ;;  %vm1898_vm10 = vcmp.gt.f32.partialorder %v5418_v15, 20.0  ;;  %v1986_v49 = vsel %vm1985_vm9, %v1983_v38, %v1980_v52  ;;  %v6281_v15 = vld [vmem:[#allocation39_spill] sm:$0xff]  ;;  %v6290_v38 = vld [vmem:[#allocation49_spill] sm:$0xff] }
 0x59d   : >> { %3521 = vmatprep.subr.bf16.mxu0 %v3520_v20  ;;  %v2000_v43 = vsel %vm1896_vm5, %v5392_v30, %v1992_v26  ;;  %v1994_v62 = vmul.f32 0.01, %v1986_v49  ;;  %v6280_v30 = vld [vmem:[#allocation38_spill] sm:$0xff] }
 0x59e   : >> { %v3524_v4 = vpack.c.bf16 %v2000_v43, %v1999_v51  ;;  %v2001_v8 = vsel %vm1897_vm8, %v5409_v56, %v1993_v16  ;;  %v6282_v56 = vld [vmem:[#allocation40_spill] sm:$0xff]  ;;  %v6291_v16 = vld [vmem:[#allocation50_spill] sm:$0xff] }
 0x59f   : >> { %v2002_v53 = vsel %vm1898_vm10, %v5412_v59, %v1994_v62  ;;  %v6283_v59 = vld [vmem:[#allocation41_spill] sm:$0xff]  ;;  %v6292_v62 = vld [vmem:[#allocation51_spill] sm:$0xff] }
 0x5a0   : >> { %3523 = vmatpush3.bf16.msra.mxu0 %v3520_v20  ;;  %v3528_v13 = vpack.c.bf16 %v2002_v53, %v2001_v8 }
 0x5a1   : >> { %3525 = vmatprep.subr.bf16.mxu0 %v3524_v4 }
 0x5a4   : >> { %3527 = vmatpush3.bf16.msra.mxu0 %v3524_v4 }
 0x5a5   : >> { %3529 = vmatprep.subr.bf16.mxu0 %v3528_v13 }
 0x5a8   : >> { %3531 = vmatpush3.bf16.msra.mxu0 %v3528_v13 }
 0x5ab   : >> { %3395 = vmatmul.mubr.msk.f32.vlgmr.msra.gmra.mrb[0].mxu0 %vm791_vm0, %v6278_v7 }
 0x5ac   : >> { %3397 = vmatprep.mubr.msk.f32.mxu0 %vm791_vm0, %v6279_v22 }
 0x5af   : >> { %3398 = vmatmul.mubr.msk.f32.gmra.mrb[2].mxu0 %vm791_vm0, %v6280_v30 }
 0x5b0   : >> { %3400 = vmatprep.mubr.msk.f32.mxu0 %vm791_vm0, %v6281_v15 }
 0x5b3   : >> { %3401 = vmatmul.mubr.msk.f32.gmra.mrb[4].mxu0 %vm791_vm0, %v6282_v56 }
 0x5b4   : >> { %3403 = vmatprep.mubr.msk.f32.mxu0 %vm791_vm0, %v6283_v59 }
 0x5b7   : >> { %3404 = vmatmul.mubr.msk.f32.gmra.mrb[6].mxu0 %vm791_vm0, %v6284_v48 }
 0x67e   : >> { %v3396_v32 = vpop.f32.mrb[0].mxu0 }
 0x67f   : >> { %v5525_v27 = vadd.f32 %v3396_v32, %v6285_v2  ;;  %v2069_v18 = vpop.f32.mrb[1].mxu0 }
 0x680   : >> { %v5528_v45 = vadd.f32 %v2069_v18, %v6286_v17 }
 0x681   : >> { %v5531_v10 = vmul.f32 100.0, %v5525_v27 }
 0x682   : >> { %v5534_v0 = vmul.f32 100.0, %v5528_v45  ;;  %v3399_v6 = vpop.f32.mrb[2].mxu0 }
 0x683   : >> { %v2117_v21 = vmin.f32 %v5531_v10, 20.0  ;;  %v5538_v24 = vadd.f32 %v3399_v6, %v6287_v23  ;;  %v2079_v61 = vpop.f32.mrb[3].mxu0  ;;  %vm2125_vm11 = vcmp.gt.f32.partialorder %v5531_v10, 20.0 }
 0x684   : >> { %v2116_v36 = vmin.f32 %v5534_v0, 20.0  ;;  %v5542_v57 = vadd.f32 %v2079_v61, %v6288_v55  ;;  %vm2124_vm12 = vcmp.gt.f32.partialorder %v5534_v0, 20.0 }
 0x685   : >> { %v2134_v29 = vmul.f32 1.442695, %v2117_v21  ;;  %v5545_v3 = vmul.f32 100.0, %v5538_v24 }
 0x686   : >> { %v2132_v35 = vmul.f32 1.442695, %v2116_v36  ;;  %v5548_v40 = vmul.f32 100.0, %v5542_v57  ;;  %v3402_v47 = vpop.f32.mrb[4].mxu0 }
 0x687   : >> { %3970 = vpow2.f32 %v2134_v29  ;;  %v2119_v37 = vmin.f32 %v5545_v3, 20.0  ;;  %v5552_v42 = vadd.f32 %v3402_v47, %v6289_v34  ;;  %v2089_v60 = vpop.f32.mrb[5].mxu0  ;;  %vm2127_vm15 = vcmp.gt.f32.partialorder %v5545_v3, 20.0 }
 0x688   : >> { %3972 = vpow2.f32 %v2132_v35  ;;  %v2118_v58 = vmin.f32 %v5548_v40, 20.0  ;;  %v5556_v54 = vadd.f32 %v2089_v60, %v6290_v38  ;;  %vm2126_vm1 = vcmp.gt.f32.partialorder %v5548_v40, 20.0 }
 0x689   : >> { %v2138_v20 = vmul.f32 1.442695, %v2119_v37  ;;  %v5559_v44 = vmul.f32 100.0, %v5552_v42 }
 0x68a   : >> { %v2136_v26 = vmul.f32 1.442695, %v2118_v58  ;;  %v5562_v51 = vmul.f32 100.0, %v5556_v54  ;;  %v3405_v25 = vpop.f32.mrb[6].mxu0 }
 0x68b   : >> { %3974 = vpow2.f32 %v2138_v20  ;;  %v2121_v52 = vmin.f32 %v5559_v44, 20.0  ;;  %v5566_v43 = vadd.f32 %v3405_v25, %v6291_v16  ;;  %v2099_v49 = vpop.f32.mrb[7].mxu0  ;;  %vm2129_vm8 = vcmp.gt.f32.partialorder %v5559_v44, 20.0 }
 0x68c   : >> { %3976 = vpow2.f32 %v2136_v26  ;;  %v2120_v4 = vmin.f32 %v5562_v51, 20.0  ;;  %v5570_v8 = vadd.f32 %v2099_v49, %v6292_v62  ;;  %vm2128_vm9 = vcmp.gt.f32.partialorder %v5562_v51, 20.0 }
 0x68d   : >> { %v2142_v53 = vmul.f32 1.442695, %v2121_v52  ;;  %v5573_v13 = vmul.f32 100.0, %v5566_v43 }
 0x68e   : >> { %v2140_v7 = vmul.f32 1.442695, %v2120_v4  ;;  %v5576_v22 = vmul.f32 100.0, %v5570_v8 }
 0x68f   : >> { %3978 = vpow2.f32 %v2142_v53  ;;  %v2123_v30 = vmin.f32 %v5573_v13, 20.0 }
 0x690   : >> { %3980 = vpow2.f32 %v2140_v7  ;;  %v2122_v15 = vmin.f32 %v5576_v22, 20.0 }
 0x691   : >> { %v3971_v56 = vpop.eup %3970  ;;  %v2146_v59 = vmul.f32 1.442695, %v2123_v30 }
 0x692   : >> { %v3973_v48 = vpop.eup %3972  ;;  %v2144_v32 = vmul.f32 1.442695, %v2122_v15  ;;  %v2157_v2 = vadd.f32 1.0, %v3971_v56  ;;  %v2160_v61 = vmul.f32 -0.5, %v3971_v56  ;;  %v2163_v35 = vand.u32 2147483647, %v3971_v56 }
 0x693   : >> { %3982 = vpow2.f32 %v2146_v59  ;;  %v2148_v18 = vadd.f32 1.0, %v3973_v48  ;;  %v2151_v23 = vmul.f32 -0.5, %v3973_v48  ;;  %v2154_v37 = vand.u32 2147483647, %v3973_v48 }
 0x694   : >> { %3984 = vpow2.f32 %v2144_v32  ;;  %v2161_v58 = vadd.f32 1.0, %v2160_v61  ;;  %vm5587_vm13 = vcmp.lt.f32.partialorder %v2163_v35, 0.0004427343 }
 0x695   : >> { %v3975_v17 = vpop.eup %3974  ;;  %3986 = vlog2.f32 %v2148_v18  ;;  %v2152_v60 = vadd.f32 1.0, %v2151_v23  ;;  %vm5593_vm14 = vcmp.lt.f32.partialorder %v2154_v37, 0.0004427343 }
 0x696   : >> { %v3977_v6 = vpop.eup %3976  ;;  %3988 = vlog2.f32 %v2157_v2  ;;  %v2175_v21 = vadd.f32 1.0, %v3975_v17  ;;  %v2178_v55 = vmul.f32 -0.5, %v3975_v17  ;;  %v2181_v53 = vand.u32 2147483647, %v3975_v17 }
 0x697   : >> { %v2166_v36 = vadd.f32 1.0, %v3977_v6  ;;  %v2169_v38 = vmul.f32 -0.5, %v3977_v6  ;;  %v2172_v26 = vand.u32 2147483647, %v3977_v6  ;;  %v2153_v59 = vmul.f32 %v3973_v48, %v2152_v60 }
 0x698   : >> { %3990 = vlog2.f32 %v2175_v21  ;;  %v2179_v25 = vadd.f32 1.0, %v2178_v55  ;;  %v2162_v32 = vmul.f32 %v3971_v56, %v2161_v58  ;;  %vm5608_vm4 = vcmp.lt.f32.partialorder %v2181_v53, 0.0004427343 }
 0x699   : >> { %v3979_v29 = vpop.eup %3978  ;;  %3992 = vlog2.f32 %v2166_v36  ;;  %v2170_v2 = vadd.f32 1.0, %v2169_v38  ;;  %vm5602_vm2 = vcmp.lt.f32.partialorder %v2172_v26, 0.0004427343 }
 0x69a   : >> { %v5580_v47 = vpop.eup %3980  ;;  %v2193_v34 = vadd.f32 1.0, %v3979_v29  ;;  %v2196_v49 = vmul.f32 -0.5, %v3979_v29  ;;  %v2180_v36 = vmul.f32 %v3975_v17, %v2179_v25  ;;  %v2199_v37 = vand.u32 2147483647, %v3979_v29 }
 0x69b   : >> { %v2184_v20 = vadd.f32 1.0, %v5580_v47  ;;  %v2187_v7 = vmul.f32 -0.5, %v5580_v47  ;;  %v2190_v58 = vand.u32 2147483647, %v5580_v47 }
 0x69c   : >> { %3994 = vlog2.f32 %v2193_v34  ;;  %v2197_v35 = vadd.f32 1.0, %v2196_v49  ;;  %vm5622_vm5 = vcmp.lt.f32.partialorder %v2199_v37, 0.0004427343 }
 0x69d   : >> { %v5583_v52 = vpop.eup %3982  ;;  %3996 = vlog2.f32 %v2184_v20  ;;  %v2188_v60 = vadd.f32 1.0, %v2187_v7  ;;  %vm2191_vm3 = vcmp.lt.f32.partialorder %v2190_v58, 0.0004427343 }
 0x69e   : >> { %v5591_v4 = vpop.eup %3984  ;;  %v2211_v30 = vadd.f32 1.0, %v5583_v52  ;;  %v2214_v25 = vmul.f32 -0.5, %v5583_v52  ;;  %v2217_v10 = vand.u32 2147483647, %v5583_v52 }
 0x69f   : >> { %v3987_v15 = vpop.eup %3986  ;;  %v2202_v18 = vadd.f32 1.0, %v5591_v4  ;;  %v2205_v62 = vmul.f32 -0.5, %v5591_v4  ;;  %v2189_v0 = vmul.f32 %v5580_v47, %v2188_v60  ;;  %v2208_v61 = vand.u32 2147483647, %v5591_v4 }
 0x6a0   : >> { %v3989_v21 = vpop.eup %3988  ;;  %v2150_v23 = vmul.f32 0.6931472, %v3987_v15  ;;  %3998 = vlog2.f32 %v2211_v30  ;;  %v2171_v15 = vmul.f32 %v3977_v6, %v2170_v2  ;;  %vm2218_vm10 = vcmp.lt.f32.partialorder %v2217_v10, 0.0004427343 }
 0x6a1   : >> { %v2159_v55 = vmul.f32 0.6931472, %v3989_v21  ;;  %4000 = vlog2.f32 %v2202_v18  ;;  %v2206_v37 = vadd.f32 1.0, %v2205_v62  ;;  %v4280_v62 = vmov 0.0|0.0  }
 0x6a2   : >> { %v3991_v34 = vpop.eup %3990  ;;  %v2156_v56 = vsel %vm5593_vm14, %v2153_v59, %v2150_v23  ;;  %v2198_v59 = vmul.f32 %v3979_v29, %v2197_v35  ;;  %v2215_v29 = vadd.f32 1.0, %v2214_v25  ;;  %3548 = vmatprep.subr.bf16.mxu0 %v4280_v62  ;;  %vm4281_vm14 = vmmov 0  }
 0x6a3   : >> { %v3993_v38 = vpop.eup %3992  ;;  %v2165_v17 = vsel %vm5587_vm13, %v2162_v32, %v2159_v55  ;;  %v2220_v20 = vmul.f32 0.01, %v2156_v56  ;;  %v2177_v26 = vmul.f32 0.6931472, %v3991_v34  ;;  %vm2130_vm13 = vcmp.gt.f32.partialorder %v5576_v22, 20.0  ;;  %v6307_v22 = vld [vmem:[#allocation56_spill] sm:$0xff] }
 0x6a4   : >> { %v2221_v49 = vmul.f32 0.01, %v2165_v17  ;;  %v2168_v30 = vmul.f32 0.6931472, %v3993_v38  ;;  %v2207_v17 = vmul.f32 %v5591_v4, %v2206_v37 }
 0x6a5   : >> { %v2228_v53 = vsel %vm2124_vm12, %v5528_v45, %v2220_v20  ;;  %v2183_v7 = vsel %vm5608_vm4, %v2180_v36, %v2177_v26  ;;  %vm2131_vm12 = vcmp.gt.f32.partialorder %v5573_v13, 20.0  ;;  %v6306_v13 = vld [vmem:[#allocation55_spill] sm:$0xff] }
 0x6a6   : >> { %v3995_v32 = vpop.eup %3994  ;;  %v2229_v18 = vsel %vm2125_vm11, %v5525_v27, %v2221_v49  ;;  %v2174_v6 = vsel %vm5602_vm2, %v2171_v15, %v2168_v30  ;;  %v2223_v2 = vmul.f32 0.01, %v2183_v7  ;;  %vm2209_vm11 = vcmp.lt.f32.partialorder %v2208_v61, 0.0004427343  ;;  %v6304_v30 = vld [vmem:[#allocation53_spill] sm:$0xff]  ;;  %v6305_v15 = vld [vmem:[#allocation54_spill] sm:$0xff] }
 0x6a7   : >> { %v3997_v45 = vpop.eup %3996  ;;  %v3532_v21 = vpack.c.bf16 %v2229_v18, %v2228_v53  ;;  %v2222_v23 = vmul.f32 0.01, %v2174_v6  ;;  %v2195_v36 = vmul.f32 0.6931472, %v3995_v32  ;;  %v4282_v53 = vmov 0.0   ;;  %v6311_v18 = vld [vmem:[#allocation59_spill] sm:$0xff] }
 0x6a8   : >> { %v2231_v55 = vsel %vm2127_vm15, %v5538_v24, %v2223_v2  ;;  %v2186_v35 = vmul.f32 0.6931472, %v3997_v45  ;;  %3450 = vmatprep.mubr.msk.f32.mxu0 %vm4281_vm14, %v4282_v53 }
 0x6a9   : >> { %3533 = vmatprep.subr.bf16.mxu1 %v3532_v21  ;;  %v2230_v27 = vsel %vm2126_vm1, %v5542_v57, %v2222_v23  ;;  %v2201_v47 = vsel %vm5622_vm5, %v2198_v59, %v2195_v36  ;;  %v2216_v57 = vmul.f32 %v5583_v52, %v2215_v29  ;;  %v6310_v59 = vld [vmem:[#allocation60_spill] sm:$0xff]  ;;  %v6312_v23 = vld [vmem:[#allocation61_spill] sm:$0xff] }
 0x6aa   : >> { %v3999_v34 = vpop.eup %3998  ;;  %3535 = vmatpush3.bf16.msra.mxu1 %v3532_v21  ;;  %v3536_v24 = vpack.c.bf16 %v2231_v55, %v2230_v27  ;;  %v2192_v3 = vsel %vm2191_vm3, %v2189_v0, %v2186_v35  ;;  %v2225_v56 = vmul.f32 0.01, %v2201_v47  ;;  %v6313_v35 = vld [vmem:[#allocation62_spill] sm:$0xff] }
 0x6ab   : >> { %v4001_v48 = vpop.eup %4000  ;;  %v2224_v60 = vmul.f32 0.01, %v2192_v3  ;;  %v2213_v38 = vmul.f32 0.6931472, %v3999_v34  ;;  %v6314_v3 = vld [vmem:[#allocation63_spill] sm:$0xff] }
 0x6ac   : >> { %3537 = vmatprep.subr.bf16.mxu1 %v3536_v24  ;;  %v2233_v40 = vsel %vm2129_vm8, %v5552_v42, %v2225_v56  ;;  %v2204_v58 = vmul.f32 0.6931472, %v4001_v48 }
 0x6ad   : >> { %v2232_v44 = vsel %vm2128_vm9, %v5556_v54, %v2224_v60  ;;  %v2219_v20 = vsel %vm2218_vm10, %v2216_v57, %v2213_v38  ;;  %v6303_v54 = vld [vmem:[#allocation52_spill] sm:$0xff] }
 0x6ae   : >> { %3539 = vmatpush3.bf16.msra.mxu1 %v3536_v24  ;;  %v3540_v26 = vpack.c.bf16 %v2233_v40, %v2232_v44  ;;  %v2210_v25 = vsel %vm2209_vm11, %v2207_v17, %v2204_v58  ;;  %v2227_v49 = vmul.f32 0.01, %v2219_v20  ;;  %v6315_v38 = vld [vmem:[#allocation64_spill] sm:$0xff] }
 0x6af   : >> { %v2226_v51 = vmul.f32 0.01, %v2210_v25  ;;  %v6316_v25 = vld [vmem:[#allocation65_spill] sm:$0xff] }
 0x6b0   : >> { %3541 = vmatprep.subr.bf16.mxu1 %v3540_v26  ;;  %v2235_v42 = vsel %vm2131_vm12, %v5566_v43, %v2227_v49  ;;  %v6308_v43 = vld [vmem:[#allocation57_spill] sm:$0xff] }
 0x6b1   : >> { %v2234_v52 = vsel %vm2130_vm13, %v5570_v8, %v2226_v51  ;;  %v6309_v8 = vld [vmem:[#allocation58_spill] sm:$0xff] }
 0x6b2   : >> { %3543 = vmatpush3.bf16.msra.mxu1 %v3540_v26  ;;  %v3544_v4 = vpack.c.bf16 %v2235_v42, %v2234_v52 }
 0x6b4   : >> { %3545 = vmatprep.subr.bf16.mxu1 %v3544_v4 }
 0x6b6   : >> { %3547 = vmatpush3.bf16.msra.mxu1 %v3544_v4 }
 0x6b9   : >> { %3423 = vmatmul.mubr.msk.f32.vlgmr.msra.gmra.mrb[0].mxu1 %vm791_vm0, %v6303_v54 }
 0x6ba   : >> { %3425 = vmatprep.mubr.msk.f32.mxu1 %vm791_vm0, %v6304_v30 }
 0x6bd   : >> { %3426 = vmatmul.mubr.msk.f32.gmra.mrb[2].mxu1 %vm791_vm0, %v6305_v15  ;;  %v6317_v15 = vld [vmem:[#allocation66_spill] sm:$0xff] }
 0x6be   : >> { %3428 = vmatprep.mubr.msk.f32.mxu1 %vm791_vm0, %v6306_v13 }
 0x6c1   : >> { %3429 = vmatmul.mubr.msk.f32.gmra.mrb[4].mxu1 %vm791_vm0, %v6307_v22 }
 0x6c2   : >> { %3431 = vmatprep.mubr.msk.f32.mxu1 %vm791_vm0, %v6308_v43 }
 0x6c5   : >> { %3432 = vmatmul.mubr.msk.f32.gmra.mrb[6].mxu1 %vm791_vm0, %v6309_v8 }
 0x6c6   : >> { %3465 = vmatprep.mubr.msk.f32.mxu1 %vm1471_vm6, %v5088_v19 }
 0x78c   : >> { %v3424_v7 = vpop.f32.mrb[0].mxu1 }
 0x78d   : >> { %v5672_v16 = vadd.f32 %v3424_v7, %v6310_v59  ;;  %v2302_v32 = vpop.f32.mrb[1].mxu1 }
 0x78e   : >> { %v5675_v6 = vadd.f32 %v2302_v32, %v6311_v18 }
 0x78f   : >> { %v5678_v2 = vmul.f32 100.0, %v5672_v16 }
 0x790   : >> { %v5681_v0 = vmul.f32 100.0, %v5675_v6  ;;  %v3427_v45 = vpop.f32.mrb[2].mxu1 }
 0x791   : >> { %v2350_v21 = vmin.f32 %v5678_v2, 20.0  ;;  %v5685_v36 = vadd.f32 %v3427_v45, %v6312_v23  ;;  %v2312_v29 = vpop.f32.mrb[3].mxu1  ;;  %vm2358_vm15 = vcmp.gt.f32.partialorder %v5678_v2, 20.0 }
 0x792   : >> { %v2349_v55 = vmin.f32 %v5681_v0, 20.0  ;;  %v5689_v37 = vadd.f32 %v2312_v29, %v6313_v35  ;;  %vm2357_vm2 = vcmp.gt.f32.partialorder %v5681_v0, 20.0 }
 0x793   : >> { %v2367_v10 = vmul.f32 1.442695, %v2350_v21  ;;  %v5692_v27 = vmul.f32 100.0, %v5685_v36 }
 0x794   : >> { %v2365_v47 = vmul.f32 1.442695, %v2349_v55  ;;  %v5695_v61 = vmul.f32 100.0, %v5689_v37  ;;  %v3430_v34 = vpop.f32.mrb[4].mxu1 }
 0x795   : >> { %4002 = vpow2.f32 %v2367_v10  ;;  %v2352_v24 = vmin.f32 %v5692_v27, 20.0  ;;  %v5699_v56 = vadd.f32 %v3430_v34, %v6314_v3  ;;  %v2322_v48 = vpop.f32.mrb[5].mxu1  ;;  %vm2360_vm8 = vcmp.gt.f32.partialorder %v5692_v27, 20.0 }
 0x796   : >> { %4004 = vpow2.f32 %v2365_v47  ;;  %v2351_v60 = vmin.f32 %v5695_v61, 20.0  ;;  %v5703_v57 = vadd.f32 %v2322_v48, %v6315_v38  ;;  %vm2359_vm9 = vcmp.gt.f32.partialorder %v5695_v61, 20.0 }
 0x797   : >> { %v2371_v40 = vmul.f32 1.442695, %v2352_v24  ;;  %v5706_v58 = vmul.f32 100.0, %v5699_v56 }
 0x798   : >> { %v2369_v17 = vmul.f32 1.442695, %v2351_v60  ;;  %v5709_v44 = vmul.f32 100.0, %v5703_v57  ;;  %v3433_v20 = vpop.f32.mrb[6].mxu1 }
 0x799   : >> { %4006 = vpow2.f32 %v2371_v40  ;;  %v2354_v26 = vmin.f32 %v5706_v58, 20.0  ;;  %v5713_v49 = vadd.f32 %v3433_v20, %v6316_v25  ;;  %v2332_v51 = vpop.f32.mrb[7].mxu1  ;;  %vm2362_vm12 = vcmp.gt.f32.partialorder %v5706_v58, 20.0 }
 0x79a   : >> { %4008 = vpow2.f32 %v2369_v17  ;;  %v2353_v42 = vmin.f32 %v5709_v44, 20.0  ;;  %v5721_v13 = vadd.f32 %v2332_v51, %v6317_v15  ;;  %vm2361_vm13 = vcmp.gt.f32.partialorder %v5709_v44, 20.0 }
 0x79b   : >> { %v2375_v52 = vmul.f32 1.442695, %v2354_v26  ;;  %v5717_v4 = vmul.f32 100.0, %v5713_v49 }
 0x79c   : >> { %v2373_v54 = vmul.f32 1.442695, %v2353_v42  ;;  %v5724_v32 = vmul.f32 100.0, %v5721_v13 }
 0x79d   : >> { %4010 = vpow2.f32 %v2375_v52  ;;  %v2356_v30 = vmin.f32 %v5717_v4, 20.0 }
 0x79e   : >> { %4012 = vpow2.f32 %v2373_v54  ;;  %v2355_v55 = vmin.f32 %v5724_v32, 20.0 }
 0x79f   : >> { %v4003_v22 = vpop.eup %4002  ;;  %v2379_v43 = vmul.f32 1.442695, %v2356_v30 }
 0x7a0   : >> { %v4005_v8 = vpop.eup %4004  ;;  %v2390_v7 = vadd.f32 1.0, %v4003_v22  ;;  %v2393_v21 = vmul.f32 -0.5, %v4003_v22  ;;  %v2396_v24 = vand.u32 2147483647, %v4003_v22  ;;  %v2377_v38 = vmul.f32 1.442695, %v2355_v55 }
 0x7a1   : >> { %v2381_v59 = vadd.f32 1.0, %v4005_v8  ;;  %4014 = vpow2.f32 %v2379_v43  ;;  %v2384_v35 = vmul.f32 -0.5, %v4005_v8  ;;  %v2387_v26 = vand.u32 2147483647, %v4005_v8 }
 0x7a2   : >> { %4016 = vlog2.f32 %v2390_v7  ;;  %v2394_v34 = vadd.f32 1.0, %v2393_v21  ;;  %vm5736_vm1 = vcmp.lt.f32.partialorder %v2396_v24, 0.0004427343 }
 0x7a3   : >> { %v4007_v18 = vpop.eup %4006  ;;  %4018 = vlog2.f32 %v2381_v59  ;;  %v2385_v40 = vadd.f32 1.0, %v2384_v35  ;;  %vm2388_vm4 = vcmp.lt.f32.partialorder %v2387_v26, 0.0004427343 }
 0x7a4   : >> { %v4009_v45 = vpop.eup %4008  ;;  %v2408_v23 = vadd.f32 1.0, %v4007_v18  ;;  %v2411_v48 = vmul.f32 -0.5, %v4007_v18  ;;  %v2414_v25 = vand.u32 2147483647, %v4007_v18  ;;  %v2395_v42 = vmul.f32 %v4003_v22, %v2394_v34 }
 0x7a5   : >> { %v2399_v29 = vadd.f32 1.0, %v4009_v45  ;;  %v2402_v17 = vmul.f32 -0.5, %v4009_v45  ;;  %v2386_v21 = vmul.f32 %v4005_v8, %v2385_v40  ;;  %v2405_v35 = vand.u32 2147483647, %v4009_v45 }
 0x7a6   : >> { %4020 = vlog2.f32 %v2408_v23  ;;  %v2412_v43 = vadd.f32 1.0, %v2411_v48  ;;  %vm5746_vm5 = vcmp.lt.f32.partialorder %v2414_v25, 0.0004427343 }
 0x7a7   : >> { %v5727_v10 = vpop.eup %4010  ;;  %4022 = vlog2.f32 %v2399_v29  ;;  %v2403_v23 = vadd.f32 1.0, %v2402_v17  ;;  %vm2406_vm3 = vcmp.lt.f32.partialorder %v2405_v35, 0.0004427343 }
 0x7a8   : >> { %v5729_v47 = vpop.eup %4012  ;;  %v2426_v3 = vadd.f32 1.0, %v5727_v10  ;;  %v2429_v7 = vmul.f32 -0.5, %v5727_v10  ;;  %v2432_v48 = vand.u32 2147483647, %v5727_v10  ;;  %v2413_v40 = vmul.f32 %v4007_v18, %v2412_v43 }
 0x7a9   : >> { %v2417_v60 = vadd.f32 1.0, %v5729_v47  ;;  %v2420_v29 = vmul.f32 -0.5, %v5729_v47 }
 0x7aa   : >> { %4024 = vlog2.f32 %v2426_v3  ;;  %v2430_v17 = vadd.f32 1.0, %v2429_v7  ;;  %vm2433_vm10 = vcmp.lt.f32.partialorder %v2432_v48, 0.0004427343 }
 0x7ab   : >> { %v5733_v20 = vpop.eup %4014  ;;  %4026 = vlog2.f32 %v2417_v60 }
 0x7ac   : >> { %v4017_v51 = vpop.eup %4016  ;;  %v2444_v54 = vadd.f32 1.0, %v5733_v20  ;;  %4028 = vpow2.f32 %v2377_v38  ;;  %v2431_v0 = vmul.f32 %v5727_v10, %v2430_v17  ;;  %v2450_v48 = vand.u32 2147483647, %v5733_v20 }
 0x7ad   : >> { %v4019_v30 = vpop.eup %4018  ;;  %v2392_v15 = vmul.f32 0.6931472, %v4017_v51  ;;  %v2404_v51 = vmul.f32 %v4009_v45, %v2403_v23 }
 0x7ae   : >> { %v2383_v59 = vmul.f32 0.6931472, %v4019_v30  ;;  %4030 = vlog2.f32 %v2444_v54  ;;  %v2423_v54 = vand.u32 2147483647, %v5729_v47 }
 0x7af   : >> { %v2398_v22 = vsel %vm5736_vm1, %v2395_v42, %v2392_v15  ;;  %v2421_v42 = vadd.f32 1.0, %v2420_v29 }
 0x7b0   : >> { %v4021_v34 = vpop.eup %4020  ;;  %v2454_v24 = vmul.f32 0.01, %v2398_v22  ;;  %v2389_v3 = vsel %vm2388_vm4, %v2386_v21, %v2383_v59  ;;  %vm2424_vm11 = vcmp.lt.f32.partialorder %v2423_v54, 0.0004427343  ;;  %v2447_v22 = vmul.f32 -0.5, %v5733_v20 }
 0x7b1   : >> { %v4023_v60 = vpop.eup %4022  ;;  %v2453_v8 = vmul.f32 0.01, %v2389_v3  ;;  %v2410_v38 = vmul.f32 0.6931472, %v4021_v34  ;;  %v2422_v21 = vmul.f32 %v5729_v47, %v2421_v42  ;;  %vm2363_vm4 = vcmp.gt.f32.partialorder %v5724_v32, 20.0 }
 0x7b2   : >> { %v2462_v26 = vsel %vm2358_vm15, %v5672_v16, %v2454_v24  ;;  %v2401_v25 = vmul.f32 0.6931472, %v4023_v60  ;;  %v2448_v24 = vadd.f32 1.0, %v2447_v22  ;;  %vm2451_vm15 = vcmp.lt.f32.partialorder %v2450_v48, 0.0004427343 }
 0x7b3   : >> { %v2461_v52 = vsel %vm2357_vm2, %v5675_v6, %v2453_v8  ;;  %v2416_v30 = vsel %vm5746_vm5, %v2413_v40, %v2410_v38  ;;  %vm2364_vm2 = vcmp.gt.f32.partialorder %v5717_v4, 20.0 }
 0x7b4   : >> { %v4025_v15 = vpop.eup %4024  ;;  %v3549_v18 = vpack.c.bf16 %v2462_v26, %v2461_v52  ;;  %v2456_v43 = vmul.f32 0.01, %v2416_v30  ;;  %v2407_v2 = vsel %vm2406_vm3, %v2404_v51, %v2401_v25  ;;  %v2449_v58 = vmul.f32 %v5733_v20, %v2448_v24 }
 0x7b5   : >> { %v4027_v16 = vpop.eup %4026  ;;  %v2455_v45 = vmul.f32 0.01, %v2407_v2  ;;  %v2428_v7 = vmul.f32 0.6931472, %v4025_v15 }
 0x7b6   : >> { %v2464_v6 = vsel %vm2360_vm8, %v5685_v36, %v2456_v43  ;;  %v2419_v59 = vmul.f32 0.6931472, %v4027_v16  ;;  %3550 = vmatpush3.bf16.msra.mxu0 %v3549_v18  ;;  %v4029_v23 = vpop.eup %4028  ;;  %vm2902_vm8 = vcmask 1040384  }
 0x7b7   : >> { %v2463_v29 = vsel %vm2359_vm9, %v5689_v37, %v2455_v45  ;;  %v2434_v27 = vsel %vm2433_vm10, %v2431_v0, %v2428_v7  ;;  %3551 = vmatprep.subr.bf16.mxu0 %v4280_v62  ;;  %v2435_v10 = vadd.f32 1.0, %v4029_v23  ;;  %v2438_v8 = vmul.f32 -0.5, %v4029_v23 }
 0x7b8   : >> { %v3552_v61 = vpack.c.bf16 %v2464_v6, %v2463_v29  ;;  %v2458_v55 = vmul.f32 0.01, %v2434_v27  ;;  %v2425_v35 = vsel %vm2424_vm11, %v2422_v21, %v2419_v59  ;;  %v4031_v34 = vpop.eup %4030  ;;  %v2441_v38 = vand.u32 2147483647, %v4029_v23 }
 0x7b9   : >> { %v2457_v36 = vmul.f32 0.01, %v2425_v35  ;;  %4032 = vlog2.f32 %v2435_v10  ;;  %v2446_v60 = vmul.f32 0.6931472, %v4031_v34  ;;  %v2439_v44 = vadd.f32 1.0, %v2438_v8 }
 0x7ba   : >> { %v2466_v47 = vsel %vm2362_vm12, %v5699_v56, %v2458_v55  ;;  %3553 = vmatpush3.bf16.msra.mxu0 %v3552_v61  ;;  %vm2442_vm1 = vcmp.lt.f32.partialorder %v2441_v38, 0.0004427343 }
 0x7bb   : >> { %v2465_v37 = vsel %vm2361_vm13, %v5703_v57, %v2457_v36  ;;  %3554 = vmatprep.subr.bf16.mxu0 %v4280_v62  ;;  %v2452_v56 = vsel %vm2451_vm15, %v2449_v58, %v2446_v60  ;;  %v2440_v26 = vmul.f32 %v4029_v23, %v2439_v44 }
 0x7bc   : >> { %v3555_v3 = vpack.c.bf16 %v2466_v47, %v2465_v37  ;;  %v2460_v17 = vmul.f32 0.01, %v2452_v56 }
 0x7be   : >> { %3556 = vmatpush3.bf16.msra.mxu0 %v3555_v3  ;;  %v2468_v51 = vsel %vm2364_vm2, %v5713_v49, %v2460_v17 }
 0x7bf   : >> { %3557 = vmatprep.subr.bf16.mxu0 %v4280_v62 }
 0x7c3   : >> { %v4033_v40 = vpop.eup %4032 }
 0x7c4   : >> { %v2437_v57 = vmul.f32 0.6931472, %v4033_v40 }
 0x7c6   : >> { %v2443_v25 = vsel %vm2442_vm1, %v2440_v26, %v2437_v57  ;;  %v2772_v26 = vrot.slane %v4216_v63, 1 }
 0x7c7   : >> { %v2459_v42 = vmul.f32 0.01, %v2443_v25  ;;  %v2776_v25 = vrot.slane %v4204_v12, 2 }
 0x7c9   : >> { %v2467_v20 = vsel %vm2363_vm4, %v5721_v13, %v2459_v42 }
 0x7ca   : >> { %v3558_v62 = vpack.c.bf16 %v2468_v51, %v2467_v20  ;;  %v2676_v51 = vrot.slane %v5332_v9, 4  ;;  %v2684_v20 = vrot.slane %v5334_v39, 4 }
 0x7cc   : >> { %3559 = vmatpush3.bf16.msra.mxu0 %v3558_v62 }
 0x7cf   : >> { %3451 = vmatmul.mubr.msk.f32.vlgmr.msra.gmra.mrb[8].mxu0 %vm791_vm0, %v4931_v28 }
 0x7d0   : >> { %3453 = vmatprep.mubr.msk.f32.mxu0 %vm4281_vm14, %v4282_v53 }
 0x7d3   : >> { %3454 = vmatmul.mubr.msk.f32.gmra.mrb[10].mxu0 %vm791_vm0, %v4936_v41 }
 0x7d4   : >> { %3456 = vmatprep.mubr.msk.f32.mxu0 %vm4281_vm14, %v4282_v53 }
 0x7d7   : >> { %3457 = vmatmul.mubr.msk.f32.gmra.mrb[12].mxu0 %vm791_vm0, %v4943_v46 }
 0x8a2   : >> { %v2535_v49 = vpop.f32.mrb[8].mxu0 }
 0x8a3   : >> { %v3452_v4 = vpop.f32.mrb[9].mxu0  ;;  %v2536_v13 = vadd.f32 %v2535_v49, %v5102_v31 }
 0x8a4   : >> { %v2774_v4 = vmul.f32 %v2772_v26, %v5314_v33 }
 0x8a5   : >> { %v2549_v54 = vmul.f32 20.0, %v2536_v13 }
 0x8a6   : >> { %v2540_v32 = vpop.f32.mrb[10].mxu0 }
 0x8a7   : >> { %v2541_v52 = vadd.f32 %v2540_v32, %v5104_v14  ;;  %v3455_v30 = vpop.f32.mrb[11].mxu0  ;;  %v2672_v32 = vrot.slane %v5321_v5, 4 }
 0x8a9   : >> { %v2550_v15 = vmul.f32 20.0, %v2541_v52 }
 0x8aa   : >> { %v2545_v18 = vpop.f32.mrb[12].mxu0 }
 0x8ab   : >> { %v2552_v43 = vmax.f32 %v2549_v54, %v2550_v15  ;;  %v2546_v2 = vadd.f32 %v2545_v18, %v5108_v11  ;;  %v3458_v16 = vpop.f32.mrb[13].mxu0 }
 0x8ac   : >> { %v6323_v16 = vld [vmem:[#allocation82_spill] sm:$0xff] }
 0x8ad   : >> { %v2551_v45 = vmul.f32 20.0, %v2546_v2 }
 0x8af   : >> { %v2553_v7 = vmax.f32 %v2552_v43, %v2551_v45 }
 0x8b1   : >> { %v2554_v0 = vrot.slane %v2553_v7, 4 }
 0x8b3   : >> { %v2555_v6 = vmax.f32 %v2553_v7, %v2554_v0 }
 0x8b5   : >> { %v2556_v59 = vrot.slane %v2555_v6, 2 }
 0x8b7   : >> { %v2557_v21 = vmax.f32 %v2555_v6, %v2556_v59 }
 0x8b9   : >> { %v2558_v23 = vrot.slane %v2557_v21, 1 }
 0x8bb   : >> { %v2559_v29 = vmax.f32 %v2557_v21, %v2558_v23  ;;  %v6324_v21 = vld [vmem:[#allocation78_spill] sm:$0xff] }
 0x8bc   : >> { %v2761_v23 = vrot.slane %v6324_v21, 2 }
 0x8bd   : >> { %v2560_v27 = vsub.f32 %v2549_v54, %v2559_v29  ;;  %v2561_v22 = vsub.f32 %v2550_v15, %v2559_v29  ;;  %v2562_v61 = vsub.f32 %v2551_v45, %v2559_v29  ;;  %v2747_v54 = vrot.slane %v4224_v50, 5  ;;  %v6322_v15 = vld [vmem:[#allocation77_spill] sm:$0xff] }
 0x8be   : >> { %v2751_v18 = vrot.slane %v6322_v15, 6  ;;  %v2778_v45 = vmul.f32 %v2776_v25, %v6323_v16  ;;  %v6328_v25 = vld [vmem:[#allocation67_spill] sm:$0xff] }
 0x8bf   : >> { %v2563_v55 = vmul.f32 1.442695, %v2560_v27  ;;  %v2565_v35 = vmul.f32 1.442695, %v2561_v22  ;;  %v2567_v10 = vmul.f32 1.442695, %v2562_v61 }
 0x8c1   : >> { %4034 = vpow2.f32 %v2563_v55 }
 0x8c2   : >> { %4036 = vpow2.f32 %v2565_v35 }
 0x8c3   : >> { %4038 = vpow2.f32 %v2567_v10  ;;  %v2749_v10 = vmul.f32 %v2747_v54, %v5314_v33 }
 0x8cb   : >> { %v4035_v36 = vpop.eup %4034 }
 0x8cc   : >> { %v4037_v34 = vpop.eup %4036 }
 0x8cd   : >> { %v2569_v47 = vadd.f32 %v4037_v34, %v4035_v36  ;;  %v4039_v37 = vpop.eup %4038 }
 0x8cf   : >> { %v2570_v24 = vadd.f32 %v4039_v37, %v2569_v47 }
 0x8d1   : >> { %v2571_v3 = vrot.slane %v2570_v24, 4 }
 0x8d3   : >> { %v2572_v48 = vadd.f32 %v2571_v3, %v2570_v24 }
 0x8d5   : >> { %v2573_v60 = vrot.slane %v2572_v48, 2 }
 0x8d7   : >> { %v2574_v8 = vadd.f32 %v2573_v60, %v2572_v48  ;;  %v2763_v60 = vmul.f32 %v2761_v23, %v5314_v33 }
 0x8d9   : >> { %v2575_v58 = vrot.slane %v2574_v8, 1 }
 0x8db   : >> { %v2576_v56 = vadd.f32 %v2575_v58, %v2574_v8  ;;  %v6325_v8 = vld [vmem:[#allocation75_spill] sm:$0xff] }
 0x8dc   : >> { %v2756_v58 = vrot.slane %v6325_v8, 4 }
 0x8dd   : >> { %4040 = vrcp.f32 %v2576_v56 }
 0x8e7   : >> { %v4041_v44 = vpop.eup %4040 }
 0x8e8   : >> { %v2578_v38 = vmul.f32 %v4041_v44, %v4035_v36  ;;  %v2579_v40 = vmul.f32 %v4041_v44, %v4037_v34  ;;  %v2580_v17 = vmul.f32 %v4041_v44, %v4039_v37  ;;  %v2753_v36 = vmul.f32 %v2751_v18, %v6323_v16  ;;  %v6332_v18 = vld [vmem:[#allocation79_spill] sm:$0xff] }
 0x8ea   : >> { %v3560_v57 = vpack.c.bf16 %v2579_v40, %v2578_v38  ;;  %v6326_v38 = vld [vmem:[#allocation76_spill] sm:$0xff] }
 0x8eb   : >> { %v2764_v40 = vmul.f32 %v6326_v38, %v6323_v16 }
 0x8ec   : >> { %3561 = vmatprep.subr.bf16.mxu1 %v3560_v57 }
 0x8ed   : >> { %3563 = vmatpush3.bf16.msra.mxu1 %v3560_v57 }
 0x8ee   : >> { %3463 = vmatprep.subr.mxu1 %v2580_v17 }
 0x8f1   : >> { %3464 = vmatpush3.msra.mxu1 %v2580_v17  ;;  %v6327_v17 = vld [vmem:[#allocation74_spill] sm:$0xff] }
 0x8f2   : >> { %3466 = vmatmul.mubr.msk.f32.vlgmr.msra.gmra.mrb[8].mxu1 %vm1471_vm6, %v5112_v1  ;;  %v2767_v57 = vrot.slane %v6327_v17, 1 }
 0x9c5   : >> { %v3467_v42 = vpop.f32.mrb[8].mxu1 }
 0x9c6   : >> { %v2693_v62 = vmul.f32 %v3467_v42, %v5332_v9  ;;  %v2698_v49 = vmul.f32 %v3467_v42, %v5334_v39  ;;  %v2647_v13 = vpop.f32.mrb[9].mxu1  ;;  %v2692_v43 = vmul.f32 %v3467_v42, %v5321_v5  ;;  %v2704_v47 = vrot.slane %v3467_v42, 3 }
 0x9c7   : >> { %v2657_v52 = vmul.f32 %v2647_v13, %v5332_v9  ;;  %v2662_v30 = vmul.f32 %v2647_v13, %v5334_v39  ;;  %v2678_v7 = vmul.f32 %v2676_v51, %v2647_v13  ;;  %v2656_v0 = vmul.f32 %v2647_v13, %v5321_v5 }
 0x9c8   : >> { %v2695_v2 = vrot.slane %v2693_v62, 1  ;;  %v2686_v59 = vmul.f32 %v2684_v20, %v2647_v13  ;;  %v2700_v27 = vrot.slane %v2698_v49, 2  ;;  %v2674_v22 = vmul.f32 %v2672_v32, %v2647_v13  ;;  %v6330_v62 = vld [vmem:[#allocation83_spill] sm:$0xff]  ;;  %v6331_v49 = vld [vmem:[#allocation73_spill] sm:$0xff] }
 0x9c9   : >> { %v2659_v6 = vrot.slane %v2657_v52, 1  ;;  %v2680_v61 = vrot.slane %v2678_v7, 1  ;;  %v2664_v35 = vrot.slane %v2662_v30, 2  ;;  %v2668_v48 = vrot.slane %v2647_v13, 3 }
 0x9ca   : >> { %v2697_v29 = vadd.f32 %v2695_v2, %v2692_v43  ;;  %v2688_v24 = vrot.slane %v2686_v59, 2  ;;  %v6329_v51 = vrot.slane %v6328_v25, 2  ;;  %v2779_v42 = vadd.f32 %v2778_v45, %v2774_v4  ;;  %v6334_v59 = vld [vmem:[#allocation81_spill] sm:$0xff] }
 0x9cb   : >> { %v2661_v55 = vadd.f32 %v2659_v6, %v2656_v0  ;;  %v2682_v37 = vadd.f32 %v2680_v61, %v2674_v22  ;;  %v2780_v32 = vmul.f32 %v6331_v49, %v6330_v62  ;;  %v2754_v30 = vadd.f32 %v2753_v36, %v2749_v10 }
 0x9cc   : >> { %v2702_v34 = vadd.f32 %v2700_v27, %v2697_v29  ;;  %v2758_v54 = vmul.f32 %v2756_v58, %v6330_v62  ;;  %v6333_v2 = vrot.slane %v6328_v25, 5  ;;  %v2765_v0 = vadd.f32 %v2764_v40, %v2763_v60  ;;  %v6336_v27 = vld [vmem:[#allocation80_spill] sm:$0xff] }
 0x9cd   : >> { %v2666_v3 = vadd.f32 %v2664_v35, %v2661_v55  ;;  %v2690_v44 = vadd.f32 %v2688_v24, %v2682_v37  ;;  %v2769_v6 = vmul.f32 %v2767_v57, %v6330_v62  ;;  %v5832_v29 = vadd.f32 %v2780_v32, %v2779_v42 }
 0x9ce   : >> { %v2706_v56 = vadd.f32 %v2704_v47, %v2702_v34  ;;  %v5835_v55 = vadd.f32 %v2758_v54, %v2754_v30 }
 0x9cf   : >> { %v2670_v26 = vadd.f32 %v2668_v48, %v2666_v3  ;;  %v2691_v13 = vadd.f32 %v2690_v44, %v2668_v48  ;;  %v5837_v36 = vadd.f32 %v2769_v6, %v2765_v0 }
 0x9d0   : >> { %v2716_v20 = vsub.f32 %v2706_v56, %v6329_v51 }
 0x9d1   : >> { %v2707_v52 = vsub.f32 %v2670_v26, %v6328_v25  ;;  %v2710_v7 = vsub.f32 %v2691_v13, %v6333_v2 }
 0x9d2   : >> { %v2717_v43 = vsub.f32 %v2716_v20, %v6332_v18 }
 0x9d3   : >> { %v2708_v23 = vsub.f32 %v2707_v52, %v6334_v59  ;;  %v2711_v22 = vsub.f32 %v2710_v7, %v6336_v27 }
 0x9d4   : >> { %v2718_v45 = vsel %vm1738_vm7, %v2717_v43, 0.0 }
 0x9d5   : >> { %v2809_v61 = vrot.slane %v2718_v45, 6  ;;  %v2794_v35 = vrot.slane %v2718_v45, 7  ;;  %v2713_v10 = vrot.slane %v2711_v22, 4  ;;  %v2709_v34 = vsel %vm1738_vm7, %v2708_v23, 0.0 }
 0x9d6   : >> { %v2826_v47 = vmul.f32 %v6331_v49, %v2718_v45  ;;  %v2846_v37 = vmul.f32 %v5832_v29, %v2718_v45  ;;  %v5846_v3 = vadd.f32 %v6332_v18, %v2718_v45   ;;  %v2801_v48 = vrot.slane %v2709_v34, 2 }
 0x9d7   : >> { %v2715_v24 = vsel %vm1738_vm7, %v2713_v10, 0.0  ;;  %v2811_v60 = vmul.f32 %v4204_v12, %v2809_v61  ;;  %v2783_v44 = vrot.slane %v2709_v34, 3  ;;  %v2796_v40 = vmul.f32 %v4216_v63, %v2794_v35 }
 0x9d8   : >> { %v2786_v58 = vrot.slane %v2715_v24, 6  ;;  %v2804_v56 = vmul.f32 %v6326_v38, %v2715_v24  ;;  %v2819_v57 = vrot.slane %v2715_v24, 7  ;;  %v2844_v26 = vmul.f32 %v5837_v36, %v2715_v24 }
 0x9d9   : >> { %v2721_v51 = vrot.slane %v2715_v24, 4  ;;  %v5854_v54 = vadd.f32 %v6334_v59, %v2709_v34   ;;  %v2803_v32 = vmul.f32 %v6322_v15, %v2801_v48  ;;  %v2816_v52 = vrot.slane %v2709_v34, 4 }
 0x9da   : >> { %v2788_v20 = vmul.f32 %v6324_v21, %v2786_v58  ;;  %v2806_v42 = vrot.slane %v2804_v56, 2  ;;  %v2821_v13 = vmul.f32 %v6327_v17, %v2819_v57  ;;  %v2843_v30 = vmul.f32 %v5835_v55, %v2709_v34 }
 0x9db   : >> { %v5859_v51 = vadd.f32 %v6336_v27, %v2721_v51   ;;  %v2813_v18 = vrot.slane %v2811_v60, 4  ;;  %v2785_v2 = vmul.f32 %v4224_v50, %v2783_v44  ;;  %v2818_v59 = vmul.f32 %v6325_v8, %v2816_v52 }
 0x9dc   : >> { %v2790_v43 = vrot.slane %v2788_v20, 5  ;;  %v2808_v7 = vadd.f32 %v2806_v42, %v2803_v32  ;;  %v2823_v0 = vrot.slane %v2821_v13, 5  ;;  %v2845_v23 = vadd.f32 %v2844_v26, %v2843_v30  ;;  %v6337_v20 = vld [vmem:[#allocation69_spill] sm:$0xff]  ;;  %v6341_v13 = vld [vmem:[#allocation71_spill] sm:$0xff] }
 0x9dd   : >> { %v2726_v6 = vmul.f32 %v5859_v51, %v5859_v51  ;;  %v2798_v4 = vrot.slane %v2796_v40, 4  ;;  %v2828_v45 = vrot.slane %v2826_v47, 4  ;;  %v2725_v61 = vmul.f32 %v5854_v54, %v5854_v54 }
 0x9de   : >> { %v2792_v22 = vadd.f32 %v2790_v43, %v2785_v2  ;;  %v2815_v27 = vadd.f32 %v2813_v18, %v2808_v7  ;;  %v2825_v10 = vadd.f32 %v2823_v0, %v2818_v59  ;;  %v2847_v34 = vadd.f32 %v2846_v37, %v2845_v23  ;;  %v6339_v37 = vld [vmem:[#allocation72_spill] sm:$0xff]  ;;  %v6343_v43 = vld [vmem:[#allocation70_spill] sm:$0xff] }
 0x9df   : >> { %v2728_v35 = vrot.slane %v2726_v6, 4  ;;  %v2731_v60 = vmul.f32 %v5846_v3, %v5846_v3  ;;  %v2736_v56 = vrot.slane %v5332_v9, 1  ;;  %v2739_v44 = vrot.slane %v5334_v39, 2 }
 0x9e0   : >> { %v2800_v24 = vadd.f32 %v2798_v4, %v2792_v22  ;;  %v2830_v58 = vadd.f32 %v2828_v45, %v2825_v10  ;;  %vm2848_vm7 = vcmp.ge.f32.partialorder %v2847_v34, 0.0  ;;  %v4283_v47 = vmov -1e-06  }
 0x9e1   : >> { %v2730_v48 = vadd.f32 %v2728_v35, %v2725_v61  ;;  %v2849_v40 = vsel %vm2848_vm7, 1e-06, %v4283_v47  ;;  %v2836_v32 = vrot.slane %v2815_v27, 6 }
 0x9e2   : >> { %v2850_v26 = vadd.f32 %v2849_v40, %v2847_v34  ;;  %v2832_v42 = vrot.slane %v2800_v24, 5  ;;  %v2840_v7 = vrot.slane %v2830_v58, 4 }
 0x9e3   : >> { %v2732_v57 = vadd.f32 %v2731_v60, %v2730_v48  ;;  %v2838_v0 = vsub.f32 %v6323_v16, %v2836_v32 }
 0x9e4   : >> { %4042 = vrcp.f32 %v2850_v26  ;;  %v2834_v6 = vsub.f32 %v5314_v33, %v2832_v42  ;;  %v2842_v23 = vsub.f32 %v6330_v62, %v2840_v7 }
 0x9e5   : >> { %vm2733_vm14 = vcmp.lt.f32.partialorder %v2732_v57, %v6337_v20  ;;  %vm2743_vm3 = vcmp.lt.f32.partialorder %v2732_v57, 1.0  ;;  %v2877_v61 = vmul.f32 %v2838_v0, %v5837_v36 }
 0x9e6   : >> { %v5874_v4 = vsel %vm2733_vm14, %v2732_v57, %v6337_v20   ;;  %v5878_v48 = vsel %vm2733_vm14, %v5321_v5, %v6339_v37   ;;  %v5881_v40 = vsel %vm2733_vm14, %v2736_v56, %v6341_v13   ;;  %v5884_v13 = vsel %vm2733_vm14, %v2739_v44, %v6343_v43  }
 0x9e7   : >> { %v6338_v52 = vmov %v5874_v4  ;;  %v6340_v30 = vmov %v5878_v48  ;;  %v6342_v18 = vmov %v5881_v40  ;;  %v6344_v2 = vmov %v5884_v13 }
 0x9e8   : >> { %vm2742_vm5 = vcmp.gt.f32.partialorder %v6338_v52, 1e-10  ;;  %v2871_v4 = vmul.f32 %v2838_v0, %v5835_v55  ;;  %v2853_v45 = vmul.f32 %v2834_v6, %v5835_v55  ;;  %v2859_v22 = vmul.f32 %v2834_v6, %v5837_v36 }
 0x9e9   : >> { %vm2744_vm9 = vmand %vm2742_vm5, %vm2743_vm3  ;;  %v2865_v27 = vmul.f32 %v2834_v6, %v5832_v29  ;;  %v2886_v16 = vmul.f32 %v2842_v23, %v5835_v55  ;;  %v2892_v33 = vmul.f32 %v2842_v23, %v5837_v36  ;;  %v2898_v62 = vmul.f32 %v2842_v23, %v5832_v29 }
 0x9ea   : >> { %v2745_v34 = vsel %vm2744_vm9, 1.0, %v4282_v53   ;;  %v2880_v53 = vmul.f32 %v2838_v0, %v5832_v29 }
 0x9eb   : >> { %v2903_v59 = vsel %vm2902_vm8, %v2745_v34, -inf }
 0x9ec   : >> { %2904 = vmax.xlane.f32.xlu0 %v2903_v59 }
 0x9ee   : >> { %v4043_v35 = vpop.eup %4042 }
 0x9ef   : >> { %v2854_v10 = vmul.f32 %v4043_v35, %v2853_v45  ;;  %v2860_v24 = vmul.f32 %v4043_v35, %v2859_v22  ;;  %v2866_v48 = vmul.f32 %v4043_v35, %v2865_v27  ;;  %v2872_v60 = vmul.f32 %v4043_v35, %v2871_v4 }
 0x9f0   : >> { %v2878_v58 = vmul.f32 %v4043_v35, %v2877_v61  ;;  %v2881_v56 = vmul.f32 %v4043_v35, %v2880_v53  ;;  %v2887_v44 = vmul.f32 %v4043_v35, %v2886_v16  ;;  %v2893_v47 = vmul.f32 %v4043_v35, %v2892_v33 }
 0x9f1   : >> { %v2856_v40 = vrot.slane %v2854_v10, 3  ;;  %v2862_v57 = vrot.slane %v2860_v24, 6  ;;  %v2868_v26 = vrot.slane %v2866_v48, 7  ;;  %v2874_v20 = vrot.slane %v2872_v60, 2 }
 0x9f2   : >> { %v2879_v24 = vadd.f32 %v6326_v38, %v2878_v58   ;;  %v2883_v42 = vrot.slane %v2881_v56, 6  ;;  %v2889_v55 = vrot.slane %v2887_v44, 4  ;;  %v2895_v32 = vrot.slane %v2893_v47, 7 }
 0x9f3   : >> { %v2858_v50 = vadd.f32 %v4224_v50, %v2856_v40   ;;  %v2864_v6 = vadd.f32 %v6324_v21, %v2862_v57   ;;  %v2870_v63 = vadd.f32 %v4216_v63, %v2868_v26   ;;  %v2876_v44 = vadd.f32 %v6322_v15, %v2874_v20  }
 0x9f4   : >> { %v2885_v12 = vadd.f32 %v4204_v12, %v2883_v42   ;;  %v2891_v37 = vadd.f32 %v6325_v8, %v2889_v55   ;;  %v2897_v21 = vadd.f32 %v6327_v17, %v2895_v32   ;;  %v2899_v29 = vmul.f32 %v4043_v35, %v2898_v62 }
 0x9f5   : >> { %v6346_v4 = vmov %v6338_v52  ;;  %v6348_v40 = vmov %v6342_v18  ;;  %v6349_v48 = vmov %v6340_v30  ;;  %v6350_v27 = vmov %v5846_v3 }
 0x9f6   : >> { %v2900_v32 = vadd.f32 %v6331_v49, %v2899_v29  }
 0xa79   : >> { %v2905_v38 = vpop.xlane.xlu0 %2904 }
 0xa7a   : >> { %v2906_v36 = vrot.slane %v2905_v38, 4 }
 0xa7c   : >> { %v2907_v13 = vmax.f32 %v2905_v38, %v2906_v36 }
 0xa7e   : >> { %v2908_v43 = vrot.slane %v2907_v13, 2 }
 0xa80   : >> { %v2909_v7 = vmax.f32 %v2907_v13, %v2908_v43  ;;  %v6347_v13 = vmov %v6344_v2 }
 0xa82   : >> { %v2910_v0 = vrot.slane %v2909_v7, 1 }
 0xa84   : >> { %v2911_v59 = vmax.f32 %v2909_v7, %v2910_v0 }
 0xa86   : >> { %3566 = vpush %v2911_v59 }
 0xab7   : >> { %s3567_s26 = spop %3566 }
 0xab8   : >> { %p1733_p7 = scmp.gt.f32.partialorder %s3567_s26, 0.5 }
 0xaba   : >> { %p5911_p8 = pnand %p1733_p7, %p1732_p6 }
 0xabb   : > { %v6352_v36 = vmov (%p5911_p8), %v6338_v52  ;;  %v6353_v3 = vmov (%p5911_p8), %v6344_v2  ;;  %v6354_v53 = vmov (%p5911_p8), %v6342_v18  ;;  %v6355_v10 = vmov (%p5911_p8), %v6340_v30 }
 0xabc   : > { %1737 = sbr.rel (!%p5911_p8) target bundleno = 1365 (0x555), region = 103 }
 0xac3 PF: > { %v2914_v5 = vrot.slane %v4264_v53, 7  ;;  %v2917_v28 = vrot.slane %v4260_v3, 6  ;;  %vm2919_vm0 = vcmask 1040384   ;;  %vm2921_vm6 = vcmask 1041408   ;;  %v4268_v10 = vphi %v6204_v10, %v6355_v10   ;;  %v4264_v53 = vphi %v6203_v53, %v6354_v53   ;;  %v4260_v3 = vphi %v6202_v3, %v6353_v3   ;;  %v4256_v36 = vphi %v6201_v36, %v6352_v36  }
 0xac4   : > { %4044 = vrsqrt.f32 %v4256_v36  ;;  %vm2926_vm10 = vcmp.eq.f32.partialorder %v4256_v36, inf  ;;  %v2929_v31 = vand.u32 2147483648, %v4256_v36  ;;  %vm2928_vm11 = vcmp.eq.f32.partialorder %v4256_v36, 0.0 }
 0xac5   : > { %v2920_v41 = vsel %vm2919_vm0, %v4268_v10, %v2914_v5 }
 0xac6   : > { %v2922_v46 = vsel %vm2921_vm6, %v2920_v41, %v2917_v28 }
 0xac7   : > { %2923 = vst [vmem:[%s390_s22] sm:$0x7] %v2922_v46 }
 0xace   : > { %v4045_v19 = vpop.eup %4044 }
 0xacf   : > { %v2925_v14 = vmul.f32 %v4256_v36, %v4045_v19 }
 0xad1   : > { %v2927_v11 = vsel %vm2926_vm10, %v4256_v36, %v2925_v14 }
 0xad2   : > { %v2930_v1 = vsel %vm2928_vm11, %v2929_v31, %v2927_v11 }
 0xad3   : > { %2931 = vst [vmem:[%s396_s16] sm:$0x1] %v2930_v1 }
 0xad4 PF: > { %s19_s29 = sadd.s32 1, %s4168_s29   ;;  %s6356_s27 = smov %s4164_s28 }
 0xad5   : > { %p16_p9 = scmp.ge.s32.totalorder %s19_s29, 4   ;;  %s6357_s28 = smov %s6359_s30 }
 0xad7   :  { %18 = sbr.rel (!%p16_p9) target bundleno = 2 (0x2), region = 114 }

</bundles_post_ra>
